<compile_context>
chip_gen: v5e
topology: v5e:2x2
jax: 0.10.0
libtpu: 0.0.40
codegen_flags: <defaults>
</compile_context>

<pallas_src>
import functools

import numpy as np
import jax
import jax.numpy as jnp
from jax.experimental import pallas as pl
from jax.experimental.pallas import tpu as pltpu


def _cbam_kernel(x_ref, w1t_ref, b1_ref, w2_ref, b2_ref, wm_ref, bsp_ref, o_ref,
                 *, Bn, C, H, W, mid):
    HW = H * W
    x = x_ref[...].astype(jnp.float32)              # (Bn, C, HW)

    # ---------------- Channel attention ----------------
    # keepdims pooling keeps the natural slab/(sublane,lane) layout.
    v_avg = jnp.mean(x, axis=2, keepdims=True)      # (Bn, C, 1)  lane reduce
    v_max = jnp.max(x, axis=2, keepdims=True)       # (Bn, C, 1)

    w1t = w1t_ref[...]                              # (C, mid) == W1.T
    b1 = b1_ref[...]                                # (1, mid)
    w2 = w2_ref[...]                                # (C, mid) == W2
    b2 = b2_ref[...]                                # (C, 1)

    # Shared MLP, fused: layer 2 is linear, so
    #   mlp(avg) + mlp(max) = W2 @ (relu(W1 avg + b1) + relu(W1 max + b1)) + 2*b2
    # Tiny C -> broadcast + sublane reduce; for C >= 128 switch to an MXU matmul.
    h_avg = jnp.maximum(jnp.sum(v_avg * w1t, axis=1, keepdims=True) + b1, 0.0)  # (Bn,1,mid)
    h_max = jnp.maximum(jnp.sum(v_max * w1t, axis=1, keepdims=True) + b1, 0.0)  # (Bn,1,mid)
    h = h_avg + h_max                                                            # (Bn,1,mid)
    logits = jnp.sum(h * w2, axis=2, keepdims=True) + 2.0 * b2                   # (Bn,C,1)
    a_ch = jax.nn.sigmoid(logits)                                                # (Bn,C,1)
    x_att = x * a_ch                                                             # (Bn,C,HW)

    # ---------------- Spatial attention ----------------
    mean_map = jnp.mean(x_att, axis=1, keepdims=True)    # (Bn, 1, HW) sublane reduce
    max_map = jnp.max(x_att, axis=1, keepdims=True)      # (Bn, 1, HW)
    cat = jnp.concatenate([mean_map, max_map], axis=1)   # (Bn, 2, HW)

    # 7x7 conv with zero padding == 49 lane rolls of the stacked flattened map.
    # wm_ref[t] = (2, HW): w_spatial[c, ky, kx] * in_bounds(p, dy, dx) (host-built),
    # so rolled values that wrapped across a row / the image are zeroed.
    # Rolling mean & max together halves the roll count; 4 independent
    # accumulators break the 49-tap add dependency chain.
    accs = [jnp.zeros((Bn, 2, HW), jnp.float32) for _ in range(4)]
    t = 0
    for ky in range(7):
        dy = ky - 3
        for kx in range(7):
            dx = kx - 3
            shift = (-(dy * W + dx)) % HW
            r = cat if shift == 0 else pltpu.roll(cat, shift=shift, axis=2)
            accs[t % 4] = accs[t % 4] + r * wm_ref[t]     # (2,HW) bcast over Bn
            t += 1
    conv2 = (accs[0] + accs[1]) + (accs[2] + accs[3])     # (Bn, 2, HW)
    conv = jnp.sum(conv2, axis=1, keepdims=True)          # (Bn, 1, HW)
    a_sp = jax.nn.sigmoid(conv + bsp_ref[0])              # (Bn, 1, HW)

    o_ref[...] = (x_att * a_sp).astype(o_ref.dtype)


def _spatial_weight_masks(wsp, H, W):
    """wm[t, c, p] = wsp[0, c, ky, kx] if tap t=(ky,kx) at pixel p stays in-image, else 0."""
    HW = H * W
    ys, xs = np.divmod(np.arange(HW), W)
    masks = np.zeros((49, HW), np.float32)
    t = 0
    for ky in range(7):
        dy = ky - 3
        for kx in range(7):
            dx = kx - 3
            valid = (ys + dy >= 0) & (ys + dy < H) & (xs + dx >= 0) & (xs + dx < W)
            masks[t] = valid.astype(np.float32)
            t += 1
    w = jnp.asarray(wsp, jnp.float32).reshape(2, 49)            # (c, tap)
    # (49, 2, HW): each tap's (2, HW) slice is a contiguous slab in VMEM.
    return jnp.transpose(w)[:, :, None] * jnp.asarray(masks)[:, None, :]


def cbam_forward(x, params, *, block_n=None, block_bytes_budget=2 * 1024 * 1024):
    N, C, H, W = x.shape
    HW = H * W
    mid = params["w1"].shape[0]

    # Block several images per grid step (largest divisor of N under the VMEM
    # budget).  Budget is conservative so the double-buffered in + out blocks
    # fit every generation's scoped VMEM (incl. v7x's 64 MiB physical).
    if block_n is None:
        per_img = C * HW * x.dtype.itemsize
        block_n = 1
        for d in range(1, N + 1):
            if N % d == 0 and d * per_img <= block_bytes_budget:
                block_n = d
    Bn = block_n
    assert N % Bn == 0

    x_flat = x.reshape(N, C, HW)                     # lane-dense: H*W on the lane axis
    w1t = jnp.transpose(params["w1"])                # (C, mid)
    b1_row = params["b1"].reshape(1, mid)            # (1, mid)
    w2 = params["w2"]                                # (C, mid)
    b2_col = params["b2"].reshape(C, 1)              # (C, 1)
    wm = _spatial_weight_masks(params["wsp"], H, W)  # (49, 2, HW)
    bsp = params["bsp"].reshape(1).astype(jnp.float32)

    kernel = functools.partial(_cbam_kernel, Bn=Bn, C=C, H=H, W=W, mid=mid)
    grid_spec = pltpu.PrefetchScalarGridSpec(
        num_scalar_prefetch=0,
        grid=(N // Bn,),
        in_specs=[
            pl.BlockSpec((Bn, C, HW), lambda n: (n, 0, 0)),        # x (lane-dense)
            pl.BlockSpec((C, mid), lambda n: (0, 0)),              # W1.T
            pl.BlockSpec((1, mid), lambda n: (0, 0)),              # b1
            pl.BlockSpec((C, mid), lambda n: (0, 0)),              # W2
            pl.BlockSpec((C, 1), lambda n: (0, 0)),                # b2
            pl.BlockSpec((49, 2, HW), lambda n: (0, 0, 0)),        # weighted border masks
            pl.BlockSpec(memory_space=pltpu.MemorySpace.SMEM),     # spatial-conv bias
        ],
        out_specs=pl.BlockSpec((Bn, C, HW), lambda n: (n, 0, 0)),
    )
    out = pl.pallas_call(
        kernel,
        out_shape=jax.ShapeDtypeStruct((N, C, HW), x.dtype),
        grid_spec=grid_spec,
        compiler_params=pltpu.CompilerParams(
            dimension_semantics=("parallel",),       # batch axis -> both TCs on v7x
            vmem_limit_bytes=32 * 1024 * 1024,
        ),
    )(x_flat, w1t, b1_row, w2, b2_col, wm, bsp)
    return out.reshape(N, C, H, W)


def cbam_reference(x, p):
    # Pure-JAX reference mirroring the PyTorch forward (for validation).
    avg = jnp.mean(x, axis=(2, 3), keepdims=True)
    mx = jnp.max(x, axis=(2, 3), keepdims=True)

    def mlp(v):  # v: (N, C, 1, 1)
        v2 = v[:, :, 0, 0]
        h = jax.nn.relu(v2 @ p["w1"].T + p["b1"][:, 0])
        o = h @ p["w2"].T + p["b2"][:, 0]
        return o[:, :, None, None]

    a_ch = jax.nn.sigmoid(mlp(avg) + mlp(mx))
    xc = a_ch * x
    cat = jnp.concatenate(
        [jnp.mean(xc, axis=1, keepdims=True), jnp.max(xc, axis=1, keepdims=True)],
        axis=1)
    conv = jax.lax.conv_general_dilated(
        cat, p["wsp"], window_strides=(1, 1), padding=((3, 3), (3, 3)),
        dimension_numbers=("NCHW", "OIHW", "NCHW")) + p["bsp"].reshape(1, 1, 1, 1)
    a_sp = jax.nn.sigmoid(conv)
    return a_sp * xc


if __name__ == "__main__":
    N, C, H, W = 2, 4, 16, 16
    r = 2
    mid = C // r

    key = jax.random.PRNGKey(0)
    kx_, k1, k2, k3, k4, k5, k6 = jax.random.split(key, 7)

    x = jax.random.normal(kx_, (N, C, H, W), jnp.float32)
    params = {
        "w1": jax.random.normal(k1, (mid, C), jnp.float32) * 0.5,      # Conv2d(C, mid, 1)
        "b1": jax.random.normal(k2, (mid, 1), jnp.float32) * 0.1,
        "w2": jax.random.normal(k3, (C, mid), jnp.float32) * 0.5,      # Conv2d(mid, C, 1)
        "b2": jax.random.normal(k4, (C, 1), jnp.float32) * 0.1,
        "wsp": jax.random.normal(k5, (1, 2, 7, 7), jnp.float32) * 0.1,  # Conv2d(2,1,7,p=3)
        "bsp": jax.random.normal(k6, (1,), jnp.float32) * 0.1,
    }

    out = jax.block_until_ready(cbam_forward(x, params))
    ref = cbam_reference(x, params)
    assert out.shape == (N, C, H, W)
    assert jnp.allclose(out, ref, atol=1e-4, rtol=1e-4), "mismatch vs reference"
    print("KERNEL_OK")
</pallas_src>

<mosaic_0001>
module attributes {stable_mosaic.version = 11 : i64} {
  func.func @_cbam_kernel(%arg0: i32, %arg1: memref<2x4x256xf32, #tpu.memory_space<vmem>>, %arg2: memref<4x2xf32, #tpu.memory_space<vmem>>, %arg3: memref<1x2xf32, #tpu.memory_space<vmem>>, %arg4: memref<4x2xf32, #tpu.memory_space<vmem>>, %arg5: memref<4x1xf32, #tpu.memory_space<vmem>>, %arg6: memref<49x2x256xf32, #tpu.memory_space<vmem>>, %arg7: memref<1xf32, #tpu.memory_space<smem>>, %arg8: memref<2x4x256xf32, #tpu.memory_space<vmem>>) attributes {dimension_semantics = [#tpu.dimension_semantics<parallel>], iteration_bounds = array<i64: 1>, scalar_prefetch = 0 : i64, scratch_operands = 0 : i64, tpu.core_type = #tpu.core_type<tc>, window_params = [{transform_indices = @transform_0, window_bounds = array<i64: 2, 4, 256>}, {pipeline_mode = #tpu.pipeline_mode<synchronous>, transform_indices = @transform_1, window_bounds = array<i64: 4, 2>}, {pipeline_mode = #tpu.pipeline_mode<synchronous>, transform_indices = @transform_2, window_bounds = array<i64: 1, 2>}, {pipeline_mode = #tpu.pipeline_mode<synchronous>, transform_indices = @transform_3, window_bounds = array<i64: 4, 2>}, {pipeline_mode = #tpu.pipeline_mode<synchronous>, transform_indices = @transform_4, window_bounds = array<i64: 4, 1>}, {pipeline_mode = #tpu.pipeline_mode<synchronous>, transform_indices = @transform_5, window_bounds = array<i64: 49, 2, 256>}, {transform_indices = @transform_6, window_bounds = array<i64: 1>}, {transform_indices = @transform_7, window_bounds = array<i64: 2, 4, 256>}]} {
    %c0 = arith.constant 0 : index
    %c0_0 = arith.constant 0 : index
    %c0_1 = arith.constant 0 : index
    %0 = vector.load %arg1[%c0, %c0_0, %c0_1] : memref<2x4x256xf32, #tpu.memory_space<vmem>>, vector<2x4x256xf32>
    %cst = arith.constant dense<0.000000e+00> : vector<2x4xf32>
    %1 = vector.multi_reduction <add>, %0, %cst [2] : vector<2x4x256xf32> to vector<2x4xf32>
    %2 = vector.shape_cast %1 : vector<2x4xf32> to vector<2x4x1xf32>
    %cst_2 = arith.constant 2.560000e+02 : f32
    %3 = vector.broadcast %cst_2 : f32 to vector<2x4x1xf32>
    %4 = arith.divf %2, %3 : vector<2x4x1xf32>
    %cst_3 = arith.constant dense<0xFF800000> : vector<2x4xf32>
    %5 = vector.multi_reduction <maximumf>, %0, %cst_3 [2] : vector<2x4x256xf32> to vector<2x4xf32>
    %6 = vector.shape_cast %5 : vector<2x4xf32> to vector<2x4x1xf32>
    %c0_4 = arith.constant 0 : index
    %c0_5 = arith.constant 0 : index
    %7 = vector.load %arg2[%c0_4, %c0_5] : memref<4x2xf32, #tpu.memory_space<vmem>>, vector<4x2xf32>
    %c0_6 = arith.constant 0 : index
    %c0_7 = arith.constant 0 : index
    %8 = vector.load %arg3[%c0_6, %c0_7] : memref<1x2xf32, #tpu.memory_space<vmem>>, vector<1x2xf32>
    %c0_8 = arith.constant 0 : index
    %c0_9 = arith.constant 0 : index
    %9 = vector.load %arg4[%c0_8, %c0_9] : memref<4x2xf32, #tpu.memory_space<vmem>>, vector<4x2xf32>
    %c0_10 = arith.constant 0 : index
    %c0_11 = arith.constant 0 : index
    %10 = vector.load %arg5[%c0_10, %c0_11] : memref<4x1xf32, #tpu.memory_space<vmem>>, vector<4x1xf32>
    %11 = vector.shape_cast %7 : vector<4x2xf32> to vector<1x4x2xf32>
    %12 = vector.broadcast %4 : vector<2x4x1xf32> to vector<2x4x2xf32>
    %13 = vector.broadcast %11 : vector<1x4x2xf32> to vector<2x4x2xf32>
    %14 = arith.mulf %12, %13 : vector<2x4x2xf32>
    %cst_12 = arith.constant dense<0.000000e+00> : vector<2x2xf32>
    %15 = vector.multi_reduction <add>, %14, %cst_12 [1] : vector<2x4x2xf32> to vector<2x2xf32>
    %16 = vector.shape_cast %15 : vector<2x2xf32> to vector<2x1x2xf32>
    %17 = vector.shape_cast %8 : vector<1x2xf32> to vector<1x1x2xf32>
    %18 = vector.broadcast %17 : vector<1x1x2xf32> to vector<2x1x2xf32>
    %19 = arith.addf %16, %18 : vector<2x1x2xf32>
    %cst_13 = arith.constant 0.000000e+00 : f32
    %20 = vector.broadcast %cst_13 : f32 to vector<2x1x2xf32>
    %21 = arith.maximumf %19, %20 : vector<2x1x2xf32>
    %22 = vector.shape_cast %7 : vector<4x2xf32> to vector<1x4x2xf32>
    %23 = vector.broadcast %6 : vector<2x4x1xf32> to vector<2x4x2xf32>
    %24 = vector.broadcast %22 : vector<1x4x2xf32> to vector<2x4x2xf32>
    %25 = arith.mulf %23, %24 : vector<2x4x2xf32>
    %cst_14 = arith.constant dense<0.000000e+00> : vector<2x2xf32>
    %26 = vector.multi_reduction <add>, %25, %cst_14 [1] : vector<2x4x2xf32> to vector<2x2xf32>
    %27 = vector.shape_cast %26 : vector<2x2xf32> to vector<2x1x2xf32>
    %28 = vector.shape_cast %8 : vector<1x2xf32> to vector<1x1x2xf32>
    %29 = vector.broadcast %28 : vector<1x1x2xf32> to vector<2x1x2xf32>
    %30 = arith.addf %27, %29 : vector<2x1x2xf32>
    %cst_15 = arith.constant 0.000000e+00 : f32
    %31 = vector.broadcast %cst_15 : f32 to vector<2x1x2xf32>
    %32 = arith.maximumf %30, %31 : vector<2x1x2xf32>
    %33 = arith.addf %21, %32 : vector<2x1x2xf32>
    %34 = vector.shape_cast %9 : vector<4x2xf32> to vector<1x4x2xf32>
    %35 = vector.broadcast %33 : vector<2x1x2xf32> to vector<2x4x2xf32>
    %36 = vector.broadcast %34 : vector<1x4x2xf32> to vector<2x4x2xf32>
    %37 = arith.mulf %35, %36 : vector<2x4x2xf32>
    %cst_16 = arith.constant dense<0.000000e+00> : vector<2x4xf32>
    %38 = vector.multi_reduction <add>, %37, %cst_16 [2] : vector<2x4x2xf32> to vector<2x4xf32>
    %39 = vector.shape_cast %38 : vector<2x4xf32> to vector<2x4x1xf32>
    %cst_17 = arith.constant 2.000000e+00 : f32
    %40 = vector.broadcast %cst_17 : f32 to vector<4x1xf32>
    %41 = arith.mulf %40, %10 : vector<4x1xf32>
    %42 = vector.shape_cast %41 : vector<4x1xf32> to vector<1x4x1xf32>
    %43 = vector.broadcast %42 : vector<1x4x1xf32> to vector<2x4x1xf32>
    %44 = arith.addf %39, %43 : vector<2x4x1xf32>
    %45 = arith.negf %44 : vector<2x4x1xf32>
    %46 = math.exp %45 : vector<2x4x1xf32>
    %cst_18 = arith.constant 1.000000e+00 : f32
    %47 = vector.broadcast %cst_18 : f32 to vector<2x4x1xf32>
    %48 = arith.addf %47, %46 : vector<2x4x1xf32>
    %49 = arith.divf %47, %48 : vector<2x4x1xf32>
    %50 = vector.broadcast %49 : vector<2x4x1xf32> to vector<2x4x256xf32>
    %51 = arith.mulf %0, %50 : vector<2x4x256xf32>
    %cst_19 = arith.constant dense<0.000000e+00> : vector<2x256xf32>
    %52 = vector.multi_reduction <add>, %51, %cst_19 [1] : vector<2x4x256xf32> to vector<2x256xf32>
    %53 = vector.shape_cast %52 : vector<2x256xf32> to vector<2x1x256xf32>
    %cst_20 = arith.constant 4.000000e+00 : f32
    %54 = vector.broadcast %cst_20 : f32 to vector<2x1x256xf32>
    %55 = arith.divf %53, %54 : vector<2x1x256xf32>
    %cst_21 = arith.constant dense<0xFF800000> : vector<2x256xf32>
    %56 = vector.multi_reduction <maximumf>, %51, %cst_21 [1] : vector<2x4x256xf32> to vector<2x256xf32>
    %57 = vector.shape_cast %56 : vector<2x256xf32> to vector<2x1x256xf32>
    %58 = tpu.concatenate %55, %57 in 1 : vector<2x1x256xf32>, vector<2x1x256xf32> -> vector<2x2x256xf32>
    %cst_22 = arith.constant 0.000000e+00 : f32
    %59 = vector.broadcast %cst_22 : f32 to vector<2x2x256xf32>
    %cst_23 = arith.constant 0.000000e+00 : f32
    %60 = vector.broadcast %cst_23 : f32 to vector<2x2x256xf32>
    %cst_24 = arith.constant 0.000000e+00 : f32
    %61 = vector.broadcast %cst_24 : f32 to vector<2x2x256xf32>
    %cst_25 = arith.constant 0.000000e+00 : f32
    %62 = vector.broadcast %cst_25 : f32 to vector<2x2x256xf32>
    %c51_i32 = arith.constant 51 : i32
    %63 = tpu.dynamic_rotate %58 by %c51_i32 dim 2 : vector<2x2x256xf32>, i32 -> vector<2x2x256xf32>
    %c0_26 = arith.constant 0 : index
    %c0_27 = arith.constant 0 : index
    %c0_28 = arith.constant 0 : index
    %64 = vector.load %arg6[%c0_26, %c0_27, %c0_28] : memref<49x2x256xf32, #tpu.memory_space<vmem>>, vector<1x2x256xf32>
    %65 = vector.shape_cast %64 : vector<1x2x256xf32> to vector<2x256xf32>
    %66 = vector.shape_cast %65 : vector<2x256xf32> to vector<1x2x256xf32>
    %67 = vector.broadcast %66 : vector<1x2x256xf32> to vector<2x2x256xf32>
    %68 = arith.mulf %63, %67 : vector<2x2x256xf32>
    %69 = arith.addf %59, %68 : vector<2x2x256xf32>
    %c50_i32 = arith.constant 50 : i32
    %70 = tpu.dynamic_rotate %58 by %c50_i32 dim 2 : vector<2x2x256xf32>, i32 -> vector<2x2x256xf32>
    %c1 = arith.constant 1 : index
    %c0_29 = arith.constant 0 : index
    %c0_30 = arith.constant 0 : index
    %71 = vector.load %arg6[%c1, %c0_29, %c0_30] : memref<49x2x256xf32, #tpu.memory_space<vmem>>, vector<1x2x256xf32>
    %72 = vector.shape_cast %71 : vector<1x2x256xf32> to vector<2x256xf32>
    %73 = vector.shape_cast %72 : vector<2x256xf32> to vector<1x2x256xf32>
    %74 = vector.broadcast %73 : vector<1x2x256xf32> to vector<2x2x256xf32>
    %75 = arith.mulf %70, %74 : vector<2x2x256xf32>
    %76 = arith.addf %60, %75 : vector<2x2x256xf32>
    %c49_i32 = arith.constant 49 : i32
    %77 = tpu.dynamic_rotate %58 by %c49_i32 dim 2 : vector<2x2x256xf32>, i32 -> vector<2x2x256xf32>
    %c2 = arith.constant 2 : index
    %c0_31 = arith.constant 0 : index
    %c0_32 = arith.constant 0 : index
    %78 = vector.load %arg6[%c2, %c0_31, %c0_32] : memref<49x2x256xf32, #tpu.memory_space<vmem>>, vector<1x2x256xf32>
    %79 = vector.shape_cast %78 : vector<1x2x256xf32> to vector<2x256xf32>
    %80 = vector.shape_cast %79 : vector<2x256xf32> to vector<1x2x256xf32>
    %81 = vector.broadcast %80 : vector<1x2x256xf32> to vector<2x2x256xf32>
    %82 = arith.mulf %77, %81 : vector<2x2x256xf32>
    %83 = arith.addf %61, %82 : vector<2x2x256xf32>
    %c48_i32 = arith.constant 48 : i32
    %84 = tpu.dynamic_rotate %58 by %c48_i32 dim 2 : vector<2x2x256xf32>, i32 -> vector<2x2x256xf32>
    %c3 = arith.constant 3 : index
    %c0_33 = arith.constant 0 : index
    %c0_34 = arith.constant 0 : index
    %85 = vector.load %arg6[%c3, %c0_33, %c0_34] : memref<49x2x256xf32, #tpu.memory_space<vmem>>, vector<1x2x256xf32>
    %86 = vector.shape_cast %85 : vector<1x2x256xf32> to vector<2x256xf32>
    %87 = vector.shape_cast %86 : vector<2x256xf32> to vector<1x2x256xf32>
    %88 = vector.broadcast %87 : vector<1x2x256xf32> to vector<2x2x256xf32>
    %89 = arith.mulf %84, %88 : vector<2x2x256xf32>
    %90 = arith.addf %62, %89 : vector<2x2x256xf32>
    %c47_i32 = arith.constant 47 : i32
    %91 = tpu.dynamic_rotate %58 by %c47_i32 dim 2 : vector<2x2x256xf32>, i32 -> vector<2x2x256xf32>
    %c4 = arith.constant 4 : index
    %c0_35 = arith.constant 0 : index
    %c0_36 = arith.constant 0 : index
    %92 = vector.load %arg6[%c4, %c0_35, %c0_36] : memref<49x2x256xf32, #tpu.memory_space<vmem>>, vector<1x2x256xf32>
    %93 = vector.shape_cast %92 : vector<1x2x256xf32> to vector<2x256xf32>
    %94 = vector.shape_cast %93 : vector<2x256xf32> to vector<1x2x256xf32>
    %95 = vector.broadcast %94 : vector<1x2x256xf32> to vector<2x2x256xf32>
    %96 = arith.mulf %91, %95 : vector<2x2x256xf32>
    %97 = arith.addf %69, %96 : vector<2x2x256xf32>
    %c46_i32 = arith.constant 46 : i32
    %98 = tpu.dynamic_rotate %58 by %c46_i32 dim 2 : vector<2x2x256xf32>, i32 -> vector<2x2x256xf32>
    %c5 = arith.constant 5 : index
    %c0_37 = arith.constant 0 : index
    %c0_38 = arith.constant 0 : index
    %99 = vector.load %arg6[%c5, %c0_37, %c0_38] : memref<49x2x256xf32, #tpu.memory_space<vmem>>, vector<1x2x256xf32>
    %100 = vector.shape_cast %99 : vector<1x2x256xf32> to vector<2x256xf32>
    %101 = vector.shape_cast %100 : vector<2x256xf32> to vector<1x2x256xf32>
    %102 = vector.broadcast %101 : vector<1x2x256xf32> to vector<2x2x256xf32>
    %103 = arith.mulf %98, %102 : vector<2x2x256xf32>
    %104 = arith.addf %76, %103 : vector<2x2x256xf32>
    %c45_i32 = arith.constant 45 : i32
    %105 = tpu.dynamic_rotate %58 by %c45_i32 dim 2 : vector<2x2x256xf32>, i32 -> vector<2x2x256xf32>
    %c6 = arith.constant 6 : index
    %c0_39 = arith.constant 0 : index
    %c0_40 = arith.constant 0 : index
    %106 = vector.load %arg6[%c6, %c0_39, %c0_40] : memref<49x2x256xf32, #tpu.memory_space<vmem>>, vector<1x2x256xf32>
    %107 = vector.shape_cast %106 : vector<1x2x256xf32> to vector<2x256xf32>
    %108 = vector.shape_cast %107 : vector<2x256xf32> to vector<1x2x256xf32>
    %109 = vector.broadcast %108 : vector<1x2x256xf32> to vector<2x2x256xf32>
    %110 = arith.mulf %105, %109 : vector<2x2x256xf32>
    %111 = arith.addf %83, %110 : vector<2x2x256xf32>
    %c35_i32 = arith.constant 35 : i32
    %112 = tpu.dynamic_rotate %58 by %c35_i32 dim 2 : vector<2x2x256xf32>, i32 -> vector<2x2x256xf32>
    %c7 = arith.constant 7 : index
    %c0_41 = arith.constant 0 : index
    %c0_42 = arith.constant 0 : index
    %113 = vector.load %arg6[%c7, %c0_41, %c0_42] : memref<49x2x256xf32, #tpu.memory_space<vmem>>, vector<1x2x256xf32>
    %114 = vector.shape_cast %113 : vector<1x2x256xf32> to vector<2x256xf32>
    %115 = vector.shape_cast %114 : vector<2x256xf32> to vector<1x2x256xf32>
    %116 = vector.broadcast %115 : vector<1x2x256xf32> to vector<2x2x256xf32>
    %117 = arith.mulf %112, %116 : vector<2x2x256xf32>
    %118 = arith.addf %90, %117 : vector<2x2x256xf32>
    %c34_i32 = arith.constant 34 : i32
    %119 = tpu.dynamic_rotate %58 by %c34_i32 dim 2 : vector<2x2x256xf32>, i32 -> vector<2x2x256xf32>
    %c8 = arith.constant 8 : index
    %c0_43 = arith.constant 0 : index
    %c0_44 = arith.constant 0 : index
    %120 = vector.load %arg6[%c8, %c0_43, %c0_44] : memref<49x2x256xf32, #tpu.memory_space<vmem>>, vector<1x2x256xf32>
    %121 = vector.shape_cast %120 : vector<1x2x256xf32> to vector<2x256xf32>
    %122 = vector.shape_cast %121 : vector<2x256xf32> to vector<1x2x256xf32>
    %123 = vector.broadcast %122 : vector<1x2x256xf32> to vector<2x2x256xf32>
    %124 = arith.mulf %119, %123 : vector<2x2x256xf32>
    %125 = arith.addf %97, %124 : vector<2x2x256xf32>
    %c33_i32 = arith.constant 33 : i32
    %126 = tpu.dynamic_rotate %58 by %c33_i32 dim 2 : vector<2x2x256xf32>, i32 -> vector<2x2x256xf32>
    %c9 = arith.constant 9 : index
    %c0_45 = arith.constant 0 : index
    %c0_46 = arith.constant 0 : index
    %127 = vector.load %arg6[%c9, %c0_45, %c0_46] : memref<49x2x256xf32, #tpu.memory_space<vmem>>, vector<1x2x256xf32>
    %128 = vector.shape_cast %127 : vector<1x2x256xf32> to vector<2x256xf32>
    %129 = vector.shape_cast %128 : vector<2x256xf32> to vector<1x2x256xf32>
    %130 = vector.broadcast %129 : vector<1x2x256xf32> to vector<2x2x256xf32>
    %131 = arith.mulf %126, %130 : vector<2x2x256xf32>
    %132 = arith.addf %104, %131 : vector<2x2x256xf32>
    %c32_i32 = arith.constant 32 : i32
    %133 = tpu.dynamic_rotate %58 by %c32_i32 dim 2 : vector<2x2x256xf32>, i32 -> vector<2x2x256xf32>
    %c10 = arith.constant 10 : index
    %c0_47 = arith.constant 0 : index
    %c0_48 = arith.constant 0 : index
    %134 = vector.load %arg6[%c10, %c0_47, %c0_48] : memref<49x2x256xf32, #tpu.memory_space<vmem>>, vector<1x2x256xf32>
    %135 = vector.shape_cast %134 : vector<1x2x256xf32> to vector<2x256xf32>
    %136 = vector.shape_cast %135 : vector<2x256xf32> to vector<1x2x256xf32>
    %137 = vector.broadcast %136 : vector<1x2x256xf32> to vector<2x2x256xf32>
    %138 = arith.mulf %133, %137 : vector<2x2x256xf32>
    %139 = arith.addf %111, %138 : vector<2x2x256xf32>
    %c31_i32 = arith.constant 31 : i32
    %140 = tpu.dynamic_rotate %58 by %c31_i32 dim 2 : vector<2x2x256xf32>, i32 -> vector<2x2x256xf32>
    %c11 = arith.constant 11 : index
    %c0_49 = arith.constant 0 : index
    %c0_50 = arith.constant 0 : index
    %141 = vector.load %arg6[%c11, %c0_49, %c0_50] : memref<49x2x256xf32, #tpu.memory_space<vmem>>, vector<1x2x256xf32>
    %142 = vector.shape_cast %141 : vector<1x2x256xf32> to vector<2x256xf32>
    %143 = vector.shape_cast %142 : vector<2x256xf32> to vector<1x2x256xf32>
    %144 = vector.broadcast %143 : vector<1x2x256xf32> to vector<2x2x256xf32>
    %145 = arith.mulf %140, %144 : vector<2x2x256xf32>
    %146 = arith.addf %118, %145 : vector<2x2x256xf32>
    %c30_i32 = arith.constant 30 : i32
    %147 = tpu.dynamic_rotate %58 by %c30_i32 dim 2 : vector<2x2x256xf32>, i32 -> vector<2x2x256xf32>
    %c12 = arith.constant 12 : index
    %c0_51 = arith.constant 0 : index
    %c0_52 = arith.constant 0 : index
    %148 = vector.load %arg6[%c12, %c0_51, %c0_52] : memref<49x2x256xf32, #tpu.memory_space<vmem>>, vector<1x2x256xf32>
    %149 = vector.shape_cast %148 : vector<1x2x256xf32> to vector<2x256xf32>
    %150 = vector.shape_cast %149 : vector<2x256xf32> to vector<1x2x256xf32>
    %151 = vector.broadcast %150 : vector<1x2x256xf32> to vector<2x2x256xf32>
    %152 = arith.mulf %147, %151 : vector<2x2x256xf32>
    %153 = arith.addf %125, %152 : vector<2x2x256xf32>
    %c29_i32 = arith.constant 29 : i32
    %154 = tpu.dynamic_rotate %58 by %c29_i32 dim 2 : vector<2x2x256xf32>, i32 -> vector<2x2x256xf32>
    %c13 = arith.constant 13 : index
    %c0_53 = arith.constant 0 : index
    %c0_54 = arith.constant 0 : index
    %155 = vector.load %arg6[%c13, %c0_53, %c0_54] : memref<49x2x256xf32, #tpu.memory_space<vmem>>, vector<1x2x256xf32>
    %156 = vector.shape_cast %155 : vector<1x2x256xf32> to vector<2x256xf32>
    %157 = vector.shape_cast %156 : vector<2x256xf32> to vector<1x2x256xf32>
    %158 = vector.broadcast %157 : vector<1x2x256xf32> to vector<2x2x256xf32>
    %159 = arith.mulf %154, %158 : vector<2x2x256xf32>
    %160 = arith.addf %132, %159 : vector<2x2x256xf32>
    %c19_i32 = arith.constant 19 : i32
    %161 = tpu.dynamic_rotate %58 by %c19_i32 dim 2 : vector<2x2x256xf32>, i32 -> vector<2x2x256xf32>
    %c14 = arith.constant 14 : index
    %c0_55 = arith.constant 0 : index
    %c0_56 = arith.constant 0 : index
    %162 = vector.load %arg6[%c14, %c0_55, %c0_56] : memref<49x2x256xf32, #tpu.memory_space<vmem>>, vector<1x2x256xf32>
    %163 = vector.shape_cast %162 : vector<1x2x256xf32> to vector<2x256xf32>
    %164 = vector.shape_cast %163 : vector<2x256xf32> to vector<1x2x256xf32>
    %165 = vector.broadcast %164 : vector<1x2x256xf32> to vector<2x2x256xf32>
    %166 = arith.mulf %161, %165 : vector<2x2x256xf32>
    %167 = arith.addf %139, %166 : vector<2x2x256xf32>
    %c18_i32 = arith.constant 18 : i32
    %168 = tpu.dynamic_rotate %58 by %c18_i32 dim 2 : vector<2x2x256xf32>, i32 -> vector<2x2x256xf32>
    %c15 = arith.constant 15 : index
    %c0_57 = arith.constant 0 : index
    %c0_58 = arith.constant 0 : index
    %169 = vector.load %arg6[%c15, %c0_57, %c0_58] : memref<49x2x256xf32, #tpu.memory_space<vmem>>, vector<1x2x256xf32>
    %170 = vector.shape_cast %169 : vector<1x2x256xf32> to vector<2x256xf32>
    %171 = vector.shape_cast %170 : vector<2x256xf32> to vector<1x2x256xf32>
    %172 = vector.broadcast %171 : vector<1x2x256xf32> to vector<2x2x256xf32>
    %173 = arith.mulf %168, %172 : vector<2x2x256xf32>
    %174 = arith.addf %146, %173 : vector<2x2x256xf32>
    %c17_i32 = arith.constant 17 : i32
    %175 = tpu.dynamic_rotate %58 by %c17_i32 dim 2 : vector<2x2x256xf32>, i32 -> vector<2x2x256xf32>
    %c16 = arith.constant 16 : index
    %c0_59 = arith.constant 0 : index
    %c0_60 = arith.constant 0 : index
    %176 = vector.load %arg6[%c16, %c0_59, %c0_60] : memref<49x2x256xf32, #tpu.memory_space<vmem>>, vector<1x2x256xf32>
    %177 = vector.shape_cast %176 : vector<1x2x256xf32> to vector<2x256xf32>
    %178 = vector.shape_cast %177 : vector<2x256xf32> to vector<1x2x256xf32>
    %179 = vector.broadcast %178 : vector<1x2x256xf32> to vector<2x2x256xf32>
    %180 = arith.mulf %175, %179 : vector<2x2x256xf32>
    %181 = arith.addf %153, %180 : vector<2x2x256xf32>
    %c16_i32 = arith.constant 16 : i32
    %182 = tpu.dynamic_rotate %58 by %c16_i32 dim 2 : vector<2x2x256xf32>, i32 -> vector<2x2x256xf32>
    %c17 = arith.constant 17 : index
    %c0_61 = arith.constant 0 : index
    %c0_62 = arith.constant 0 : index
    %183 = vector.load %arg6[%c17, %c0_61, %c0_62] : memref<49x2x256xf32, #tpu.memory_space<vmem>>, vector<1x2x256xf32>
    %184 = vector.shape_cast %183 : vector<1x2x256xf32> to vector<2x256xf32>
    %185 = vector.shape_cast %184 : vector<2x256xf32> to vector<1x2x256xf32>
    %186 = vector.broadcast %185 : vector<1x2x256xf32> to vector<2x2x256xf32>
    %187 = arith.mulf %182, %186 : vector<2x2x256xf32>
    %188 = arith.addf %160, %187 : vector<2x2x256xf32>
    %c15_i32 = arith.constant 15 : i32
    %189 = tpu.dynamic_rotate %58 by %c15_i32 dim 2 : vector<2x2x256xf32>, i32 -> vector<2x2x256xf32>
    %c18 = arith.constant 18 : index
    %c0_63 = arith.constant 0 : index
    %c0_64 = arith.constant 0 : index
    %190 = vector.load %arg6[%c18, %c0_63, %c0_64] : memref<49x2x256xf32, #tpu.memory_space<vmem>>, vector<1x2x256xf32>
    %191 = vector.shape_cast %190 : vector<1x2x256xf32> to vector<2x256xf32>
    %192 = vector.shape_cast %191 : vector<2x256xf32> to vector<1x2x256xf32>
    %193 = vector.broadcast %192 : vector<1x2x256xf32> to vector<2x2x256xf32>
    %194 = arith.mulf %189, %193 : vector<2x2x256xf32>
    %195 = arith.addf %167, %194 : vector<2x2x256xf32>
    %c14_i32 = arith.constant 14 : i32
    %196 = tpu.dynamic_rotate %58 by %c14_i32 dim 2 : vector<2x2x256xf32>, i32 -> vector<2x2x256xf32>
    %c19 = arith.constant 19 : index
    %c0_65 = arith.constant 0 : index
    %c0_66 = arith.constant 0 : index
    %197 = vector.load %arg6[%c19, %c0_65, %c0_66] : memref<49x2x256xf32, #tpu.memory_space<vmem>>, vector<1x2x256xf32>
    %198 = vector.shape_cast %197 : vector<1x2x256xf32> to vector<2x256xf32>
    %199 = vector.shape_cast %198 : vector<2x256xf32> to vector<1x2x256xf32>
    %200 = vector.broadcast %199 : vector<1x2x256xf32> to vector<2x2x256xf32>
    %201 = arith.mulf %196, %200 : vector<2x2x256xf32>
    %202 = arith.addf %174, %201 : vector<2x2x256xf32>
    %c13_i32 = arith.constant 13 : i32
    %203 = tpu.dynamic_rotate %58 by %c13_i32 dim 2 : vector<2x2x256xf32>, i32 -> vector<2x2x256xf32>
    %c20 = arith.constant 20 : index
    %c0_67 = arith.constant 0 : index
    %c0_68 = arith.constant 0 : index
    %204 = vector.load %arg6[%c20, %c0_67, %c0_68] : memref<49x2x256xf32, #tpu.memory_space<vmem>>, vector<1x2x256xf32>
    %205 = vector.shape_cast %204 : vector<1x2x256xf32> to vector<2x256xf32>
    %206 = vector.shape_cast %205 : vector<2x256xf32> to vector<1x2x256xf32>
    %207 = vector.broadcast %206 : vector<1x2x256xf32> to vector<2x2x256xf32>
    %208 = arith.mulf %203, %207 : vector<2x2x256xf32>
    %209 = arith.addf %181, %208 : vector<2x2x256xf32>
    %c3_i32 = arith.constant 3 : i32
    %210 = tpu.dynamic_rotate %58 by %c3_i32 dim 2 : vector<2x2x256xf32>, i32 -> vector<2x2x256xf32>
    %c21 = arith.constant 21 : index
    %c0_69 = arith.constant 0 : index
    %c0_70 = arith.constant 0 : index
    %211 = vector.load %arg6[%c21, %c0_69, %c0_70] : memref<49x2x256xf32, #tpu.memory_space<vmem>>, vector<1x2x256xf32>
    %212 = vector.shape_cast %211 : vector<1x2x256xf32> to vector<2x256xf32>
    %213 = vector.shape_cast %212 : vector<2x256xf32> to vector<1x2x256xf32>
    %214 = vector.broadcast %213 : vector<1x2x256xf32> to vector<2x2x256xf32>
    %215 = arith.mulf %210, %214 : vector<2x2x256xf32>
    %216 = arith.addf %188, %215 : vector<2x2x256xf32>
    %c2_i32 = arith.constant 2 : i32
    %217 = tpu.dynamic_rotate %58 by %c2_i32 dim 2 : vector<2x2x256xf32>, i32 -> vector<2x2x256xf32>
    %c22 = arith.constant 22 : index
    %c0_71 = arith.constant 0 : index
    %c0_72 = arith.constant 0 : index
    %218 = vector.load %arg6[%c22, %c0_71, %c0_72] : memref<49x2x256xf32, #tpu.memory_space<vmem>>, vector<1x2x256xf32>
    %219 = vector.shape_cast %218 : vector<1x2x256xf32> to vector<2x256xf32>
    %220 = vector.shape_cast %219 : vector<2x256xf32> to vector<1x2x256xf32>
    %221 = vector.broadcast %220 : vector<1x2x256xf32> to vector<2x2x256xf32>
    %222 = arith.mulf %217, %221 : vector<2x2x256xf32>
    %223 = arith.addf %195, %222 : vector<2x2x256xf32>
    %c1_i32 = arith.constant 1 : i32
    %224 = tpu.dynamic_rotate %58 by %c1_i32 dim 2 : vector<2x2x256xf32>, i32 -> vector<2x2x256xf32>
    %c23 = arith.constant 23 : index
    %c0_73 = arith.constant 0 : index
    %c0_74 = arith.constant 0 : index
    %225 = vector.load %arg6[%c23, %c0_73, %c0_74] : memref<49x2x256xf32, #tpu.memory_space<vmem>>, vector<1x2x256xf32>
    %226 = vector.shape_cast %225 : vector<1x2x256xf32> to vector<2x256xf32>
    %227 = vector.shape_cast %226 : vector<2x256xf32> to vector<1x2x256xf32>
    %228 = vector.broadcast %227 : vector<1x2x256xf32> to vector<2x2x256xf32>
    %229 = arith.mulf %224, %228 : vector<2x2x256xf32>
    %230 = arith.addf %202, %229 : vector<2x2x256xf32>
    %c24 = arith.constant 24 : index
    %c0_75 = arith.constant 0 : index
    %c0_76 = arith.constant 0 : index
    %231 = vector.load %arg6[%c24, %c0_75, %c0_76] : memref<49x2x256xf32, #tpu.memory_space<vmem>>, vector<1x2x256xf32>
    %232 = vector.shape_cast %231 : vector<1x2x256xf32> to vector<2x256xf32>
    %233 = vector.shape_cast %232 : vector<2x256xf32> to vector<1x2x256xf32>
    %234 = vector.broadcast %233 : vector<1x2x256xf32> to vector<2x2x256xf32>
    %235 = arith.mulf %58, %234 : vector<2x2x256xf32>
    %236 = arith.addf %209, %235 : vector<2x2x256xf32>
    %c255_i32 = arith.constant 255 : i32
    %237 = tpu.dynamic_rotate %58 by %c255_i32 dim 2 : vector<2x2x256xf32>, i32 -> vector<2x2x256xf32>
    %c25 = arith.constant 25 : index
    %c0_77 = arith.constant 0 : index
    %c0_78 = arith.constant 0 : index
    %238 = vector.load %arg6[%c25, %c0_77, %c0_78] : memref<49x2x256xf32, #tpu.memory_space<vmem>>, vector<1x2x256xf32>
    %239 = vector.shape_cast %238 : vector<1x2x256xf32> to vector<2x256xf32>
    %240 = vector.shape_cast %239 : vector<2x256xf32> to vector<1x2x256xf32>
    %241 = vector.broadcast %240 : vector<1x2x256xf32> to vector<2x2x256xf32>
    %242 = arith.mulf %237, %241 : vector<2x2x256xf32>
    %243 = arith.addf %216, %242 : vector<2x2x256xf32>
    %c254_i32 = arith.constant 254 : i32
    %244 = tpu.dynamic_rotate %58 by %c254_i32 dim 2 : vector<2x2x256xf32>, i32 -> vector<2x2x256xf32>
    %c26 = arith.constant 26 : index
    %c0_79 = arith.constant 0 : index
    %c0_80 = arith.constant 0 : index
    %245 = vector.load %arg6[%c26, %c0_79, %c0_80] : memref<49x2x256xf32, #tpu.memory_space<vmem>>, vector<1x2x256xf32>
    %246 = vector.shape_cast %245 : vector<1x2x256xf32> to vector<2x256xf32>
    %247 = vector.shape_cast %246 : vector<2x256xf32> to vector<1x2x256xf32>
    %248 = vector.broadcast %247 : vector<1x2x256xf32> to vector<2x2x256xf32>
    %249 = arith.mulf %244, %248 : vector<2x2x256xf32>
    %250 = arith.addf %223, %249 : vector<2x2x256xf32>
    %c253_i32 = arith.constant 253 : i32
    %251 = tpu.dynamic_rotate %58 by %c253_i32 dim 2 : vector<2x2x256xf32>, i32 -> vector<2x2x256xf32>
    %c27 = arith.constant 27 : index
    %c0_81 = arith.constant 0 : index
    %c0_82 = arith.constant 0 : index
    %252 = vector.load %arg6[%c27, %c0_81, %c0_82] : memref<49x2x256xf32, #tpu.memory_space<vmem>>, vector<1x2x256xf32>
    %253 = vector.shape_cast %252 : vector<1x2x256xf32> to vector<2x256xf32>
    %254 = vector.shape_cast %253 : vector<2x256xf32> to vector<1x2x256xf32>
    %255 = vector.broadcast %254 : vector<1x2x256xf32> to vector<2x2x256xf32>
    %256 = arith.mulf %251, %255 : vector<2x2x256xf32>
    %257 = arith.addf %230, %256 : vector<2x2x256xf32>
    %c243_i32 = arith.constant 243 : i32
    %258 = tpu.dynamic_rotate %58 by %c243_i32 dim 2 : vector<2x2x256xf32>, i32 -> vector<2x2x256xf32>
    %c28 = arith.constant 28 : index
    %c0_83 = arith.constant 0 : index
    %c0_84 = arith.constant 0 : index
    %259 = vector.load %arg6[%c28, %c0_83, %c0_84] : memref<49x2x256xf32, #tpu.memory_space<vmem>>, vector<1x2x256xf32>
    %260 = vector.shape_cast %259 : vector<1x2x256xf32> to vector<2x256xf32>
    %261 = vector.shape_cast %260 : vector<2x256xf32> to vector<1x2x256xf32>
    %262 = vector.broadcast %261 : vector<1x2x256xf32> to vector<2x2x256xf32>
    %263 = arith.mulf %258, %262 : vector<2x2x256xf32>
    %264 = arith.addf %236, %263 : vector<2x2x256xf32>
    %c242_i32 = arith.constant 242 : i32
    %265 = tpu.dynamic_rotate %58 by %c242_i32 dim 2 : vector<2x2x256xf32>, i32 -> vector<2x2x256xf32>
    %c29 = arith.constant 29 : index
    %c0_85 = arith.constant 0 : index
    %c0_86 = arith.constant 0 : index
    %266 = vector.load %arg6[%c29, %c0_85, %c0_86] : memref<49x2x256xf32, #tpu.memory_space<vmem>>, vector<1x2x256xf32>
    %267 = vector.shape_cast %266 : vector<1x2x256xf32> to vector<2x256xf32>
    %268 = vector.shape_cast %267 : vector<2x256xf32> to vector<1x2x256xf32>
    %269 = vector.broadcast %268 : vector<1x2x256xf32> to vector<2x2x256xf32>
    %270 = arith.mulf %265, %269 : vector<2x2x256xf32>
    %271 = arith.addf %243, %270 : vector<2x2x256xf32>
    %c241_i32 = arith.constant 241 : i32
    %272 = tpu.dynamic_rotate %58 by %c241_i32 dim 2 : vector<2x2x256xf32>, i32 -> vector<2x2x256xf32>
    %c30 = arith.constant 30 : index
    %c0_87 = arith.constant 0 : index
    %c0_88 = arith.constant 0 : index
    %273 = vector.load %arg6[%c30, %c0_87, %c0_88] : memref<49x2x256xf32, #tpu.memory_space<vmem>>, vector<1x2x256xf32>
    %274 = vector.shape_cast %273 : vector<1x2x256xf32> to vector<2x256xf32>
    %275 = vector.shape_cast %274 : vector<2x256xf32> to vector<1x2x256xf32>
    %276 = vector.broadcast %275 : vector<1x2x256xf32> to vector<2x2x256xf32>
    %277 = arith.mulf %272, %276 : vector<2x2x256xf32>
    %278 = arith.addf %250, %277 : vector<2x2x256xf32>
    %c240_i32 = arith.constant 240 : i32
    %279 = tpu.dynamic_rotate %58 by %c240_i32 dim 2 : vector<2x2x256xf32>, i32 -> vector<2x2x256xf32>
    %c31 = arith.constant 31 : index
    %c0_89 = arith.constant 0 : index
    %c0_90 = arith.constant 0 : index
    %280 = vector.load %arg6[%c31, %c0_89, %c0_90] : memref<49x2x256xf32, #tpu.memory_space<vmem>>, vector<1x2x256xf32>
    %281 = vector.shape_cast %280 : vector<1x2x256xf32> to vector<2x256xf32>
    %282 = vector.shape_cast %281 : vector<2x256xf32> to vector<1x2x256xf32>
    %283 = vector.broadcast %282 : vector<1x2x256xf32> to vector<2x2x256xf32>
    %284 = arith.mulf %279, %283 : vector<2x2x256xf32>
    %285 = arith.addf %257, %284 : vector<2x2x256xf32>
    %c239_i32 = arith.constant 239 : i32
    %286 = tpu.dynamic_rotate %58 by %c239_i32 dim 2 : vector<2x2x256xf32>, i32 -> vector<2x2x256xf32>
    %c32 = arith.constant 32 : index
    %c0_91 = arith.constant 0 : index
    %c0_92 = arith.constant 0 : index
    %287 = vector.load %arg6[%c32, %c0_91, %c0_92] : memref<49x2x256xf32, #tpu.memory_space<vmem>>, vector<1x2x256xf32>
    %288 = vector.shape_cast %287 : vector<1x2x256xf32> to vector<2x256xf32>
    %289 = vector.shape_cast %288 : vector<2x256xf32> to vector<1x2x256xf32>
    %290 = vector.broadcast %289 : vector<1x2x256xf32> to vector<2x2x256xf32>
    %291 = arith.mulf %286, %290 : vector<2x2x256xf32>
    %292 = arith.addf %264, %291 : vector<2x2x256xf32>
    %c238_i32 = arith.constant 238 : i32
    %293 = tpu.dynamic_rotate %58 by %c238_i32 dim 2 : vector<2x2x256xf32>, i32 -> vector<2x2x256xf32>
    %c33 = arith.constant 33 : index
    %c0_93 = arith.constant 0 : index
    %c0_94 = arith.constant 0 : index
    %294 = vector.load %arg6[%c33, %c0_93, %c0_94] : memref<49x2x256xf32, #tpu.memory_space<vmem>>, vector<1x2x256xf32>
    %295 = vector.shape_cast %294 : vector<1x2x256xf32> to vector<2x256xf32>
    %296 = vector.shape_cast %295 : vector<2x256xf32> to vector<1x2x256xf32>
    %297 = vector.broadcast %296 : vector<1x2x256xf32> to vector<2x2x256xf32>
    %298 = arith.mulf %293, %297 : vector<2x2x256xf32>
    %299 = arith.addf %271, %298 : vector<2x2x256xf32>
    %c237_i32 = arith.constant 237 : i32
    %300 = tpu.dynamic_rotate %58 by %c237_i32 dim 2 : vector<2x2x256xf32>, i32 -> vector<2x2x256xf32>
    %c34 = arith.constant 34 : index
    %c0_95 = arith.constant 0 : index
    %c0_96 = arith.constant 0 : index
    %301 = vector.load %arg6[%c34, %c0_95, %c0_96] : memref<49x2x256xf32, #tpu.memory_space<vmem>>, vector<1x2x256xf32>
    %302 = vector.shape_cast %301 : vector<1x2x256xf32> to vector<2x256xf32>
    %303 = vector.shape_cast %302 : vector<2x256xf32> to vector<1x2x256xf32>
    %304 = vector.broadcast %303 : vector<1x2x256xf32> to vector<2x2x256xf32>
    %305 = arith.mulf %300, %304 : vector<2x2x256xf32>
    %306 = arith.addf %278, %305 : vector<2x2x256xf32>
    %c227_i32 = arith.constant 227 : i32
    %307 = tpu.dynamic_rotate %58 by %c227_i32 dim 2 : vector<2x2x256xf32>, i32 -> vector<2x2x256xf32>
    %c35 = arith.constant 35 : index
    %c0_97 = arith.constant 0 : index
    %c0_98 = arith.constant 0 : index
    %308 = vector.load %arg6[%c35, %c0_97, %c0_98] : memref<49x2x256xf32, #tpu.memory_space<vmem>>, vector<1x2x256xf32>
    %309 = vector.shape_cast %308 : vector<1x2x256xf32> to vector<2x256xf32>
    %310 = vector.shape_cast %309 : vector<2x256xf32> to vector<1x2x256xf32>
    %311 = vector.broadcast %310 : vector<1x2x256xf32> to vector<2x2x256xf32>
    %312 = arith.mulf %307, %311 : vector<2x2x256xf32>
    %313 = arith.addf %285, %312 : vector<2x2x256xf32>
    %c226_i32 = arith.constant 226 : i32
    %314 = tpu.dynamic_rotate %58 by %c226_i32 dim 2 : vector<2x2x256xf32>, i32 -> vector<2x2x256xf32>
    %c36 = arith.constant 36 : index
    %c0_99 = arith.constant 0 : index
    %c0_100 = arith.constant 0 : index
    %315 = vector.load %arg6[%c36, %c0_99, %c0_100] : memref<49x2x256xf32, #tpu.memory_space<vmem>>, vector<1x2x256xf32>
    %316 = vector.shape_cast %315 : vector<1x2x256xf32> to vector<2x256xf32>
    %317 = vector.shape_cast %316 : vector<2x256xf32> to vector<1x2x256xf32>
    %318 = vector.broadcast %317 : vector<1x2x256xf32> to vector<2x2x256xf32>
    %319 = arith.mulf %314, %318 : vector<2x2x256xf32>
    %320 = arith.addf %292, %319 : vector<2x2x256xf32>
    %c225_i32 = arith.constant 225 : i32
    %321 = tpu.dynamic_rotate %58 by %c225_i32 dim 2 : vector<2x2x256xf32>, i32 -> vector<2x2x256xf32>
    %c37 = arith.constant 37 : index
    %c0_101 = arith.constant 0 : index
    %c0_102 = arith.constant 0 : index
    %322 = vector.load %arg6[%c37, %c0_101, %c0_102] : memref<49x2x256xf32, #tpu.memory_space<vmem>>, vector<1x2x256xf32>
    %323 = vector.shape_cast %322 : vector<1x2x256xf32> to vector<2x256xf32>
    %324 = vector.shape_cast %323 : vector<2x256xf32> to vector<1x2x256xf32>
    %325 = vector.broadcast %324 : vector<1x2x256xf32> to vector<2x2x256xf32>
    %326 = arith.mulf %321, %325 : vector<2x2x256xf32>
    %327 = arith.addf %299, %326 : vector<2x2x256xf32>
    %c224_i32 = arith.constant 224 : i32
    %328 = tpu.dynamic_rotate %58 by %c224_i32 dim 2 : vector<2x2x256xf32>, i32 -> vector<2x2x256xf32>
    %c38 = arith.constant 38 : index
    %c0_103 = arith.constant 0 : index
    %c0_104 = arith.constant 0 : index
    %329 = vector.load %arg6[%c38, %c0_103, %c0_104] : memref<49x2x256xf32, #tpu.memory_space<vmem>>, vector<1x2x256xf32>
    %330 = vector.shape_cast %329 : vector<1x2x256xf32> to vector<2x256xf32>
    %331 = vector.shape_cast %330 : vector<2x256xf32> to vector<1x2x256xf32>
    %332 = vector.broadcast %331 : vector<1x2x256xf32> to vector<2x2x256xf32>
    %333 = arith.mulf %328, %332 : vector<2x2x256xf32>
    %334 = arith.addf %306, %333 : vector<2x2x256xf32>
    %c223_i32 = arith.constant 223 : i32
    %335 = tpu.dynamic_rotate %58 by %c223_i32 dim 2 : vector<2x2x256xf32>, i32 -> vector<2x2x256xf32>
    %c39 = arith.constant 39 : index
    %c0_105 = arith.constant 0 : index
    %c0_106 = arith.constant 0 : index
    %336 = vector.load %arg6[%c39, %c0_105, %c0_106] : memref<49x2x256xf32, #tpu.memory_space<vmem>>, vector<1x2x256xf32>
    %337 = vector.shape_cast %336 : vector<1x2x256xf32> to vector<2x256xf32>
    %338 = vector.shape_cast %337 : vector<2x256xf32> to vector<1x2x256xf32>
    %339 = vector.broadcast %338 : vector<1x2x256xf32> to vector<2x2x256xf32>
    %340 = arith.mulf %335, %339 : vector<2x2x256xf32>
    %341 = arith.addf %313, %340 : vector<2x2x256xf32>
    %c222_i32 = arith.constant 222 : i32
    %342 = tpu.dynamic_rotate %58 by %c222_i32 dim 2 : vector<2x2x256xf32>, i32 -> vector<2x2x256xf32>
    %c40 = arith.constant 40 : index
    %c0_107 = arith.constant 0 : index
    %c0_108 = arith.constant 0 : index
    %343 = vector.load %arg6[%c40, %c0_107, %c0_108] : memref<49x2x256xf32, #tpu.memory_space<vmem>>, vector<1x2x256xf32>
    %344 = vector.shape_cast %343 : vector<1x2x256xf32> to vector<2x256xf32>
    %345 = vector.shape_cast %344 : vector<2x256xf32> to vector<1x2x256xf32>
    %346 = vector.broadcast %345 : vector<1x2x256xf32> to vector<2x2x256xf32>
    %347 = arith.mulf %342, %346 : vector<2x2x256xf32>
    %348 = arith.addf %320, %347 : vector<2x2x256xf32>
    %c221_i32 = arith.constant 221 : i32
    %349 = tpu.dynamic_rotate %58 by %c221_i32 dim 2 : vector<2x2x256xf32>, i32 -> vector<2x2x256xf32>
    %c41 = arith.constant 41 : index
    %c0_109 = arith.constant 0 : index
    %c0_110 = arith.constant 0 : index
    %350 = vector.load %arg6[%c41, %c0_109, %c0_110] : memref<49x2x256xf32, #tpu.memory_space<vmem>>, vector<1x2x256xf32>
    %351 = vector.shape_cast %350 : vector<1x2x256xf32> to vector<2x256xf32>
    %352 = vector.shape_cast %351 : vector<2x256xf32> to vector<1x2x256xf32>
    %353 = vector.broadcast %352 : vector<1x2x256xf32> to vector<2x2x256xf32>
    %354 = arith.mulf %349, %353 : vector<2x2x256xf32>
    %355 = arith.addf %327, %354 : vector<2x2x256xf32>
    %c211_i32 = arith.constant 211 : i32
    %356 = tpu.dynamic_rotate %58 by %c211_i32 dim 2 : vector<2x2x256xf32>, i32 -> vector<2x2x256xf32>
    %c42 = arith.constant 42 : index
    %c0_111 = arith.constant 0 : index
    %c0_112 = arith.constant 0 : index
    %357 = vector.load %arg6[%c42, %c0_111, %c0_112] : memref<49x2x256xf32, #tpu.memory_space<vmem>>, vector<1x2x256xf32>
    %358 = vector.shape_cast %357 : vector<1x2x256xf32> to vector<2x256xf32>
    %359 = vector.shape_cast %358 : vector<2x256xf32> to vector<1x2x256xf32>
    %360 = vector.broadcast %359 : vector<1x2x256xf32> to vector<2x2x256xf32>
    %361 = arith.mulf %356, %360 : vector<2x2x256xf32>
    %362 = arith.addf %334, %361 : vector<2x2x256xf32>
    %c210_i32 = arith.constant 210 : i32
    %363 = tpu.dynamic_rotate %58 by %c210_i32 dim 2 : vector<2x2x256xf32>, i32 -> vector<2x2x256xf32>
    %c43 = arith.constant 43 : index
    %c0_113 = arith.constant 0 : index
    %c0_114 = arith.constant 0 : index
    %364 = vector.load %arg6[%c43, %c0_113, %c0_114] : memref<49x2x256xf32, #tpu.memory_space<vmem>>, vector<1x2x256xf32>
    %365 = vector.shape_cast %364 : vector<1x2x256xf32> to vector<2x256xf32>
    %366 = vector.shape_cast %365 : vector<2x256xf32> to vector<1x2x256xf32>
    %367 = vector.broadcast %366 : vector<1x2x256xf32> to vector<2x2x256xf32>
    %368 = arith.mulf %363, %367 : vector<2x2x256xf32>
    %369 = arith.addf %341, %368 : vector<2x2x256xf32>
    %c209_i32 = arith.constant 209 : i32
    %370 = tpu.dynamic_rotate %58 by %c209_i32 dim 2 : vector<2x2x256xf32>, i32 -> vector<2x2x256xf32>
    %c44 = arith.constant 44 : index
    %c0_115 = arith.constant 0 : index
    %c0_116 = arith.constant 0 : index
    %371 = vector.load %arg6[%c44, %c0_115, %c0_116] : memref<49x2x256xf32, #tpu.memory_space<vmem>>, vector<1x2x256xf32>
    %372 = vector.shape_cast %371 : vector<1x2x256xf32> to vector<2x256xf32>
    %373 = vector.shape_cast %372 : vector<2x256xf32> to vector<1x2x256xf32>
    %374 = vector.broadcast %373 : vector<1x2x256xf32> to vector<2x2x256xf32>
    %375 = arith.mulf %370, %374 : vector<2x2x256xf32>
    %376 = arith.addf %348, %375 : vector<2x2x256xf32>
    %c208_i32 = arith.constant 208 : i32
    %377 = tpu.dynamic_rotate %58 by %c208_i32 dim 2 : vector<2x2x256xf32>, i32 -> vector<2x2x256xf32>
    %c45 = arith.constant 45 : index
    %c0_117 = arith.constant 0 : index
    %c0_118 = arith.constant 0 : index
    %378 = vector.load %arg6[%c45, %c0_117, %c0_118] : memref<49x2x256xf32, #tpu.memory_space<vmem>>, vector<1x2x256xf32>
    %379 = vector.shape_cast %378 : vector<1x2x256xf32> to vector<2x256xf32>
    %380 = vector.shape_cast %379 : vector<2x256xf32> to vector<1x2x256xf32>
    %381 = vector.broadcast %380 : vector<1x2x256xf32> to vector<2x2x256xf32>
    %382 = arith.mulf %377, %381 : vector<2x2x256xf32>
    %383 = arith.addf %355, %382 : vector<2x2x256xf32>
    %c207_i32 = arith.constant 207 : i32
    %384 = tpu.dynamic_rotate %58 by %c207_i32 dim 2 : vector<2x2x256xf32>, i32 -> vector<2x2x256xf32>
    %c46 = arith.constant 46 : index
    %c0_119 = arith.constant 0 : index
    %c0_120 = arith.constant 0 : index
    %385 = vector.load %arg6[%c46, %c0_119, %c0_120] : memref<49x2x256xf32, #tpu.memory_space<vmem>>, vector<1x2x256xf32>
    %386 = vector.shape_cast %385 : vector<1x2x256xf32> to vector<2x256xf32>
    %387 = vector.shape_cast %386 : vector<2x256xf32> to vector<1x2x256xf32>
    %388 = vector.broadcast %387 : vector<1x2x256xf32> to vector<2x2x256xf32>
    %389 = arith.mulf %384, %388 : vector<2x2x256xf32>
    %390 = arith.addf %362, %389 : vector<2x2x256xf32>
    %c206_i32 = arith.constant 206 : i32
    %391 = tpu.dynamic_rotate %58 by %c206_i32 dim 2 : vector<2x2x256xf32>, i32 -> vector<2x2x256xf32>
    %c47 = arith.constant 47 : index
    %c0_121 = arith.constant 0 : index
    %c0_122 = arith.constant 0 : index
    %392 = vector.load %arg6[%c47, %c0_121, %c0_122] : memref<49x2x256xf32, #tpu.memory_space<vmem>>, vector<1x2x256xf32>
    %393 = vector.shape_cast %392 : vector<1x2x256xf32> to vector<2x256xf32>
    %394 = vector.shape_cast %393 : vector<2x256xf32> to vector<1x2x256xf32>
    %395 = vector.broadcast %394 : vector<1x2x256xf32> to vector<2x2x256xf32>
    %396 = arith.mulf %391, %395 : vector<2x2x256xf32>
    %397 = arith.addf %369, %396 : vector<2x2x256xf32>
    %c205_i32 = arith.constant 205 : i32
    %398 = tpu.dynamic_rotate %58 by %c205_i32 dim 2 : vector<2x2x256xf32>, i32 -> vector<2x2x256xf32>
    %c48 = arith.constant 48 : index
    %c0_123 = arith.constant 0 : index
    %c0_124 = arith.constant 0 : index
    %399 = vector.load %arg6[%c48, %c0_123, %c0_124] : memref<49x2x256xf32, #tpu.memory_space<vmem>>, vector<1x2x256xf32>
    %400 = vector.shape_cast %399 : vector<1x2x256xf32> to vector<2x256xf32>
    %401 = vector.shape_cast %400 : vector<2x256xf32> to vector<1x2x256xf32>
    %402 = vector.broadcast %401 : vector<1x2x256xf32> to vector<2x2x256xf32>
    %403 = arith.mulf %398, %402 : vector<2x2x256xf32>
    %404 = arith.addf %376, %403 : vector<2x2x256xf32>
    %405 = arith.addf %404, %383 : vector<2x2x256xf32>
    %406 = arith.addf %390, %397 : vector<2x2x256xf32>
    %407 = arith.addf %405, %406 : vector<2x2x256xf32>
    %cst_125 = arith.constant dense<0.000000e+00> : vector<2x256xf32>
    %408 = vector.multi_reduction <add>, %407, %cst_125 [1] : vector<2x2x256xf32> to vector<2x256xf32>
    %409 = vector.shape_cast %408 : vector<2x256xf32> to vector<2x1x256xf32>
    %c0_126 = arith.constant 0 : index
    %410 = memref.load %arg7[%c0_126] : memref<1xf32, #tpu.memory_space<smem>>
    %411 = vector.broadcast %410 : f32 to vector<2x1x256xf32>
    %412 = arith.addf %409, %411 : vector<2x1x256xf32>
    %413 = arith.negf %412 : vector<2x1x256xf32>
    %414 = math.exp %413 : vector<2x1x256xf32>
    %cst_127 = arith.constant 1.000000e+00 : f32
    %415 = vector.broadcast %cst_127 : f32 to vector<2x1x256xf32>
    %416 = arith.addf %415, %414 : vector<2x1x256xf32>
    %417 = arith.divf %415, %416 : vector<2x1x256xf32>
    %418 = vector.broadcast %417 : vector<2x1x256xf32> to vector<2x4x256xf32>
    %419 = arith.mulf %51, %418 : vector<2x4x256xf32>
    %c0_128 = arith.constant 0 : index
    %c0_129 = arith.constant 0 : index
    %c0_130 = arith.constant 0 : index
    %420 = vector.load %arg8[%c0_128, %c0_129, %c0_130] : memref<2x4x256xf32, #tpu.memory_space<vmem>>, vector<2x4x256xf32>
    tpu.vector_store %arg8[%c0_128, %c0_129, %c0_130], %419 {strides = array<i32>} : memref<2x4x256xf32, #tpu.memory_space<vmem>>, vector<2x4x256xf32>,
    return
  }
  func.func @transform_0(%arg0: i32) -> (i32, i32, i32) {
    %c0_i32 = arith.constant 0 : i32
    %c0_i32_0 = arith.constant 0 : i32
    %c0_i32_1 = arith.constant 0 : i32
    return %arg0, %c0_i32, %c0_i32_0 : i32, i32, i32
  }
  func.func @transform_1(%arg0: i32) -> (i32, i32) {
    %c0_i32 = arith.constant 0 : i32
    %c0_i32_0 = arith.constant 0 : i32
    %c0_i32_1 = arith.constant 0 : i32
    return %c0_i32, %c0_i32_0 : i32, i32
  }
  func.func @transform_2(%arg0: i32) -> (i32, i32) {
    %c0_i32 = arith.constant 0 : i32
    %c0_i32_0 = arith.constant 0 : i32
    %c0_i32_1 = arith.constant 0 : i32
    return %c0_i32, %c0_i32_0 : i32, i32
  }
  func.func @transform_3(%arg0: i32) -> (i32, i32) {
    %c0_i32 = arith.constant 0 : i32
    %c0_i32_0 = arith.constant 0 : i32
    %c0_i32_1 = arith.constant 0 : i32
    return %c0_i32, %c0_i32_0 : i32, i32
  }
  func.func @transform_4(%arg0: i32) -> (i32, i32) {
    %c0_i32 = arith.constant 0 : i32
    %c0_i32_0 = arith.constant 0 : i32
    %c0_i32_1 = arith.constant 0 : i32
    return %c0_i32, %c0_i32_0 : i32, i32
  }
  func.func @transform_5(%arg0: i32) -> (i32, i32, i32) {
    %c0_i32 = arith.constant 0 : i32
    %c0_i32_0 = arith.constant 0 : i32
    %c0_i32_1 = arith.constant 0 : i32
    %c0_i32_2 = arith.constant 0 : i32
    return %c0_i32, %c0_i32_0, %c0_i32_1 : i32, i32, i32
  }
  func.func @transform_6(%arg0: i32) -> i32 {
    %c0_i32 = arith.constant 0 : i32
    %c0_i32_0 = arith.constant 0 : i32
    return %c0_i32 : i32
  }
  func.func @transform_7(%arg0: i32) -> (i32, i32, i32) {
    %c0_i32 = arith.constant 0 : i32
    %c0_i32_0 = arith.constant 0 : i32
    %c0_i32_1 = arith.constant 0 : i32
    return %arg0, %c0_i32, %c0_i32_0 : i32, i32, i32
  }
}

</mosaic_0001>

<bundles_post_ra>
// kernel: tpu_custom_call.1
= control target key start
LH: loop header
LB: loop body
LE: loop exit
PB: predicated region body
PF: predicated region fallthrough
CT: control target
= control target key end

     0   :  { %13 = vsyncpa [#allocation4], 0  ;;  %s4518_s0 = inlined_call_operand.hbm [shape: f32[2,4,256], index: 0, kind: input, shape index: {}]   ;;  %s4519_s1 = inlined_call_operand.vmem [shape: f32[4,2], index: 1, kind: input, shape index: {}]   ;;  %s4520_s2 = inlined_call_operand.vmem [shape: f32[1,2], index: 2, kind: input, shape index: {}]   ;;  %s4521_s3 = inlined_call_operand.vmem [shape: f32[4,2], index: 3, kind: input, shape index: {}]   ;;  %s4522_s4 = inlined_call_operand.vmem [shape: f32[4,1], index: 4, kind: input, shape index: {}]   ;;  %s4523_s5 = inlined_call_operand.hbm [shape: f32[49,2,256], index: 5, kind: input, shape index: {}]   ;;  %s4524_s6 = inlined_call_operand.<no memory space> [shape: f32[1], index: 6, kind: input, shape index: {}]   ;;  %s4525_s7 = inlined_call_operand.hbm [shape: f32[2,4,256], index: 7, kind: output, shape index: {}]  }
   0x1   :  { %14 = vsyncpa [#allocation7], 0 }
   0x2   :  { %15 = vsyncpa [#allocation5], 0  ;;  %s20_s26 = sshll.u32 %s4518_s0, 4  ;;  %s2363_s27 = smov [#allocation3]   ;;  %s21_s26 = int_to_ptr.hbm [resolvable:$true] %s20_s26 }
   0x3   :  { %s22_s28 = sshll.u32 %s2363_s27, 4  ;;  %s41_s8 = sshll.u32 %s4523_s5, 4  ;;  %s23_s28 = int_to_ptr.vmem [resolvable:$true] %s22_s28  ;;  %s42_s8 = int_to_ptr.hbm [resolvable:$true] %s41_s8 }
   0x4   :  { %s2364_s9 = smov 128   ;;  %s2365_s10 = smov 8  }
   0x5   :  { %28 = dma.hbm_to_vmem [thread:$0]  %s21_s26, 256, %s23_s28, [#allocation4], %s2364_s9, %s2364_s9, %s2365_s10  }
   0x6   :  { %s2366_s11 = smov [#allocation6]   ;;  %s2367_s13 = smov 64  }
   0x7   :  { %s43_s12 = sshll.u32 %s2366_s11, 4  ;;  %s2368_s0 = smov 4   ;;  %s44_s12 = int_to_ptr.vmem [resolvable:$true] %s43_s12 }
   0x8   :  { %49 = dma.hbm_to_vmem [thread:$0]  %s42_s8, 3136, %s44_s12, [#allocation7], %s2367_s13, %s2367_s13, %s2368_s0  }
   0x9   :  { %2357 = dma.done.wait [#allocation4], 256  }
   0xa   :  { %2358 = vsyncadd [#allocation4], 4294967040 }
   0xb   :  { %2359 = dma.done.wait [#allocation7], 3136  }
   0xc   :  { %2360 = vsyncadd [#allocation7], 4294964160  ;;  %v2471_v0 = vld [vmem:[#allocation3] sm:$0xff]  ;;  %v2473_v1 = vld [vmem:[#allocation3 + $0x8] sm:$0xff]  ;;  %vm75_vm0 = vcmask 1043456   ;;  %v2369_v22 = vmov 256.0  }
   0xd   :  { %64 = vst [vmem:[#allocation1] ss:$2 sm:$0xff] %v2471_v0  ;;  %2257 = vrcp.f32 %v2369_v22  ;;  %v116_v29 = vld [vmem:[%s4519_s1] sm:$0xf]  ;;  %vm122_vm2 = vcmask 11264   ;;  %vm325_vm12 = vcmask 1040384  }
   0xe   :  { %68 = vst [vmem:[#allocation1 + $0x10] ss:$2 sm:$0xff] %v2473_v1  ;;  %v117_v57 = vld [vmem:[%s4520_s2] sm:$0x1]  ;;  %s2374_s18 = smov 50   ;;  %s2375_s19 = smov 49  }
   0xf   :  { %s2376_s20 = smov 48   ;;  %s2377_s21 = smov 47  }
  0x10   :  { %s2378_s22 = smov 46   ;;  %s2379_s23 = smov 45  }
  0x11   :  { %s2380_s24 = smov 35   ;;  %s2381_s25 = smov 34  }
  0x12   :  { %s2382_s26 = smov 33   ;;  %s2383_s27 = smov 32  }
  0x13   :  { %v2258_v23 = vpop.eup %2257  ;;  %s2384_s28 = smov 31   ;;  %s2385_s29 = smov 30  }
  0x14   :  { %v65_v2 = vld.sshfl [vmem:[#allocation1] sm:$0xff pattern:$0x75316420]  ;;  %v66_v3 = vld.sshfl [vmem:[#allocation1 + $0x8] sm:$0xff pattern:$0x75316420]  ;;  %vm91_vm1 = vweird.f32 %v2258_v23 }
  0x15   :  { %v76_v4 = vsel %vm75_vm0, %v65_v2, 0.0  ;;  %v77_v5 = vsel %vm75_vm0, %v66_v3, 0.0  ;;  %95 = vst [vmem:[#allocation1] ss:$2 sm:$0xff] %v2471_v0  ;;  %v87_v24 = vmul.f32 256.0, %v2258_v23  ;;  %s2386_s30 = smov 29  }
  0x16   :  { %v78_v6 = vadd.f32 %v77_v5, %v76_v4  ;;  %v69_v7 = vld.sshfl [vmem:[#allocation1 + $0x10] sm:$0xff pattern:$0x75316420]  ;;  %v70_v8 = vld.sshfl [vmem:[#allocation1 + $0x18] sm:$0xff pattern:$0x75316420] }
  0x17   :  { %99 = vst [vmem:[#allocation1 + $0x10] ss:$2 sm:$0xff] %v2473_v1  ;;  %v81_v9 = vsel %vm75_vm0, %v69_v7, 0.0  ;;  %v82_v10 = vsel %vm75_vm0, %v70_v8, 0.0  ;;  %v88_v25 = vsub.f32 1.0, %v87_v24  ;;  %s2387_s8 = smov 19  }
  0x18   :  { %79 = vadd.xlane.f32.xlu0 %v78_v6  ;;  %v83_v13 = vadd.f32 %v82_v10, %v81_v9  ;;  %v2502_v24 = vld [vmem:[#allocation6] sm:$0xf]  ;;  %s2388_s11 = smov 18   ;;  %s2389_s12 = smov 17  }
  0x19   :  { %v89_v26 = vmul.f32 %v2258_v23, %v88_v25  ;;  %351 = vst [vmem:[#allocation1 + $0x20] ss:$4 sm:$0xff] %v2502_v24  ;;  %s2390_s13 = smov 16   ;;  %s2391_s0 = smov 15  }
  0x1a   :  { %s2392_s5 = smov 14   ;;  %s2393_s14 = smov 13  }
  0x1b   :  { %v90_v27 = vadd.f32 %v2258_v23, %v89_v26  ;;  %s2394_s1 = smov 3   ;;  %s2395_s15 = smov 2  }
  0x1c   :  { %v96_v11 = vld.sshfl [vmem:[#allocation1] sm:$0xff pattern:$0x75316420]  ;;  %v97_v12 = vld.sshfl [vmem:[#allocation1 + $0x8] sm:$0xff pattern:$0x75316420] }
  0x1d   :  { %v106_v14 = vsel %vm75_vm0, %v96_v11, -inf  ;;  %v107_v15 = vsel %vm75_vm0, %v97_v12, -inf  ;;  %v92_v28 = vsel %vm91_vm1, %v2258_v23, %v90_v27  ;;  %v118_v11 = vld [vmem:[%s4521_s3] sm:$0xf]  ;;  %v2509_v27 = vld [vmem:[#allocation6 + $0x4] sm:$0xf] }
  0x1e   :  { %v108_v16 = vmax.f32 %v106_v14, %v107_v15  ;;  %v100_v17 = vld.sshfl [vmem:[#allocation1 + $0x10] sm:$0xff pattern:$0x75316420]  ;;  %v101_v18 = vld.sshfl [vmem:[#allocation1 + $0x18] sm:$0xff pattern:$0x75316420] }
  0x1f   :  { %v111_v19 = vsel %vm75_vm0, %v100_v17, -inf  ;;  %v112_v20 = vsel %vm75_vm0, %v101_v18, -inf  ;;  %s2396_s16 = smov 1   ;;  %s2397_s17 = smov 127  }
  0x20   :  { %109 = vmax.xlane.f32.xlu1 %v108_v16  ;;  %84 = vadd.xlane.f32.xlu0 %v83_v13  ;;  %v113_v21 = vmax.f32 %v111_v19, %v112_v20  ;;  %v2505_v25 = vld.sshfl [vmem:[#allocation1 + $0x20] sm:$0xff pattern:$0x73625140]  ;;  %v2507_v26 = vld.sshfl [vmem:[#allocation1 + $0x28] sm:$0xff pattern:$0x73625140] }
  0x21   :  { %386 = vst [vmem:[#allocation1 + $0x20] ss:$4 sm:$0xff] %v2509_v27  ;;  %s2398_s2 = smov 126   ;;  %s2399_s3 = smov 125  }
  0x28   :  { %114 = vmax.xlane.f32.xlu1 %v113_v21 }
  0x8b   :  { %v80_v30 = vpop.xlane.xlu0 %79 }
  0x8c   :  { %v93_v31 = vmul.f32 %v92_v28, %v80_v30  ;;  %v2516_v30 = vld.sshfl [vmem:[#allocation1 + $0x28] sm:$0xff pattern:$0x73625140] }
  0x8e   :  { %v120_v32 = vmul.f32 %v116_v29, %v93_v31  ;;  %v2519_v31 = vld [vmem:[#allocation6 + $0xc] sm:$0xf] }
  0x90   :  { %v123_v33 = vsel %vm122_vm2, %v120_v32, 0.0 }
  0x91   :  { %v124_v34 = vrot.slane %v123_v33, 4 }
  0x93   :  { %v125_v35 = vadd.f32 %v124_v34, %v123_v33  ;;  %v110_v36 = vpop.xlane.xlu1 %109  ;;  %v85_v37 = vpop.xlane.xlu0 %84  ;;  %v2526_v34 = vld [vmem:[#allocation6 + $0x10] sm:$0xf] }
  0x94   :  { %v141_v38 = vmul.f32 %v116_v29, %v110_v36  ;;  %v94_v39 = vmul.f32 %v92_v28, %v85_v37  ;;  %v2512_v28 = vld [vmem:[#allocation6 + $0x8] sm:$0xf]  ;;  %v2370_v37 = vmov 0  }
  0x95   :  { %v126_v40 = vrot.slane %v125_v35, 2  ;;  %2255 = vset.pattern.permute.xlu0 %v2370_v37  ;;  %2256 = vset.pattern.permute.xlu1 %v2370_v37 }
  0x96   :  { %v143_v41 = vsel %vm122_vm2, %v141_v38, 0.0  ;;  %v121_v42 = vmul.f32 %v116_v29, %v94_v39  ;;  %v119_v38 = vld [vmem:[%s4522_s4] sm:$0xf]  ;;  %v2536_v39 = vld [vmem:[#allocation6 + $0x14] sm:$0xf]  ;;  %s2373_s4 = smov 51  }
  0x97   :  { %v127_v43 = vadd.f32 %v126_v40, %v125_v35  ;;  %v144_v44 = vrot.slane %v143_v41, 4 }
  0x98   :  { %v130_v45 = vsel %vm122_vm2, %v121_v42, 0.0  ;;  %v173_v42 = vmul.f32 2.0, %v119_v38 }
  0x99   :  { %v145_v46 = vadd.f32 %v144_v44, %v143_v41  ;;  %v131_v47 = vrot.slane %v130_v45, 4  ;;  %v128_v48 = vrot.slane %v127_v43, 1 }
  0x9b   :  { %v146_v49 = vrot.slane %v145_v46, 2  ;;  %v132_v50 = vadd.f32 %v131_v47, %v130_v45  ;;  %v115_v51 = vpop.xlane.xlu1 %114  ;;  %v129_v55 = vadd.f32 %v128_v48, %v127_v43 }
  0x9c   :  { %v142_v52 = vmul.f32 %v116_v29, %v115_v51  ;;  %v2514_v29 = vld.sshfl [vmem:[#allocation1 + $0x20] sm:$0xff pattern:$0x73625140] }
  0x9d   :  { %v147_v53 = vadd.f32 %v146_v49, %v145_v46  ;;  %v133_v54 = vrot.slane %v132_v50, 2  ;;  %v137_v63 = vadd.f32 %v129_v55, %v117_v57  ;;  %421 = vst [vmem:[#allocation1 + $0x20] ss:$4 sm:$0xff] %v2512_v28  ;;  %v2543_v46 = vld [vmem:[#allocation6 + $0x18] sm:$0xf] }
  0x9e   :  { %v150_v56 = vsel %vm122_vm2, %v142_v52, 0.0 }
  0x9f   :  { %v148_v58 = vrot.slane %v147_v53, 1  ;;  %v134_v59 = vadd.f32 %v133_v54, %v132_v50  ;;  %v151_v60 = vrot.slane %v150_v56, 4  ;;  %v139_v6 = vmax.f32 %v137_v63, 0.0 }
  0xa1   :  { %v135_v61 = vrot.slane %v134_v59, 1  ;;  %v152_v62 = vadd.f32 %v151_v60, %v150_v56  ;;  %v149_v2 = vadd.f32 %v148_v58, %v147_v53  ;;  %v2550_v53 = vld [vmem:[#allocation6 + $0x1c] sm:$0xf]  ;;  %v2557_v58 = vld [vmem:[#allocation6 + $0x20] sm:$0xf] }
  0xa3   :  { %v153_v3 = vrot.slane %v152_v62, 2  ;;  %v157_v4 = vadd.f32 %v149_v2, %v117_v57  ;;  %v136_v8 = vadd.f32 %v135_v61, %v134_v59 }
  0xa4   :  { %v2521_v32 = vld.sshfl [vmem:[#allocation1 + $0x20] sm:$0xff pattern:$0x73625140]  ;;  %v2523_v33 = vld.sshfl [vmem:[#allocation1 + $0x28] sm:$0xff pattern:$0x73625140] }
  0xa5   :  { %v154_v5 = vadd.f32 %v153_v3, %v152_v62  ;;  %v159_v7 = vmax.f32 %v157_v4, 0.0  ;;  %v138_v14 = vadd.f32 %v136_v8, %v117_v57  ;;  %456 = vst [vmem:[#allocation1 + $0x20] ss:$4 sm:$0xff] %v2519_v31 }
  0xa7   :  { %v155_v9 = vrot.slane %v154_v5, 1  ;;  %v161_v10 = vadd.f32 %v159_v7, %v139_v6  ;;  %v140_v18 = vmax.f32 %v138_v14, 0.0  ;;  %v2564_v7 = vld [vmem:[#allocation6 + $0x24] sm:$0xf] }
  0xa9   :  { %v156_v12 = vadd.f32 %v155_v9, %v154_v5  ;;  %v163_v13 = vperm.slane %v161_v10, 0 }
  0xab   :  { %v165_v15 = vmul.f32 %v163_v13, %v118_v11  ;;  %v158_v16 = vadd.f32 %v156_v12, %v117_v57 }
  0xac   :  { %v2528_v35 = vld.sshfl [vmem:[#allocation1 + $0x20] sm:$0xff pattern:$0x73625140]  ;;  %v2530_v36 = vld.sshfl [vmem:[#allocation1 + $0x28] sm:$0xff pattern:$0x73625140] }
  0xad   :  { %v167_v17 = vsel %vm122_vm2, %v165_v15, 0.0  ;;  %v160_v19 = vmax.f32 %v158_v16, 0.0  ;;  %491 = vst [vmem:[#allocation1 + $0x20] ss:$4 sm:$0xff] %v2526_v34 }
  0xae   :  { %168 = vadd.xlane.f32.xlu2 %v167_v17 }
  0xaf   :  { %v162_v20 = vadd.f32 %v160_v19, %v140_v18 }
  0xb1   :  { %v164_v21 = vperm.slane %v162_v20, 0  ;;  %v2571_v20 = vld [vmem:[#allocation6 + $0x28] sm:$0xf] }
  0xb3   :  { %v166_v22 = vmul.f32 %v164_v21, %v118_v11 }
  0xb4   :  { %v2538_v40 = vld.sshfl [vmem:[#allocation1 + $0x20] sm:$0xff pattern:$0x73625140]  ;;  %v2540_v41 = vld.sshfl [vmem:[#allocation1 + $0x28] sm:$0xff pattern:$0x73625140] }
  0xb5   :  { %v170_v23 = vsel %vm122_vm2, %v166_v22, 0.0  ;;  %4563 = vst [vmem:[#allocation12_spill] sm:$0xff] %v2538_v40 }
  0xb6   :  { %171 = vadd.xlane.f32.xlu2 %v170_v23  ;;  %4564 = vst [vmem:[#allocation13_spill] sm:$0xff] %v2540_v41 }
  0xb7   :  { %526 = vst [vmem:[#allocation1 + $0x20] ss:$4 sm:$0xff] %v2536_v39 }
  0xbe   :  { %v2545_v47 = vld.sshfl [vmem:[#allocation1 + $0x20] sm:$0xff pattern:$0x73625140]  ;;  %v2547_v48 = vld.sshfl [vmem:[#allocation1 + $0x28] sm:$0xff pattern:$0x73625140] }
  0xbf   :  { %4565 = vst [vmem:[#allocation14_spill] sm:$0xff] %v2545_v47 }
  0xc0   :  { %4566 = vst [vmem:[#allocation15_spill] sm:$0xff] %v2547_v48 }
  0xc1   :  { %561 = vst [vmem:[#allocation1 + $0x20] ss:$4 sm:$0xff] %v2543_v46 }
  0xc8   :  { %v2552_v55 = vld.sshfl [vmem:[#allocation1 + $0x20] sm:$0xff pattern:$0x73625140]  ;;  %v2554_v56 = vld.sshfl [vmem:[#allocation1 + $0x28] sm:$0xff pattern:$0x73625140] }
  0xc9   :  { %4567 = vst [vmem:[#allocation16_spill] sm:$0xff] %v2552_v55 }
  0xca   :  { %4568 = vst [vmem:[#allocation17_spill] sm:$0xff] %v2554_v56 }
  0xcb   :  { %596 = vst [vmem:[#allocation1 + $0x20] ss:$4 sm:$0xff] %v2550_v53 }
  0xd2   :  { %v2559_v62 = vld.sshfl [vmem:[#allocation1 + $0x20] sm:$0xff pattern:$0x73625140]  ;;  %v2561_v63 = vld.sshfl [vmem:[#allocation1 + $0x28] sm:$0xff pattern:$0x73625140] }
  0xd3   :  { %4569 = vst [vmem:[#allocation18_spill] sm:$0xff] %v2561_v63 }
  0xd4   :  { %631 = vst [vmem:[#allocation1 + $0x20] ss:$4 sm:$0xff] %v2557_v58 }
  0xdb   :  { %v2566_v12 = vld.sshfl [vmem:[#allocation1 + $0x20] sm:$0xff pattern:$0x73625140]  ;;  %v2568_v13 = vld.sshfl [vmem:[#allocation1 + $0x28] sm:$0xff pattern:$0x73625140] }
  0xdc   :  { %4570 = vst [vmem:[#allocation19_spill] sm:$0xff] %v2566_v12 }
  0xdd   :  { %4571 = vst [vmem:[#allocation20_spill] sm:$0xff] %v2568_v13 }
  0xde   :  { %666 = vst [vmem:[#allocation1 + $0x20] ss:$4 sm:$0xff] %v2564_v7 }
  0xe5   :  { %v2573_v23 = vld.sshfl [vmem:[#allocation1 + $0x20] sm:$0xff pattern:$0x73625140]  ;;  %v2575_v37 = vld.sshfl [vmem:[#allocation1 + $0x28] sm:$0xff pattern:$0x73625140] }
  0xe6   :  { %4572 = vst [vmem:[#allocation21_spill] sm:$0xff] %v2573_v23 }
  0xe7   :  { %4573 = vst [vmem:[#allocation22_spill] sm:$0xff] %v2575_v37 }
  0xe8   :  { %701 = vst [vmem:[#allocation1 + $0x20] ss:$4 sm:$0xff] %v2571_v20 }
 0x121   :  { %v169_v43 = vpop.xlane.xlu2 %168 }
 0x122   :  { %v174_v44 = vadd.f32 %v173_v42, %v169_v43  ;;  %v2580_v43 = vld.sshfl [vmem:[#allocation1 + $0x20] sm:$0xff pattern:$0x73625140] }
 0x123   :  { %4574 = vst [vmem:[#allocation23_spill] sm:$0xff] %v2580_v43 }
 0x124   :  { %v2190_v45 = vmul.f32 -1.442695, %v174_v44  ;;  %v2582_v44 = vld.sshfl [vmem:[#allocation1 + $0x28] sm:$0xff pattern:$0x73625140] }
 0x125   :  { %4575 = vst [vmem:[#allocation24_spill] sm:$0xff] %v2582_v44 }
 0x126   :  { %2259 = vpow2.f32 %v2190_v45  ;;  %v2585_v45 = vld [vmem:[#allocation6 + $0x30] sm:$0xf] }
 0x129   :  { %v172_v49 = vpop.xlane.xlu2 %171 }
 0x12a   :  { %v175_v50 = vadd.f32 %v173_v42, %v172_v49  ;;  %v2578_v42 = vld [vmem:[#allocation6 + $0x2c] sm:$0xf] }
 0x12b   :  { %736 = vst [vmem:[#allocation1 + $0x20] ss:$4 sm:$0xff] %v2578_v42 }
 0x12c   :  { %v2260_v51 = vpop.eup %2259  ;;  %v2191_v52 = vmul.f32 -1.442695, %v175_v50 }
 0x12d   :  { %v182_v54 = vadd.f32 1.0, %v2260_v51  ;;  %v2592_v51 = vld [vmem:[#allocation6 + $0x34] sm:$0xf] }
 0x12e   :  { %2261 = vpow2.f32 %v2191_v52 }
 0x12f   :  { %2263 = vrcp.f32 %v182_v54  ;;  %v193_v3 = vand.u32 2147483647, %v182_v54  ;;  %v195_v4 = vand.u32 2147483648, %v182_v54  ;;  %vm189_vm4 = vweird.f32 %v182_v54 }
 0x131   :  { %vm194_vm6 = vcmp.eq.f32.partialorder %v193_v3, 8.507059e+37  ;;  %v196_v9 = vor.u32 1.1754944e-38, %v195_v4  ;;  %v2613_v4 = vld [vmem:[#allocation6 + $0x40] sm:$0xf] }
 0x132   :  { %v2587_v49 = vld.sshfl [vmem:[#allocation1 + $0x20] sm:$0xff pattern:$0x73625140]  ;;  %v2589_v50 = vld.sshfl [vmem:[#allocation1 + $0x28] sm:$0xff pattern:$0x73625140] }
 0x133   :  { %4576 = vst [vmem:[#allocation25_spill] sm:$0xff] %v2587_v49 }
 0x134   :  { %v2262_v57 = vpop.eup %2261  ;;  %4577 = vst [vmem:[#allocation26_spill] sm:$0xff] %v2589_v50 }
 0x135   :  { %v2264_v59 = vpop.eup %2263  ;;  %v183_v60 = vadd.f32 1.0, %v2262_v57  ;;  %771 = vst [vmem:[#allocation1 + $0x20] ss:$4 sm:$0xff] %v2585_v45  ;;  %v2599_v57 = vld [vmem:[#allocation6 + $0x38] sm:$0xf] }
 0x136   :  { %v185_v61 = vmul.f32 %v2264_v59, %v182_v54  ;;  %vm190_vm3 = vweird.f32 %v2264_v59 }
 0x137   :  { %2265 = vrcp.f32 %v183_v60  ;;  %vm191_vm5 = vmor %vm189_vm4, %vm190_vm3  ;;  %v208_v16 = vand.u32 2147483647, %v183_v60  ;;  %v210_v17 = vand.u32 2147483648, %v183_v60  ;;  %vm204_vm8 = vweird.f32 %v183_v60 }
 0x138   :  { %v186_v2 = vsub.f32 1.0, %v185_v61  ;;  %v2606_v61 = vld [vmem:[#allocation6 + $0x3c] sm:$0xf] }
 0x139   :  { %vm209_vm10 = vcmp.eq.f32.partialorder %v208_v16, 8.507059e+37  ;;  %v211_v21 = vor.u32 1.1754944e-38, %v210_v17  ;;  %v2634_v16 = vld [vmem:[#allocation6 + $0x4c] sm:$0xf] }
 0x13a   :  { %v187_v5 = vmul.f32 %v2264_v59, %v186_v2 }
 0x13c   :  { %v188_v6 = vadd.f32 %v2264_v59, %v187_v5  ;;  %v2594_v52 = vld.sshfl [vmem:[#allocation1 + $0x20] sm:$0xff pattern:$0x73625140]  ;;  %v2596_v54 = vld.sshfl [vmem:[#allocation1 + $0x28] sm:$0xff pattern:$0x73625140] }
 0x13d   :  { %v2266_v8 = vpop.eup %2265  ;;  %4578 = vst [vmem:[#allocation27_spill] sm:$0xff] %v2594_v52 }
 0x13e   :  { %v192_v10 = vsel %vm191_vm5, %v2264_v59, %v188_v6  ;;  %v200_v11 = vmul.f32 %v2266_v8, %v183_v60  ;;  %vm205_vm7 = vweird.f32 %v2266_v8  ;;  %4579 = vst [vmem:[#allocation28_spill] sm:$0xff] %v2596_v54 }
 0x13f   :  { %v197_v14 = vsel %vm194_vm6, %v196_v9, %v192_v10  ;;  %vm206_vm9 = vmor %vm204_vm8, %vm205_vm7  ;;  %806 = vst [vmem:[#allocation1 + $0x20] ss:$4 sm:$0xff] %v2592_v51 }
 0x140   :  { %216 = vperm.xlu0 %2255, %v197_v14   ;;  %v201_v15 = vsub.f32 1.0, %v200_v11  ;;  %v2627_v11 = vld [vmem:[#allocation6 + $0x48] sm:$0xf] }
 0x142   :  { %v202_v18 = vmul.f32 %v2266_v8, %v201_v15 }
 0x144   :  { %v203_v19 = vadd.f32 %v2266_v8, %v202_v18 }
 0x146   :  { %v207_v22 = vsel %vm206_vm9, %v2266_v8, %v203_v19  ;;  %v2601_v59 = vld.sshfl [vmem:[#allocation1 + $0x20] sm:$0xff pattern:$0x73625140]  ;;  %v2603_v60 = vld.sshfl [vmem:[#allocation1 + $0x28] sm:$0xff pattern:$0x73625140] }
 0x147   :  { %v212_v38 = vsel %vm209_vm10, %v211_v21, %v207_v22  ;;  %4580 = vst [vmem:[#allocation29_spill] sm:$0xff] %v2601_v59  ;;  %v2620_v8 = vld [vmem:[#allocation6 + $0x44] sm:$0xf]  ;;  %v2641_v19 = vld [vmem:[#allocation6 + $0x50] sm:$0xf] }
 0x148   :  { %220 = vperm.xlu1 %2256, %v212_v38   ;;  %4581 = vst [vmem:[#allocation30_spill] sm:$0xff] %v2603_v60 }
 0x149   :  { %841 = vst [vmem:[#allocation1 + $0x20] ss:$4 sm:$0xff] %v2599_v57 }
 0x150   :  { %v2608_v2 = vld.sshfl [vmem:[#allocation1 + $0x20] sm:$0xff pattern:$0x73625140]  ;;  %v2610_v3 = vld.sshfl [vmem:[#allocation1 + $0x28] sm:$0xff pattern:$0x73625140] }
 0x151   :  { %4582 = vst [vmem:[#allocation31_spill] sm:$0xff] %v2608_v2 }
 0x152   :  { %4583 = vst [vmem:[#allocation32_spill] sm:$0xff] %v2610_v3  ;;  %v2650_v3 = vld [vmem:[#allocation6 + $0x54] sm:$0xf] }
 0x153   :  { %876 = vst [vmem:[#allocation1 + $0x20] ss:$4 sm:$0xff] %v2606_v61 }
 0x15a   :  { %v2615_v5 = vld.sshfl [vmem:[#allocation1 + $0x20] sm:$0xff pattern:$0x73625140]  ;;  %v2617_v6 = vld.sshfl [vmem:[#allocation1 + $0x28] sm:$0xff pattern:$0x73625140] }
 0x15b   :  { %4584 = vst [vmem:[#allocation33_spill] sm:$0xff] %v2615_v5 }
 0x15c   :  { %4585 = vst [vmem:[#allocation34_spill] sm:$0xff] %v2617_v6 }
 0x15d   :  { %911 = vst [vmem:[#allocation1 + $0x20] ss:$4 sm:$0xff] %v2613_v4 }
 0x164   :  { %v2622_v9 = vld.sshfl [vmem:[#allocation1 + $0x20] sm:$0xff pattern:$0x73625140]  ;;  %v2624_v10 = vld.sshfl [vmem:[#allocation1 + $0x28] sm:$0xff pattern:$0x73625140] }
 0x165   :  { %4586 = vst [vmem:[#allocation35_spill] sm:$0xff] %v2622_v9 }
 0x166   :  { %4587 = vst [vmem:[#allocation36_spill] sm:$0xff] %v2624_v10 }
 0x167   :  { %946 = vst [vmem:[#allocation1 + $0x20] ss:$4 sm:$0xff] %v2620_v8 }
 0x16e   :  { %v2629_v14 = vld.sshfl [vmem:[#allocation1 + $0x20] sm:$0xff pattern:$0x73625140]  ;;  %v2631_v15 = vld.sshfl [vmem:[#allocation1 + $0x28] sm:$0xff pattern:$0x73625140] }
 0x16f   :  { %4588 = vst [vmem:[#allocation37_spill] sm:$0xff] %v2629_v14  ;;  %v2662_v14 = vld [vmem:[#allocation6 + $0x5c] sm:$0xf] }
 0x170   :  { %4589 = vst [vmem:[#allocation38_spill] sm:$0xff] %v2631_v15 }
 0x171   :  { %981 = vst [vmem:[#allocation1 + $0x20] ss:$4 sm:$0xff] %v2627_v11 }
 0x178   :  { %v2636_v17 = vld.sshfl [vmem:[#allocation1 + $0x20] sm:$0xff pattern:$0x73625140]  ;;  %v2638_v18 = vld.sshfl [vmem:[#allocation1 + $0x28] sm:$0xff pattern:$0x73625140] }
 0x179   :  { %4590 = vst [vmem:[#allocation39_spill] sm:$0xff] %v2636_v17  ;;  %v2655_v17 = vld [vmem:[#allocation6 + $0x58] sm:$0xf] }
 0x17a   :  { %4591 = vst [vmem:[#allocation40_spill] sm:$0xff] %v2638_v18 }
 0x17b   :  { %1016 = vst [vmem:[#allocation1 + $0x20] ss:$4 sm:$0xff] %v2634_v16 }
 0x182   :  { %v2643_v21 = vld.sshfl [vmem:[#allocation1 + $0x20] sm:$0xff pattern:$0x73625140]  ;;  %v2645_v22 = vld.sshfl [vmem:[#allocation1 + $0x28] sm:$0xff pattern:$0x73625140] }
 0x183   :  { %4592 = vst [vmem:[#allocation41_spill] sm:$0xff] %v2643_v21  ;;  %v2371_v21 = vmov 839922192  }
 0x184   :  { %4593 = vst [vmem:[#allocation42_spill] sm:$0xff] %v2645_v22  ;;  %v223_v22 = vunpack.c.l.s4 %v2371_v21 }
 0x185   :  { %1051 = vst [vmem:[#allocation1 + $0x20] ss:$4 sm:$0xff] %v2641_v19 }
 0x186   :  { %v224_v44 = vunpack.c.0.s8 %v223_v22 }
 0x18c   :  { %v2648_v38 = vld.sshfl [vmem:[#allocation1 + $0x20] sm:$0xff pattern:$0x73625140]  ;;  %v2652_v2 = vld.sshfl [vmem:[#allocation1 + $0x28] sm:$0xff pattern:$0x73625140] }
 0x18d   :  { %4594 = vst [vmem:[#allocation43_spill] sm:$0xff] %v2648_v38 }
 0x18e   :  { %4595 = vst [vmem:[#allocation44_spill] sm:$0xff] %v2652_v2 }
 0x18f   :  { %1086 = vst [vmem:[#allocation1 + $0x20] ss:$4 sm:$0xff] %v2650_v3 }
 0x196   :  { %v2657_v18 = vld.sshfl [vmem:[#allocation1 + $0x20] sm:$0xff pattern:$0x73625140]  ;;  %v2659_v15 = vld.sshfl [vmem:[#allocation1 + $0x28] sm:$0xff pattern:$0x73625140] }
 0x197   :  { %4596 = vst [vmem:[#allocation45_spill] sm:$0xff] %v2657_v18  ;;  %v2372_v18 = vmov 4.0  }
 0x198   :  { %4597 = vst [vmem:[#allocation46_spill] sm:$0xff] %v2659_v15  ;;  %2267 = vrcp.f32 %v2372_v18  ;;  %v2672_v15 = vld [vmem:[#allocation6 + $0x60] sm:$0xf] }
 0x199   :  { %1121 = vst [vmem:[#allocation1 + $0x20] ss:$4 sm:$0xff] %v2655_v17 }
 0x19e   :  { %v2268_v10 = vpop.eup %2267 }
 0x19f   :  { %v276_v9 = vmul.f32 4.0, %v2268_v10  ;;  %vm280_vm11 = vweird.f32 %v2268_v10 }
 0x1a0   :  { %v2664_v38 = vld.sshfl [vmem:[#allocation1 + $0x20] sm:$0xff pattern:$0x73625140]  ;;  %v2666_v43 = vld.sshfl [vmem:[#allocation1 + $0x28] sm:$0xff pattern:$0x73625140] }
 0x1a1   :  { %4598 = vst [vmem:[#allocation47_spill] sm:$0xff] %v2664_v38 }
 0x1a2   :  { %4599 = vst [vmem:[#allocation48_spill] sm:$0xff] %v2666_v43 }
 0x1a3   :  { %1156 = vst [vmem:[#allocation1 + $0x20] ss:$4 sm:$0xff] %v2662_v14 }
 0x1aa   :  { %v2675_v21 = vld.sshfl [vmem:[#allocation1 + $0x20] sm:$0xff pattern:$0x73625140]  ;;  %v2677_v22 = vld.sshfl [vmem:[#allocation1 + $0x28] sm:$0xff pattern:$0x73625140] }
 0x1ab   :  { %4601 = vst [vmem:[#allocation50_spill] sm:$0xff] %v2675_v21 }
 0x1ac   :  { %4602 = vst [vmem:[#allocation51_spill] sm:$0xff] %v2677_v22 }
 0x1ad   :  { %1178 = vst [vmem:[#allocation1 + $0x20] ss:$4 sm:$0xff] %v2672_v15 }
 0x1b2   :  { %v217_v2 = vpop.permute.xlu0 %216 }
 0x1b3   :  { %v225_v60 = vperm.slane %v217_v2, %v224_v44 }
 0x1b5   :  { %v2670_v59 = vmul.f32 %v225_v60, %v2471_v0 }
 0x1b7   :  { %4600 = vst [vmem:[#allocation49_spill] sm:$0xff] %v2670_v59 }
 0x1b8   :  { %236 = vst [vmem:[#allocation1] ss:$2 sm:$0xff] %v2670_v59 }
 0x1ba   :  { %v221_v43 = vpop.permute.xlu1 %220 }
 0x1bb   :  { %v229_v38 = vperm.slane %v221_v43, %v224_v44  ;;  %v277_v43 = vsub.f32 1.0, %v276_v9 }
 0x1bd   :  { %v2681_v2 = vmul.f32 %v229_v38, %v2473_v1  ;;  %v278_v13 = vmul.f32 %v2268_v10, %v277_v43 }
 0x1bf   :  { %4603 = vst [vmem:[#allocation52_spill] sm:$0xff] %v2681_v2  ;;  %v237_v0 = vld.sshfl [vmem:[#allocation1] sm:$0xff pattern:$0x75316420] }
 0x1c0   :  { %v238_v60 = vld.sshfl [vmem:[#allocation1 + $0x8] sm:$0xff pattern:$0x75316420]  ;;  %v247_v18 = vsel %vm75_vm0, %v237_v0, 0.0  ;;  %240 = vst [vmem:[#allocation1 + $0x10] ss:$2 sm:$0xff] %v2681_v2 }
 0x1c1   :  { %286 = vst [vmem:[#allocation1] ss:$2 sm:$0xff] %v2670_v59  ;;  %v254_v37 = vsel %vm75_vm0, %v238_v60, 0.0  ;;  %v248_v22 = vrot.slane %v247_v18, 4 }
 0x1c2   :  { %v255_v21 = vrot.slane %v254_v37, 4 }
 0x1c3   :  { %v249_v54 = vadd.f32 %v248_v22, %v247_v18 }
 0x1c4   :  { %v256_v23 = vadd.f32 %v255_v21, %v254_v37 }
 0x1c5   :  { %v250_v52 = vrot.slane %v249_v54, 2 }
 0x1c6   :  { %v257_v44 = vrot.slane %v256_v23, 2 }
 0x1c7   :  { %v241_v12 = vld.sshfl [vmem:[#allocation1 + $0x10] sm:$0xff pattern:$0x75316420]  ;;  %v242_v55 = vld.sshfl [vmem:[#allocation1 + $0x18] sm:$0xff pattern:$0x75316420]  ;;  %v251_v59 = vadd.f32 %v250_v52, %v249_v54 }
 0x1c8   :  { %v287_v1 = vld.sshfl [vmem:[#allocation1] sm:$0xff pattern:$0x75316420]  ;;  %v288_v38 = vld.sshfl [vmem:[#allocation1 + $0x8] sm:$0xff pattern:$0x75316420]  ;;  %v258_v56 = vadd.f32 %v257_v44, %v256_v23  ;;  %v279_v23 = vadd.f32 %v2268_v10, %v278_v13 }
 0x1c9   :  { %290 = vst [vmem:[#allocation1 + $0x10] ss:$2 sm:$0xff] %v2681_v2  ;;  %v261_v0 = vsel %vm75_vm0, %v241_v12, 0.0  ;;  %v268_v60 = vsel %vm75_vm0, %v242_v55, 0.0  ;;  %v297_v48 = vsel %vm75_vm0, %v287_v1, -inf  ;;  %v304_v37 = vsel %vm75_vm0, %v288_v38, -inf }
 0x1ca   :  { %v305_v9 = vrot.slane %v304_v37, 4  ;;  %v262_v21 = vrot.slane %v261_v0, 4  ;;  %v259_v22 = vrot.slane %v258_v56, 1  ;;  %v269_v18 = vrot.slane %v268_v60, 4 }
 0x1cb   :  { %v298_v47 = vrot.slane %v297_v48, 4  ;;  %v252_v52 = vrot.slane %v251_v59, 1  ;;  %v281_v41 = vsel %vm280_vm11, %v2268_v10, %v279_v23 }
 0x1cc   :  { %v306_v43 = vmax.f32 %v304_v37, %v305_v9  ;;  %v263_v44 = vadd.f32 %v262_v21, %v261_v0  ;;  %v260_v12 = vadd.f32 %v259_v22, %v258_v56  ;;  %v270_v55 = vadd.f32 %v269_v18, %v268_v60 }
 0x1cd   :  { %v299_v54 = vmax.f32 %v297_v48, %v298_v47  ;;  %v253_v0 = vadd.f32 %v252_v52, %v251_v59 }
 0x1ce   :  { %v307_v2 = vrot.slane %v306_v43, 2  ;;  %v264_v6 = vrot.slane %v263_v44, 2  ;;  %v283_v21 = vmul.f32 %v281_v41, %v260_v12  ;;  %v271_v60 = vrot.slane %v270_v55, 2 }
 0x1cf   :  { %v300_v5 = vrot.slane %v299_v54, 2 }
 0x1d0   :  { %v291_v1 = vld.sshfl [vmem:[#allocation1 + $0x10] sm:$0xff pattern:$0x75316420]  ;;  %v292_v50 = vld.sshfl [vmem:[#allocation1 + $0x18] sm:$0xff pattern:$0x75316420]  ;;  %v308_v38 = vmax.f32 %v306_v43, %v307_v2  ;;  %v265_v49 = vadd.f32 %v264_v6, %v263_v44  ;;  %v282_v6 = vmul.f32 %v281_v41, %v253_v0 }
 0x1d1   :  { %347 = vst [vmem:[#allocation1] ss:$4 sm:$0xff] %v2502_v24  ;;  %v311_v40 = vsel %vm75_vm0, %v291_v1, -inf  ;;  %v318_v13 = vsel %vm75_vm0, %v292_v50, -inf  ;;  %v301_v37 = vmax.f32 %v299_v54, %v300_v5  ;;  %v272_v54 = vadd.f32 %v271_v60, %v270_v55 }
 0x1d2   :  { %v309_v9 = vrot.slane %v308_v38, 1  ;;  %v312_v47 = vrot.slane %v311_v40, 4  ;;  %v319_v48 = vrot.slane %v318_v13, 4  ;;  %v266_v2 = vrot.slane %v265_v49, 1 }
 0x1d3   :  { %v302_v56 = vrot.slane %v301_v37, 1  ;;  %v273_v0 = vrot.slane %v272_v54, 1 }
 0x1d4   :  { %v310_v10 = vmax.f32 %v308_v38, %v309_v9  ;;  %v313_v22 = vmax.f32 %v311_v40, %v312_v47  ;;  %v320_v18 = vmax.f32 %v318_v13, %v319_v48  ;;  %v267_v40 = vadd.f32 %v266_v2, %v265_v49 }
 0x1d5   :  { %v303_v23 = vmax.f32 %v301_v37, %v302_v56 }
 0x1d6   :  { %v2696_v24 = vsel %vm325_vm12, %v283_v21, %v310_v10  ;;  %v314_v43 = vrot.slane %v313_v22, 2  ;;  %v321_v50 = vrot.slane %v320_v18, 2  ;;  %v284_v38 = vmul.f32 %v281_v41, %v267_v40 }
 0x1d7   :  { %334 = vrot.lane.b32.xlu1 %v2696_v24, %s2373_s4  ;;  %v2701_v59 = vsel %vm325_vm12, %v282_v6, %v303_v23 }
 0x1d8   :  { %v2703_v5 = vld.sshfl [vmem:[#allocation1] sm:$0xff pattern:$0x73625140]  ;;  %v2705_v44 = vld.sshfl [vmem:[#allocation1 + $0x8] sm:$0xff pattern:$0x73625140]  ;;  %330 = vrot.lane.b32.xlu2 %v2701_v59, %s2373_s4  ;;  %v315_v52 = vmax.f32 %v313_v22, %v314_v43  ;;  %v322_v1 = vmax.f32 %v320_v18, %v321_v50 }
 0x1d9   :  { %382 = vst [vmem:[#allocation1] ss:$4 sm:$0xff] %v2509_v27  ;;  %v274_v27 = vadd.f32 %v273_v0, %v272_v54 }
 0x1da   :  { %v316_v12 = vrot.slane %v315_v52, 1  ;;  %v323_v9 = vrot.slane %v322_v1, 1 }
 0x1db   :  { %v285_v48 = vmul.f32 %v281_v41, %v274_v27 }
 0x1dc   :  { %v317_v13 = vmax.f32 %v315_v52, %v316_v12  ;;  %v324_v55 = vmax.f32 %v322_v1, %v323_v9 }
 0x1de   :  { %v2711_v37 = vsel %vm325_vm12, %v284_v38, %v317_v13  ;;  %v2723_v21 = vsel %vm325_vm12, %v285_v48, %v324_v55 }
 0x1df   :  { %368 = vrot.lane.b32.xlu0 %v2711_v37, %s2374_s18  ;;  %366 = vrot.lane.b32.xlu1 %v2701_v59, %s2374_s18 }
 0x1e0   :  { %v2715_v47 = vld.sshfl [vmem:[#allocation1] sm:$0xff pattern:$0x73625140]  ;;  %v2717_v49 = vld.sshfl [vmem:[#allocation1 + $0x8] sm:$0xff pattern:$0x73625140]  ;;  %332 = vrot.lane.b32.xlu2 %v2711_v37, %s2373_s4 }
 0x1e1   :  { %417 = vst [vmem:[#allocation1] ss:$4 sm:$0xff] %v2512_v28 }
 0x1e7   :  { %401 = vrot.lane.b32.xlu0 %v2701_v59, %s2375_s19  ;;  %372 = vrot.lane.b32.xlu1 %v2723_v21, %s2374_s18 }
 0x1e8   :  { %v2727_v56 = vld.sshfl [vmem:[#allocation1] sm:$0xff pattern:$0x73625140]  ;;  %v2729_v60 = vld.sshfl [vmem:[#allocation1 + $0x8] sm:$0xff pattern:$0x73625140]  ;;  %336 = vrot.lane.b32.xlu2 %v2723_v21, %s2373_s4 }
 0x1e9   :  { %452 = vst [vmem:[#allocation1] ss:$4 sm:$0xff] %v2519_v31  ;;  %s2400_s4 = smov 115  }
 0x1ef   :  { %407 = vrot.lane.b32.xlu0 %v2723_v21, %s2375_s19  ;;  %405 = vrot.lane.b32.xlu1 %v2696_v24, %s2375_s19 }
 0x1f0   :  { %v2736_v28 = vld.sshfl [vmem:[#allocation1] sm:$0xff pattern:$0x73625140]  ;;  %v2738_v41 = vld.sshfl [vmem:[#allocation1 + $0x8] sm:$0xff pattern:$0x73625140]  ;;  %370 = vrot.lane.b32.xlu2 %v2696_v24, %s2374_s18 }
 0x1f1   :  { %487 = vst [vmem:[#allocation1] ss:$4 sm:$0xff] %v2526_v34  ;;  %s2401_s18 = smov 114  }
 0x1f7   :  { %440 = vrot.lane.b32.xlu0 %v2696_v24, %s2376_s20  ;;  %438 = vrot.lane.b32.xlu1 %v2711_v37, %s2376_s20 }
 0x1f8   :  { %v2744_v10 = vld.sshfl [vmem:[#allocation1] sm:$0xff pattern:$0x73625140]  ;;  %v2746_v31 = vld.sshfl [vmem:[#allocation1 + $0x8] sm:$0xff pattern:$0x73625140]  ;;  %403 = vrot.lane.b32.xlu2 %v2711_v37, %s2375_s19 }
 0x1f9   :  { %522 = vst [vmem:[#allocation1] ss:$4 sm:$0xff] %v2536_v39  ;;  %s2402_s19 = smov 113  }
 0x1ff   :  { %473 = vrot.lane.b32.xlu0 %v2711_v37, %s2377_s21  ;;  %471 = vrot.lane.b32.xlu1 %v2701_v59, %s2377_s21 }
 0x200   :  { %v2752_v22 = vld.sshfl [vmem:[#allocation1] sm:$0xff pattern:$0x73625140]  ;;  %v2754_v34 = vld.sshfl [vmem:[#allocation1 + $0x8] sm:$0xff pattern:$0x73625140]  ;;  %436 = vrot.lane.b32.xlu2 %v2701_v59, %s2376_s20 }
 0x201   :  { %4604 = vst [vmem:[#allocation53_spill] sm:$0xff] %v2752_v22 }
 0x202   :  { %4605 = vst [vmem:[#allocation54_spill] sm:$0xff] %v2754_v34 }
 0x203   :  { %557 = vst [vmem:[#allocation1] ss:$4 sm:$0xff] %v2543_v46 }
 0x207   :  { %506 = vrot.lane.b32.xlu0 %v2701_v59, %s2378_s22  ;;  %477 = vrot.lane.b32.xlu1 %v2723_v21, %s2377_s21 }
 0x208   :  { %442 = vrot.lane.b32.xlu2 %v2723_v21, %s2376_s20  ;;  %s2403_s20 = smov 112  }
 0x20a   :  { %v2760_v18 = vld.sshfl [vmem:[#allocation1] sm:$0xff pattern:$0x73625140]  ;;  %v2762_v39 = vld.sshfl [vmem:[#allocation1 + $0x8] sm:$0xff pattern:$0x73625140] }
 0x20b   :  { %4606 = vst [vmem:[#allocation55_spill] sm:$0xff] %v2760_v18 }
 0x20c   :  { %4607 = vst [vmem:[#allocation56_spill] sm:$0xff] %v2762_v39 }
 0x20d   :  { %592 = vst [vmem:[#allocation1] ss:$4 sm:$0xff] %v2550_v53 }
 0x20f   :  { %512 = vrot.lane.b32.xlu0 %v2723_v21, %s2378_s22  ;;  %510 = vrot.lane.b32.xlu1 %v2696_v24, %s2378_s22 }
 0x210   :  { %475 = vrot.lane.b32.xlu2 %v2696_v24, %s2377_s21  ;;  %s2404_s21 = smov 111  }
 0x214   :  { %v2768_v2 = vld.sshfl [vmem:[#allocation1] sm:$0xff pattern:$0x73625140]  ;;  %v2770_v46 = vld.sshfl [vmem:[#allocation1 + $0x8] sm:$0xff pattern:$0x73625140] }
 0x215   :  { %627 = vst [vmem:[#allocation1] ss:$4 sm:$0xff] %v2557_v58 }
 0x217   :  { %545 = vrot.lane.b32.xlu0 %v2696_v24, %s2379_s23  ;;  %543 = vrot.lane.b32.xlu1 %v2711_v37, %s2379_s23 }
 0x218   :  { %508 = vrot.lane.b32.xlu2 %v2711_v37, %s2378_s22  ;;  %s2405_s22 = smov 110  }
 0x21c   :  { %v2776_v6 = vld.sshfl [vmem:[#allocation1] sm:$0xff pattern:$0x73625140]  ;;  %v2778_v53 = vld.sshfl [vmem:[#allocation1 + $0x8] sm:$0xff pattern:$0x73625140] }
 0x21d   :  { %4608 = vst [vmem:[#allocation57_spill] sm:$0xff] %v2776_v6 }
 0x21e   :  { %4609 = vst [vmem:[#allocation58_spill] sm:$0xff] %v2778_v53  ;;  %v1207_v53 = vld [vmem:[#allocation6 + $0x64] sm:$0xf] }
 0x21f   :  { %662 = vst [vmem:[#allocation1] ss:$4 sm:$0xff] %v2564_v7  ;;  %578 = vrot.lane.b32.xlu0 %v2711_v37, %s2380_s24  ;;  %576 = vrot.lane.b32.xlu1 %v2701_v59, %s2380_s24 }
 0x220   :  { %541 = vrot.lane.b32.xlu2 %v2701_v59, %s2379_s23 }
 0x226   :  { %v2784_v23 = vld.sshfl [vmem:[#allocation1] sm:$0xff pattern:$0x73625140]  ;;  %v2786_v58 = vld.sshfl [vmem:[#allocation1 + $0x8] sm:$0xff pattern:$0x73625140] }
 0x227   :  { %4610 = vst [vmem:[#allocation59_spill] sm:$0xff] %v2784_v23  ;;  %611 = vrot.lane.b32.xlu0 %v2701_v59, %s2381_s25  ;;  %582 = vrot.lane.b32.xlu1 %v2723_v21, %s2380_s24 }
 0x228   :  { %4611 = vst [vmem:[#allocation60_spill] sm:$0xff] %v2786_v58  ;;  %547 = vrot.lane.b32.xlu2 %v2723_v21, %s2379_s23  ;;  %s2406_s23 = smov 109  }
 0x229   :  { %697 = vst [vmem:[#allocation1] ss:$4 sm:$0xff] %v2571_v20 }
 0x22f   :  { %617 = vrot.lane.b32.xlu0 %v2723_v21, %s2381_s25  ;;  %615 = vrot.lane.b32.xlu1 %v2696_v24, %s2381_s25 }
 0x230   :  { %v2792_v43 = vld.sshfl [vmem:[#allocation1] sm:$0xff pattern:$0x73625140]  ;;  %v2794_v7 = vld.sshfl [vmem:[#allocation1 + $0x8] sm:$0xff pattern:$0x73625140]  ;;  %580 = vrot.lane.b32.xlu2 %v2696_v24, %s2380_s24 }
 0x231   :  { %4612 = vst [vmem:[#allocation61_spill] sm:$0xff] %v2792_v43  ;;  %s2407_s24 = smov 99  }
 0x232   :  { %4613 = vst [vmem:[#allocation62_spill] sm:$0xff] %v2794_v7  ;;  %v2806_v40 = vpop.permute.xlu2 %330 }
 0x233   :  { %732 = vst [vmem:[#allocation1] ss:$4 sm:$0xff] %v2578_v42 }
 0x237   :  { %650 = vrot.lane.b32.xlu0 %v2696_v24, %s2382_s26  ;;  %648 = vrot.lane.b32.xlu1 %v2711_v37, %s2382_s26 }
 0x238   :  { %613 = vrot.lane.b32.xlu2 %v2711_v37, %s2381_s25  ;;  %s2408_s25 = smov 98  }
 0x23a   :  { %v2800_v50 = vld.sshfl [vmem:[#allocation1] sm:$0xff pattern:$0x73625140]  ;;  %v2802_v20 = vld.sshfl [vmem:[#allocation1 + $0x8] sm:$0xff pattern:$0x73625140]  ;;  %v2816_v54 = vpop.permute.xlu2 %332 }
 0x23b   :  { %4614 = vst [vmem:[#allocation63_spill] sm:$0xff] %v2800_v50 }
 0x23c   :  { %4615 = vst [vmem:[#allocation64_spill] sm:$0xff] %v2802_v20 }
 0x23d   :  { %767 = vst [vmem:[#allocation1] ss:$4 sm:$0xff] %v2585_v45 }
 0x23f   :  { %683 = vrot.lane.b32.xlu0 %v2711_v37, %s2383_s27  ;;  %681 = vrot.lane.b32.xlu1 %v2701_v59, %s2383_s27 }
 0x240   :  { %646 = vrot.lane.b32.xlu2 %v2701_v59, %s2382_s26 }
 0x242   :  { %v2826_v1 = vpop.permute.xlu2 %336 }
 0x244   :  { %v2810_v42 = vld.sshfl [vmem:[#allocation1] sm:$0xff pattern:$0x73625140]  ;;  %v2812_v52 = vld.sshfl [vmem:[#allocation1 + $0x8] sm:$0xff pattern:$0x73625140] }
 0x245   :  { %4616 = vst [vmem:[#allocation65_spill] sm:$0xff] %v2810_v42 }
 0x246   :  { %4617 = vst [vmem:[#allocation66_spill] sm:$0xff] %v2812_v52 }
 0x247   :  { %802 = vst [vmem:[#allocation1] ss:$4 sm:$0xff] %v2592_v51  ;;  %716 = vrot.lane.b32.xlu0 %v2701_v59, %s2384_s28  ;;  %687 = vrot.lane.b32.xlu1 %v2723_v21, %s2383_s27 }
 0x248   :  { %652 = vrot.lane.b32.xlu2 %v2723_v21, %s2382_s26  ;;  %s2409_s26 = smov 97  }
 0x249   :  { %v2836_v13 = vpop.permute.xlu1 %334 }
 0x24a   :  { %v2838_v0 = vpop.permute.xlu2 %370 }
 0x24e   :  { %v2820_v45 = vld.sshfl [vmem:[#allocation1] sm:$0xff pattern:$0x73625140]  ;;  %v2822_v12 = vld.sshfl [vmem:[#allocation1 + $0x8] sm:$0xff pattern:$0x73625140] }
 0x24f   :  { %4618 = vst [vmem:[#allocation67_spill] sm:$0xff] %v2820_v45  ;;  %722 = vrot.lane.b32.xlu0 %v2723_v21, %s2384_s28  ;;  %720 = vrot.lane.b32.xlu1 %v2696_v24, %s2384_s28 }
 0x250   :  { %4619 = vst [vmem:[#allocation68_spill] sm:$0xff] %v2822_v12  ;;  %685 = vrot.lane.b32.xlu2 %v2696_v24, %s2383_s27  ;;  %s2410_s27 = smov 96  }
 0x251   :  { %837 = vst [vmem:[#allocation1] ss:$4 sm:$0xff] %v2599_v57  ;;  %v2848_v27 = vpop.permute.xlu1 %366  ;;  %v2850_v55 = vpop.permute.xlu0 %368 }
 0x257   :  { %755 = vrot.lane.b32.xlu0 %v2696_v24, %s2385_s29  ;;  %753 = vrot.lane.b32.xlu1 %v2711_v37, %s2385_s29 }
 0x258   :  { %v2830_v51 = vld.sshfl [vmem:[#allocation1] sm:$0xff pattern:$0x73625140]  ;;  %v2832_v38 = vld.sshfl [vmem:[#allocation1 + $0x8] sm:$0xff pattern:$0x73625140]  ;;  %718 = vrot.lane.b32.xlu2 %v2711_v37, %s2384_s28 }
 0x259   :  { %4620 = vst [vmem:[#allocation69_spill] sm:$0xff] %v2830_v51  ;;  %v2864_v51 = vpop.permute.xlu0 %401  ;;  %s2411_s28 = smov 95  }
 0x25a   :  { %4621 = vst [vmem:[#allocation70_spill] sm:$0xff] %v2832_v38 }
 0x25b   :  { %872 = vst [vmem:[#allocation1] ss:$4 sm:$0xff] %v2606_v61  ;;  %v2852_v61 = vpop.permute.xlu2 %403 }
 0x25f   :  { %788 = vrot.lane.b32.xlu0 %v2711_v37, %s2386_s30  ;;  %786 = vrot.lane.b32.xlu1 %v2701_v59, %s2386_s30 }
 0x260   :  { %751 = vrot.lane.b32.xlu2 %v2701_v59, %s2385_s29 }
 0x261   :  { %v2878_v45 = vpop.permute.xlu0 %407 }
 0x262   :  { %v2842_v57 = vld.sshfl [vmem:[#allocation1] sm:$0xff pattern:$0x73625140]  ;;  %v2844_v9 = vld.sshfl [vmem:[#allocation1 + $0x8] sm:$0xff pattern:$0x73625140] }
 0x263   :  { %4622 = vst [vmem:[#allocation71_spill] sm:$0xff] %v2842_v57  ;;  %v2866_v7 = vpop.permute.xlu2 %436 }
 0x264   :  { %4623 = vst [vmem:[#allocation72_spill] sm:$0xff] %v2844_v9 }
 0x265   :  { %907 = vst [vmem:[#allocation1] ss:$4 sm:$0xff] %v2613_v4  ;;  %v2862_v4 = vpop.permute.xlu1 %372 }
 0x267   :  { %821 = vrot.lane.b32.xlu0 %v2701_v59, %s2387_s8  ;;  %792 = vrot.lane.b32.xlu1 %v2723_v21, %s2386_s30 }
 0x268   :  { %757 = vrot.lane.b32.xlu2 %v2723_v21, %s2385_s29  ;;  %s2412_s29 = smov 94  }
 0x26b   :  { %v2880_v58 = vpop.permute.xlu2 %442 }
 0x26c   :  { %v2856_v48 = vld.sshfl [vmem:[#allocation1] sm:$0xff pattern:$0x73625140]  ;;  %v2858_v38 = vld.sshfl [vmem:[#allocation1 + $0x8] sm:$0xff pattern:$0x73625140] }
 0x26d   :  { %4624 = vst [vmem:[#allocation73_spill] sm:$0xff] %v2856_v48  ;;  %v2912_v48 = vld.sshfl [vmem:[#allocation1 + $0x20] sm:$0xff pattern:$0x73625140] }
 0x26e   :  { %4625 = vst [vmem:[#allocation74_spill] sm:$0xff] %v2858_v38 }
 0x26f   :  { %942 = vst [vmem:[#allocation1] ss:$4 sm:$0xff] %v2620_v8  ;;  %v2876_v8 = vpop.permute.xlu1 %405  ;;  %827 = vrot.lane.b32.xlu0 %v2723_v21, %s2387_s8  ;;  %825 = vrot.lane.b32.xlu1 %v2696_v24, %s2387_s8 }
 0x270   :  { %790 = vrot.lane.b32.xlu2 %v2696_v24, %s2386_s30  ;;  %4633 = vst [vmem:[#allocation82_spill] sm:$0xff] %v2912_v48  ;;  %s2413_s30 = smov 93  }
 0x273   :  { %v2894_v39 = vpop.permute.xlu2 %475 }
 0x276   :  { %v2870_v43 = vld.sshfl [vmem:[#allocation1] sm:$0xff pattern:$0x73625140]  ;;  %v2872_v12 = vld.sshfl [vmem:[#allocation1 + $0x8] sm:$0xff pattern:$0x73625140] }
 0x277   :  { %4626 = vst [vmem:[#allocation75_spill] sm:$0xff] %v2870_v43  ;;  %860 = vrot.lane.b32.xlu0 %v2696_v24, %s2388_s11  ;;  %858 = vrot.lane.b32.xlu1 %v2711_v37, %s2388_s11 }
 0x278   :  { %4627 = vst [vmem:[#allocation76_spill] sm:$0xff] %v2872_v12  ;;  %v2892_v12 = vpop.permute.xlu0 %440  ;;  %823 = vrot.lane.b32.xlu2 %v2711_v37, %s2387_s8  ;;  %s2414_s8 = smov 83  }
 0x279   :  { %977 = vst [vmem:[#allocation1] ss:$4 sm:$0xff] %v2627_v11  ;;  %v2890_v11 = vpop.permute.xlu1 %438 }
 0x27f   :  { %893 = vrot.lane.b32.xlu0 %v2711_v37, %s2389_s12  ;;  %891 = vrot.lane.b32.xlu1 %v2701_v59, %s2389_s12 }
 0x280   :  { %v2884_v23 = vld.sshfl [vmem:[#allocation1] sm:$0xff pattern:$0x73625140]  ;;  %v2886_v43 = vld.sshfl [vmem:[#allocation1 + $0x8] sm:$0xff pattern:$0x73625140]  ;;  %856 = vrot.lane.b32.xlu2 %v2701_v59, %s2388_s11 }
 0x281   :  { %4628 = vst [vmem:[#allocation77_spill] sm:$0xff] %v2884_v23  ;;  %v2908_v23 = vpop.permute.xlu2 %508 }
 0x282   :  { %4629 = vst [vmem:[#allocation78_spill] sm:$0xff] %v2886_v43  ;;  %v2904_v43 = vpop.permute.xlu1 %471 }
 0x283   :  { %1012 = vst [vmem:[#allocation1] ss:$4 sm:$0xff] %v2634_v16  ;;  %v2906_v16 = vpop.permute.xlu0 %473 }
 0x284   :  { %4632 = vst [vmem:[#allocation81_spill] sm:$0xff] %v2908_v23 }
 0x287   :  { %926 = vrot.lane.b32.xlu0 %v2701_v59, %s2390_s13  ;;  %897 = vrot.lane.b32.xlu1 %v2723_v21, %s2389_s12 }
 0x288   :  { %862 = vrot.lane.b32.xlu2 %v2723_v21, %s2388_s11  ;;  %s2415_s11 = smov 82  }
 0x289   :  { %v2926_v6 = vpop.permute.xlu2 %541 }
 0x28a   :  { %v2898_v18 = vld.sshfl [vmem:[#allocation1] sm:$0xff pattern:$0x73625140]  ;;  %v2900_v38 = vld.sshfl [vmem:[#allocation1 + $0x8] sm:$0xff pattern:$0x73625140]  ;;  %v2921_v52 = vpop.permute.xlu1 %477 }
 0x28b   :  { %4630 = vst [vmem:[#allocation79_spill] sm:$0xff] %v2898_v18  ;;  %v2914_v18 = vld.sshfl [vmem:[#allocation1 + $0x28] sm:$0xff pattern:$0x73625140]  ;;  %v2923_v42 = vpop.permute.xlu0 %506 }
 0x28c   :  { %4631 = vst [vmem:[#allocation80_spill] sm:$0xff] %v2900_v38 }
 0x28d   :  { %1047 = vst [vmem:[#allocation1] ss:$4 sm:$0xff] %v2641_v19 }
 0x28e   :  { %4634 = vst [vmem:[#allocation83_spill] sm:$0xff] %v2914_v18 }
 0x28f   :  { %4637 = vst [vmem:[#allocation86_spill] sm:$0xff] %v2923_v42  ;;  %932 = vrot.lane.b32.xlu0 %v2723_v21, %s2390_s13  ;;  %930 = vrot.lane.b32.xlu1 %v2696_v24, %s2390_s13 }
 0x290   :  { %4638 = vst [vmem:[#allocation87_spill] sm:$0xff] %v2926_v6  ;;  %895 = vrot.lane.b32.xlu2 %v2696_v24, %s2389_s12  ;;  %s2416_s12 = smov 81  }
 0x291   :  { %1213 = vst [vmem:[#allocation1 + $0x20] ss:$4 sm:$0xff] %v1207_v53 }
 0x292   :  { %v2933_v48 = vpop.permute.xlu1 %510 }
 0x293   :  { %4640 = vst [vmem:[#allocation89_spill] sm:$0xff] %v2933_v48 }
 0x294   :  { %v2917_v38 = vld.sshfl [vmem:[#allocation1] sm:$0xff pattern:$0x73625140]  ;;  %v2919_v19 = vld.sshfl [vmem:[#allocation1 + $0x8] sm:$0xff pattern:$0x73625140] }
 0x295   :  { %4635 = vst [vmem:[#allocation84_spill] sm:$0xff] %v2917_v38 }
 0x296   :  { %4636 = vst [vmem:[#allocation85_spill] sm:$0xff] %v2919_v19  ;;  %v2935_v19 = vpop.permute.xlu0 %512 }
 0x297   :  { %1082 = vst [vmem:[#allocation1] ss:$4 sm:$0xff] %v2650_v3  ;;  %v2939_v3 = vpop.permute.xlu2 %547  ;;  %965 = vrot.lane.b32.xlu0 %v2696_v24, %s2391_s0  ;;  %963 = vrot.lane.b32.xlu1 %v2711_v37, %s2391_s0 }
 0x298   :  { %4641 = vst [vmem:[#allocation90_spill] sm:$0xff] %v2935_v19  ;;  %928 = vrot.lane.b32.xlu2 %v2711_v37, %s2390_s13  ;;  %s2417_s13 = smov 80  }
 0x299   :  { %4643 = vst [vmem:[#allocation92_spill] sm:$0xff] %v2939_v3 }
 0x29a   :  { %v2945_v6 = vpop.permute.xlu1 %543 }
 0x29b   :  { %4644 = vst [vmem:[#allocation93_spill] sm:$0xff] %v2945_v6 }
 0x29e   :  { %v2931_v18 = vld.sshfl [vmem:[#allocation1] sm:$0xff pattern:$0x73625140]  ;;  %v2937_v38 = vld.sshfl [vmem:[#allocation1 + $0x8] sm:$0xff pattern:$0x73625140] }
 0x29f   :  { %4639 = vst [vmem:[#allocation88_spill] sm:$0xff] %v2931_v18  ;;  %v2947_v18 = vpop.permute.xlu0 %545  ;;  %998 = vrot.lane.b32.xlu0 %v2711_v37, %s2392_s5  ;;  %996 = vrot.lane.b32.xlu1 %v2701_v59, %s2392_s5 }
 0x2a0   :  { %4642 = vst [vmem:[#allocation91_spill] sm:$0xff] %v2937_v38  ;;  %v2953_v38 = vpop.permute.xlu2 %580  ;;  %961 = vrot.lane.b32.xlu2 %v2701_v59, %s2391_s0 }
 0x2a1   :  { %1117 = vst [vmem:[#allocation1] ss:$4 sm:$0xff] %v2655_v17 }
 0x2a2   :  { %4645 = vst [vmem:[#allocation94_spill] sm:$0xff] %v2947_v18  ;;  %v2959_v17 = vpop.permute.xlu1 %576 }
 0x2a7   :  { %v2961_v3 = vpop.permute.xlu0 %578  ;;  %1031 = vrot.lane.b32.xlu0 %v2701_v59, %s2393_s14  ;;  %1002 = vrot.lane.b32.xlu1 %v2723_v21, %s2392_s5 }
 0x2a8   :  { %v2949_v9 = vld.sshfl [vmem:[#allocation1] sm:$0xff pattern:$0x73625140]  ;;  %v2951_v57 = vld.sshfl [vmem:[#allocation1 + $0x8] sm:$0xff pattern:$0x73625140]  ;;  %967 = vrot.lane.b32.xlu2 %v2723_v21, %s2391_s0 }
 0x2a9   :  { %4646 = vst [vmem:[#allocation95_spill] sm:$0xff] %v2949_v9  ;;  %v2967_v9 = vpop.permute.xlu2 %613  ;;  %s2418_s0 = smov 79  }
 0x2aa   :  { %4647 = vst [vmem:[#allocation96_spill] sm:$0xff] %v2951_v57 }
 0x2ab   :  { %1152 = vst [vmem:[#allocation1] ss:$4 sm:$0xff] %v2662_v14  ;;  %v2973_v14 = vpop.permute.xlu1 %582 }
 0x2ac   :  { %4650 = vst [vmem:[#allocation99_spill] sm:$0xff] %v2967_v9 }
 0x2af   :  { %v2975_v57 = vpop.permute.xlu0 %611  ;;  %1037 = vrot.lane.b32.xlu0 %v2723_v21, %s2393_s14  ;;  %1035 = vrot.lane.b32.xlu1 %v2696_v24, %s2393_s14 }
 0x2b0   :  { %4651 = vst [vmem:[#allocation100_spill] sm:$0xff] %v2975_v57  ;;  %1000 = vrot.lane.b32.xlu2 %v2696_v24, %s2392_s5  ;;  %s2419_s5 = smov 78  }
 0x2b2   :  { %v2963_v6 = vld.sshfl [vmem:[#allocation1] sm:$0xff pattern:$0x73625140]  ;;  %v2965_v18 = vld.sshfl [vmem:[#allocation1 + $0x8] sm:$0xff pattern:$0x73625140] }
 0x2b3   :  { %4648 = vst [vmem:[#allocation97_spill] sm:$0xff] %v2963_v6  ;;  %v2988_v9 = vpop.permute.xlu1 %615 }
 0x2b4   :  { %4649 = vst [vmem:[#allocation98_spill] sm:$0xff] %v2965_v18  ;;  %v2981_v18 = vpop.permute.xlu2 %646 }
 0x2b5   :  { %1174 = vst [vmem:[#allocation1] ss:$4 sm:$0xff] %v2672_v15  ;;  %v2985_v15 = vld [vmem:[#allocation6 + $0x68] sm:$0xf] }
 0x2b6   :  { %4654 = vst [vmem:[#allocation103_spill] sm:$0xff] %v2981_v18 }
 0x2b7   :  { %4655 = vst [vmem:[#allocation104_spill] sm:$0xff] %v2985_v15  ;;  %v2990_v22 = vpop.permute.xlu0 %617  ;;  %1070 = vrot.lane.b32.xlu0 %v2696_v24, %s2394_s1  ;;  %1068 = vrot.lane.b32.xlu1 %v2711_v37, %s2394_s1 }
 0x2b8   :  { %4656 = vst [vmem:[#allocation105_spill] sm:$0xff] %v2988_v9  ;;  %1033 = vrot.lane.b32.xlu2 %v2711_v37, %s2393_s14  ;;  %s2420_s14 = smov 77  }
 0x2b9   :  { %4657 = vst [vmem:[#allocation106_spill] sm:$0xff] %v2990_v22 }
 0x2bb   :  { %v3004_v18 = vpop.permute.xlu1 %648 }
 0x2bc   :  { %v2977_v34 = vld.sshfl [vmem:[#allocation1] sm:$0xff pattern:$0x73625140]  ;;  %v2979_v6 = vld.sshfl [vmem:[#allocation1 + $0x8] sm:$0xff pattern:$0x73625140] }
 0x2bd   :  { %4652 = vst [vmem:[#allocation101_spill] sm:$0xff] %v2977_v34 }
 0x2be   :  { %4653 = vst [vmem:[#allocation102_spill] sm:$0xff] %v2979_v6  ;;  %v2996_v6 = vpop.permute.xlu2 %652 }
 0x2bf   :  { %1209 = vst [vmem:[#allocation1] ss:$4 sm:$0xff] %v1207_v53  ;;  %v3001_v53 = vld [vmem:[#allocation6 + $0x6c] sm:$0xf]  ;;  %v3006_v22 = vpop.permute.xlu0 %650  ;;  %1103 = vrot.lane.b32.xlu0 %v2711_v37, %s2395_s15  ;;  %1101 = vrot.lane.b32.xlu1 %v2701_v59, %s2395_s15 }
 0x2c0   :  { %4660 = vst [vmem:[#allocation109_spill] sm:$0xff] %v2996_v6  ;;  %1066 = vrot.lane.b32.xlu2 %v2701_v59, %s2394_s1 }
 0x2c1   :  { %4661 = vst [vmem:[#allocation110_spill] sm:$0xff] %v3001_v53 }
 0x2c2   :  { %4662 = vst [vmem:[#allocation111_spill] sm:$0xff] %v3004_v18 }
 0x2c3   :  { %4663 = vst [vmem:[#allocation112_spill] sm:$0xff] %v3006_v22  ;;  %v3020_v9 = vpop.permute.xlu1 %681 }
 0x2c4   :  { %4668 = vst [vmem:[#allocation117_spill] sm:$0xff] %v3020_v9  ;;  %v338_v9 = vlaneseq }
 0x2c6   :  { %v2992_v57 = vld.sshfl [vmem:[#allocation1] sm:$0xff pattern:$0x73625140]  ;;  %v2994_v34 = vld.sshfl [vmem:[#allocation1 + $0x8] sm:$0xff pattern:$0x73625140]  ;;  %v3012_v6 = vpop.permute.xlu2 %685 }
 0x2c7   :  { %4658 = vst [vmem:[#allocation107_spill] sm:$0xff] %v2992_v57  ;;  %v3022_v18 = vpop.permute.xlu0 %683  ;;  %v3045_v23 = vand.u32 127, %v338_v9  ;;  %1136 = vrot.lane.b32.xlu0 %v2701_v59, %s2396_s16  ;;  %1107 = vrot.lane.b32.xlu1 %v2723_v21, %s2395_s15 }
 0x2c8   :  { %4659 = vst [vmem:[#allocation108_spill] sm:$0xff] %v2994_v34  ;;  %1072 = vrot.lane.b32.xlu2 %v2723_v21, %s2394_s1 }
 0x2c9   :  { %1244 = vst [vmem:[#allocation1] ss:$4 sm:$0xff] %v2985_v15  ;;  %v3017_v15 = vld [vmem:[#allocation6 + $0x70] sm:$0xf]  ;;  %vm724_vm13 = vcmp.lt.s32.totalorder %v3045_v23, 31  ;;  %vm759_vm14 = vcmp.lt.s32.totalorder %v3045_v23, 30 }
 0x2ca   :  { %4666 = vst [vmem:[#allocation115_spill] sm:$0xff] %v3012_v6  ;;  %vm794_vm15 = vcmp.lt.s32.totalorder %v3045_v23, 29  ;;  %vm340_vm1 = vcmp.lt.s32.totalorder %v3045_v23, 51  ;;  %vm374_vm2 = vcmp.lt.s32.totalorder %v3045_v23, 50  ;;  %vm409_vm3 = vcmp.lt.s32.totalorder %v3045_v23, 49 }
 0x2cb   :  { %4667 = vst [vmem:[#allocation116_spill] sm:$0xff] %v3017_v15  ;;  %vm444_vm4 = vcmp.lt.s32.totalorder %v3045_v23, 48  ;;  %vm479_vm5 = vcmp.lt.s32.totalorder %v3045_v23, 47  ;;  %vm584_vm6 = vcmp.lt.s32.totalorder %v3045_v23, 35  ;;  %vm514_vm7 = vcmp.lt.s32.totalorder %v3045_v23, 46 }
 0x2cc   :  { %4669 = vst [vmem:[#allocation118_spill] sm:$0xff] %v3022_v18  ;;  %v3036_v18 = vpop.permute.xlu1 %687  ;;  %vm829_vm8 = vcmp.lt.s32.totalorder %v3045_v23, 19  ;;  %vm619_vm9 = vcmp.lt.s32.totalorder %v3045_v23, 34  ;;  %vm549_vm10 = vcmp.lt.s32.totalorder %v3045_v23, 45  ;;  %vm864_vm11 = vcmp.lt.s32.totalorder %v3045_v23, 18 }
 0x2cd   :  { %4673 = vst [vmem:[#allocation122_spill] sm:$0xff] %v3036_v18  ;;  %v3052_v18 = vld [vmem:[#allocation6 + $0x78] sm:$0xf]  ;;  %vm899_vm12 = vcmp.lt.s32.totalorder %v3045_v23, 17 }
 0x2ce   :  { %4676 = vst [vmem:[#allocation125_spill] sm:$0xff] %v3052_v18 }
 0x2cf   :  { %1142 = vrot.lane.b32.xlu0 %v2723_v21, %s2396_s16  ;;  %1140 = vrot.lane.b32.xlu1 %v2696_v24, %s2396_s16 }
 0x2d0   :  { %v3008_v57 = vld.sshfl [vmem:[#allocation1] sm:$0xff pattern:$0x73625140]  ;;  %v3010_v34 = vld.sshfl [vmem:[#allocation1 + $0x8] sm:$0xff pattern:$0x73625140]  ;;  %1105 = vrot.lane.b32.xlu2 %v2696_v24, %s2395_s15 }
 0x2d1   :  { %4664 = vst [vmem:[#allocation113_spill] sm:$0xff] %v3008_v57 }
 0x2d2   :  { %4665 = vst [vmem:[#allocation114_spill] sm:$0xff] %v3010_v34  ;;  %v719_v34 = vpop.permute.xlu2 %718 }
 0x2d3   :  { %1279 = vst [vmem:[#allocation1] ss:$4 sm:$0xff] %v3001_v53  ;;  %v3033_v53 = vld [vmem:[#allocation6 + $0x74] sm:$0xf] }
 0x2d4   :  { %4672 = vst [vmem:[#allocation121_spill] sm:$0xff] %v3033_v53 }
 0x2d7   :  { %1197 = vrot.lane.b32.xlu0 %v2696_v24, %s2397_s17  ;;  %1195 = vrot.lane.b32.xlu1 %v2711_v37, %s2397_s17 }
 0x2d8   :  { %1138 = vrot.lane.b32.xlu2 %v2711_v37, %s2396_s16 }
 0x2da   :  { %v3024_v22 = vld.sshfl [vmem:[#allocation1] sm:$0xff pattern:$0x73625140]  ;;  %v3026_v57 = vld.sshfl [vmem:[#allocation1 + $0x8] sm:$0xff pattern:$0x73625140] }
 0x2db   :  { %4670 = vst [vmem:[#allocation119_spill] sm:$0xff] %v3024_v22  ;;  %v3038_v22 = vpop.permute.xlu0 %716 }
 0x2dc   :  { %4671 = vst [vmem:[#allocation120_spill] sm:$0xff] %v3026_v57 }
 0x2dd   :  { %1314 = vst [vmem:[#allocation1] ss:$4 sm:$0xff] %v3017_v15  ;;  %v752_v15 = vpop.permute.xlu2 %751 }
 0x2df   :  { %1230 = vrot.lane.b32.xlu0 %v2711_v37, %s2398_s2  ;;  %1228 = vrot.lane.b32.xlu1 %v2701_v59, %s2398_s2 }
 0x2e0   :  { %1193 = vrot.lane.b32.xlu2 %v2701_v59, %s2397_s17 }
 0x2e4   :  { %v3040_v57 = vld.sshfl [vmem:[#allocation1] sm:$0xff pattern:$0x73625140]  ;;  %v3042_v6 = vld.sshfl [vmem:[#allocation1 + $0x8] sm:$0xff pattern:$0x73625140] }
 0x2e5   :  { %4674 = vst [vmem:[#allocation123_spill] sm:$0xff] %v3040_v57  ;;  %v723_v57 = vpop.permute.xlu0 %722  ;;  %v758_v19 = vpop.permute.xlu2 %757 }
 0x2e6   :  { %4675 = vst [vmem:[#allocation124_spill] sm:$0xff] %v3042_v6  ;;  %v3056_v6 = vpop.permute.xlu1 %720  ;;  %v3064_v20 = vsel %vm724_vm13, %v719_v34, %v723_v57  ;;  %v3068_v50 = vsel %vm724_vm13, %v723_v57, %v719_v34 }
 0x2e7   :  { %1349 = vst [vmem:[#allocation1] ss:$4 sm:$0xff] %v3033_v53  ;;  %1263 = vrot.lane.b32.xlu0 %v2701_v59, %s2399_s3  ;;  %1234 = vrot.lane.b32.xlu1 %v2723_v21, %s2398_s2 }
 0x2e8   :  { %4679 = vst [vmem:[#allocation128_spill] sm:$0xff] %v3064_v20  ;;  %1199 = vrot.lane.b32.xlu2 %v2723_v21, %s2397_s17 }
 0x2e9   :  { %4680 = vst [vmem:[#allocation129_spill] sm:$0xff] %v3068_v50 }
 0x2ed   :  { %v756_v20 = vpop.permute.xlu0 %755  ;;  %v791_v42 = vpop.permute.xlu2 %790 }
 0x2ee   :  { %v3058_v53 = vld.sshfl [vmem:[#allocation1] sm:$0xff pattern:$0x73625140]  ;;  %v3060_v9 = vld.sshfl [vmem:[#allocation1 + $0x8] sm:$0xff pattern:$0x73625140]  ;;  %v3088_v48 = vsel %vm759_vm14, %v752_v15, %v756_v20  ;;  %v3090_v63 = vsel %vm759_vm14, %v756_v20, %v752_v15 }
 0x2ef   :  { %4677 = vst [vmem:[#allocation126_spill] sm:$0xff] %v3058_v53  ;;  %v754_v53 = vpop.permute.xlu1 %753  ;;  %1269 = vrot.lane.b32.xlu0 %v2723_v21, %s2399_s3  ;;  %1267 = vrot.lane.b32.xlu1 %v2696_v24, %s2399_s3 }
 0x2f0   :  { %4678 = vst [vmem:[#allocation127_spill] sm:$0xff] %v3060_v9  ;;  %v3076_v9 = vld [vmem:[#allocation6 + $0x7c] sm:$0xf]  ;;  %v3086_v50 = vsel %vm759_vm14, %v758_v19, %v754_v53  ;;  %1232 = vrot.lane.b32.xlu2 %v2696_v24, %s2398_s2 }
 0x2f1   :  { %1384 = vst [vmem:[#allocation1] ss:$4 sm:$0xff] %v3052_v18  ;;  %v3084_v18 = vsel %vm759_vm14, %v754_v53, %v758_v19  ;;  %vm689_vm14 = vcmp.lt.s32.totalorder %v3045_v23, 32 }
 0x2f2   :  { %4681 = vst [vmem:[#allocation130_spill] sm:$0xff] %v3076_v9 }
 0x2f3   :  { %4684 = vst [vmem:[#allocation133_spill] sm:$0xff] %v3084_v18 }
 0x2f4   :  { %4685 = vst [vmem:[#allocation134_spill] sm:$0xff] %v3086_v50  ;;  %v342_v50 = vsel %vm340_vm1, %v2816_v54, %v2826_v1 }
 0x2f5   :  { %v789_v20 = vpop.permute.xlu0 %788  ;;  %v3116_v18 = vpop.permute.xlu2 %823 }
 0x2f7   :  { %v787_v19 = vpop.permute.xlu1 %786  ;;  %1302 = vrot.lane.b32.xlu0 %v2696_v24, %s2400_s4  ;;  %1300 = vrot.lane.b32.xlu1 %v2711_v37, %s2400_s4 }
 0x2f8   :  { %v3080_v34 = vld.sshfl [vmem:[#allocation1] sm:$0xff pattern:$0x73625140]  ;;  %v3082_v57 = vld.sshfl [vmem:[#allocation1 + $0x8] sm:$0xff pattern:$0x73625140]  ;;  %1265 = vrot.lane.b32.xlu2 %v2711_v37, %s2399_s3 }
 0x2f9   :  { %4682 = vst [vmem:[#allocation131_spill] sm:$0xff] %v3080_v34  ;;  %v3110_v34 = vsel %vm794_vm15, %v787_v19, %v791_v42  ;;  %s2176_s3 = sshll.u32 %s4525_s7, 4  ;;  %s2177_s3 = int_to_ptr.hbm [resolvable:$true] %s2176_s3 }
 0x2fa   :  { %4683 = vst [vmem:[#allocation132_spill] sm:$0xff] %v3082_v57  ;;  %v3098_v57 = vld [vmem:[#allocation6 + $0x80] sm:$0xf] }
 0x2fb   :  { %1419 = vst [vmem:[#allocation1] ss:$4 sm:$0xff] %v3076_v9  ;;  %v3114_v9 = vsel %vm794_vm15, %v791_v42, %v787_v19  ;;  %v377_v42 = vsel %vm374_vm2, %v2838_v0, %v2848_v27  ;;  %v375_v19 = vsel %vm374_vm2, %v2848_v27, %v2838_v0 }
 0x2fc   :  { %4686 = vst [vmem:[#allocation135_spill] sm:$0xff] %v3098_v57 }
 0x2fd   :  { %4689 = vst [vmem:[#allocation138_spill] sm:$0xff] %v3110_v34  ;;  %v343_v34 = vsel %vm340_vm1, %v2836_v13, %v2806_v40  ;;  %v822_v27 = vpop.permute.xlu0 %821 }
 0x2fe   :  { %4690 = vst [vmem:[#allocation139_spill] sm:$0xff] %v3114_v9  ;;  %v378_v9 = vsel %vm374_vm2, %v2862_v4, %v2850_v55 }
 0x2ff   :  { %v3165_v0 = vmul.f32 %v2514_v29, %v378_v9  ;;  %v412_v29 = vsel %vm409_vm3, %v2876_v8, %v2864_v51  ;;  %1335 = vrot.lane.b32.xlu0 %v2711_v37, %s2401_s18  ;;  %1333 = vrot.lane.b32.xlu1 %v2701_v59, %s2401_s18 }
 0x300   :  { %1298 = vrot.lane.b32.xlu2 %v2701_v59, %s2400_s4 }
 0x302   :  { %v3103_v15 = vld.sshfl [vmem:[#allocation1] sm:$0xff pattern:$0x73625140]  ;;  %v3105_v53 = vld.sshfl [vmem:[#allocation1 + $0x8] sm:$0xff pattern:$0x73625140] }
 0x303   :  { %4687 = vst [vmem:[#allocation136_spill] sm:$0xff] %v3103_v15  ;;  %v341_v15 = vsel %vm340_vm1, %v2806_v40, %v2836_v13  ;;  %v3147_v40 = vld [vmem:[#allocation6 + $0x84] sm:$0xf]  ;;  %v3150_v13 = vmul.f32 %v2703_v5, %v343_v34  ;;  %v3194_v34 = vpop.permute.xlu2 %856 }
 0x304   :  { %4688 = vst [vmem:[#allocation137_spill] sm:$0xff] %v3105_v53  ;;  %v344_v53 = vsel %vm340_vm1, %v2826_v1, %v2816_v54  ;;  %v3140_v1 = vmul.f32 %v2507_v26, %v342_v50  ;;  %v3156_v26 = vmul.f32 %v2715_v47, %v377_v42  ;;  %v3162_v50 = vmul.f32 %v2717_v49, %v375_v19  ;;  %v793_v47 = vpop.permute.xlu1 %792 }
 0x305   :  { %1454 = vst [vmem:[#allocation1] ss:$4 sm:$0xff] %v3098_v57  ;;  %v376_v57 = vsel %vm374_vm2, %v2850_v55, %v2862_v4  ;;  %v3137_v54 = vmul.f32 %v2505_v25, %v344_v53  ;;  %v3153_v25 = vmul.f32 %v2705_v44, %v341_v15  ;;  %v410_v44 = vsel %vm409_vm3, %v2864_v51, %v2876_v8 }
 0x306   :  { %4691 = vst [vmem:[#allocation140_spill] sm:$0xff] %v3147_v40  ;;  %v3168_v5 = vmul.f32 %v2516_v30, %v376_v57  ;;  %v413_v30 = vsel %vm409_vm3, %v2878_v45, %v2852_v61  ;;  %v3188_v49 = vsel %vm794_vm15, %v789_v20, %v793_v47  ;;  %v3192_v9 = vsel %vm794_vm15, %v793_v47, %v789_v20 }
 0x307   :  { %v411_v51 = vsel %vm409_vm3, %v2852_v61, %v2878_v45  ;;  %v446_v8 = vsel %vm444_vm4, %v2890_v11, %v2880_v58  ;;  %v448_v57 = vsel %vm444_vm4, %v2880_v58, %v2890_v11  ;;  %v445_v20 = vsel %vm444_vm4, %v2866_v7, %v2892_v12  ;;  %1368 = vrot.lane.b32.xlu0 %v2701_v59, %s2402_s19 }
 0x308   :  { %v447_v45 = vsel %vm444_vm4, %v2892_v12, %v2866_v7  ;;  %v482_v61 = vsel %vm479_vm5, %v2894_v39, %v2904_v43  ;;  %v3224_v58 = vmul.f32 %v2727_v56, %v412_v29  ;;  %v3227_v11 = vmul.f32 %v2729_v60, %v410_v44  ;;  %1339 = vrot.lane.b32.xlu1 %v2723_v21, %s2401_s18 }
 0x309   :  { %v3230_v15 = vmul.f32 %v2521_v32, %v413_v30  ;;  %v480_v7 = vsel %vm479_vm5, %v2904_v43, %v2894_v39  ;;  %v3237_v12 = vmul.f32 %v2523_v33, %v411_v51  ;;  %v465_v53 = vmul.f32 %v2528_v35, %v448_v57  ;;  %v3255_v33 = vld [vmem:[#allocation6 + $0x88] sm:$0xf]  ;;  %v4698_v57 = vld [vmem:[#allocation12_spill] sm:$0xff]  ;;  %1304 = vrot.lane.b32.xlu2 %v2723_v21, %s2400_s4 }
 0x30a   :  { %v466_v42 = vmul.f32 %v2530_v36, %v446_v8  ;;  %v587_v56 = vsel %vm584_vm6, %v2953_v38, %v2959_v17  ;;  %v463_v32 = vmul.f32 %v2736_v28, %v447_v45  ;;  %v464_v60 = vmul.f32 %v2738_v41, %v445_v20  ;;  %4694 = vst [vmem:[#allocation143_spill] sm:$0xff] %v3255_v33  ;;  %v4697_v51 = vld [vmem:[#allocation18_spill] sm:$0xff]  ;;  %v4699_v45 = vld [vmem:[#allocation89_spill] sm:$0xff] }
 0x30b   :  { %v3248_v19 = vmul.f32 %v2744_v10, %v482_v61  ;;  %v3258_v35 = vmul.f32 %v2746_v31, %v480_v7  ;;  %v585_v36 = vsel %vm584_vm6, %v2959_v17, %v2953_v38  ;;  %v586_v28 = vsel %vm584_vm6, %v2961_v3, %v2973_v14  ;;  %v863_v47 = vpop.permute.xlu2 %862  ;;  %v4700_v61 = vld [vmem:[#allocation86_spill] sm:$0xff] }
 0x30c   :  { %v3174_v55 = vld.sshfl [vmem:[#allocation1] sm:$0xff pattern:$0x73625140]  ;;  %v3176_v4 = vld.sshfl [vmem:[#allocation1 + $0x8] sm:$0xff pattern:$0x73625140]  ;;  %v588_v41 = vsel %vm584_vm6, %v2973_v14, %v2961_v3  ;;  %v483_v10 = vsel %vm479_vm5, %v2921_v52, %v2906_v16  ;;  %v603_v31 = vmul.f32 %v2768_v2, %v587_v56  ;;  %v725_v39 = vsel %vm724_vm13, %v3038_v22, %v3056_v6  ;;  %v826_v38 = vpop.permute.xlu1 %825  ;;  %v828_v3 = vpop.permute.xlu0 %827 }
 0x30d   :  { %4692 = vst [vmem:[#allocation141_spill] sm:$0xff] %v3174_v55  ;;  %v727_v43 = vsel %vm724_vm13, %v3056_v6, %v3038_v22  ;;  %v3293_v44 = vsel %vm829_vm8, %v822_v27, %v826_v38  ;;  %v3297_v2 = vsel %vm829_vm8, %v826_v38, %v822_v27  ;;  %v3302_v29 = vsel %vm829_vm8, %v3116_v18, %v828_v3  ;;  %v4703_v56 = vld [vmem:[#allocation129_spill] sm:$0xff]  ;;  %v4723_v55 = vld [vmem:[#allocation58_spill] sm:$0xff] }
 0x30e   :  { %4693 = vst [vmem:[#allocation142_spill] sm:$0xff] %v3176_v4  ;;  %v3307_v22 = vsel %vm829_vm8, %v828_v3, %v3116_v18  ;;  %v481_v6 = vsel %vm479_vm5, %v2906_v16, %v2921_v52  ;;  %v604_v27 = vmul.f32 %v2770_v46, %v585_v36  ;;  %v605_v30 = vmul.f32 %v2559_v62, %v588_v41  ;;  %v4701_v46 = vld [vmem:[#allocation63_spill] sm:$0xff]  ;;  %v4702_v52 = vld [vmem:[#allocation64_spill] sm:$0xff]  ;;  %v4704_v36 = vld [vmem:[#allocation25_spill] sm:$0xff] }
 0x30f   :  { %1489 = vst [vmem:[#allocation1] ss:$4 sm:$0xff] %v3147_v40  ;;  %v606_v8 = vmul.f32 %v4697_v51, %v586_v28  ;;  %v500_v20 = vmul.f32 %v4698_v57, %v483_v10  ;;  %v515_v18 = vsel %vm514_vm7, %v4700_v61, %v4699_v45  ;;  %v517_v7 = vsel %vm514_vm7, %v4699_v45, %v4700_v61  ;;  %v4705_v41 = vld [vmem:[#allocation128_spill] sm:$0xff]  ;;  %v4706_v10 = vld [vmem:[#allocation26_spill] sm:$0xff]  ;;  %v4707_v3 = vld [vmem:[#allocation13_spill] sm:$0xff] }
 0x310   :  { %v743_v62 = vmul.f32 %v4701_v46, %v727_v43  ;;  %v744_v16 = vmul.f32 %v4702_v52, %v725_v39  ;;  %v745_v28 = vmul.f32 %v4704_v36, %v4703_v56  ;;  %v746_v38 = vmul.f32 %v4706_v10, %v4705_v41  ;;  %v4708_v57 = vld [vmem:[#allocation90_spill] sm:$0xff]  ;;  %v4710_v56 = vld [vmem:[#allocation53_spill] sm:$0xff]  ;;  %1374 = vrot.lane.b32.xlu0 %v2723_v21, %s2402_s19 }
 0x311   :  { %v501_v51 = vmul.f32 %v4707_v3, %v481_v6  ;;  %v607_v61 = vadd.f32 %v603_v31, %v463_v32  ;;  %v608_v39 = vadd.f32 %v604_v27, %v464_v60  ;;  %v609_v46 = vadd.f32 %v605_v30, %v465_v53  ;;  %v3348_v6 = vld [vmem:[#allocation6 + $0x8c] sm:$0xf]  ;;  %v4711_v41 = vld [vmem:[#allocation54_spill] sm:$0xff]  ;;  %v4713_v32 = vld [vmem:[#allocation100_spill] sm:$0xff]  ;;  %1372 = vrot.lane.b32.xlu1 %v2696_v24, %s2402_s19 }
 0x312   :  { %v610_v52 = vadd.f32 %v606_v8, %v466_v42  ;;  %v533_v36 = vmul.f32 %v4710_v56, %v517_v7  ;;  %v534_v10 = vmul.f32 %v4711_v41, %v515_v18  ;;  %vm654_vm13 = vcmp.lt.s32.totalorder %v3045_v23, 33  ;;  %1337 = vrot.lane.b32.xlu2 %v2696_v24, %s2401_s18 }
 0x313   :  { %v747_v60 = vadd.f32 %v743_v62, %v607_v61  ;;  %v748_v31 = vadd.f32 %v744_v16, %v608_v39  ;;  %v749_v27 = vadd.f32 %v745_v28, %v609_v46  ;;  %v896_v41 = vpop.permute.xlu2 %895  ;;  %v4716_v28 = vld [vmem:[#allocation33_spill] sm:$0xff]  ;;  %v4717_v61 = vld [vmem:[#allocation34_spill] sm:$0xff]  ;;  %v4718_v46 = vld [vmem:[#allocation71_spill] sm:$0xff]  ;;  %vm934_vm15 = vcmp.lt.s32.totalorder %v3045_v23, 16 }
 0x314   :  { %v750_v30 = vadd.f32 %v746_v38, %v610_v52  ;;  %v859_v8 = vpop.permute.xlu1 %858  ;;  %v861_v7 = vpop.permute.xlu0 %860  ;;  %vm969_vm1 = vcmp.lt.s32.totalorder %v3045_v23, 15  ;;  %vm1004_vm2 = vcmp.lt.s32.totalorder %v3045_v23, 14  ;;  %vm1039_vm3 = vcmp.lt.s32.totalorder %v3045_v23, 13 }
 0x315   :  { %v868_v56 = vsel %vm864_vm11, %v863_v47, %v859_v8  ;;  %v865_v62 = vsel %vm864_vm11, %v3194_v34, %v861_v7  ;;  %v867_v16 = vsel %vm864_vm11, %v861_v7, %v3194_v34  ;;  %vm1074_vm4 = vcmp.lt.s32.totalorder %v3045_v23, 3 }
 0x316   :  { %v3287_v17 = vld.sshfl [vmem:[#allocation1] sm:$0xff pattern:$0x73625140]  ;;  %v3289_v14 = vld.sshfl [vmem:[#allocation1 + $0x8] sm:$0xff pattern:$0x73625140]  ;;  %v885_v38 = vmul.f32 %v4716_v28, %v868_v56  ;;  %v883_v52 = vmul.f32 %v4718_v46, %v867_v16 }
 0x317   :  { %4695 = vst [vmem:[#allocation144_spill] sm:$0xff] %v3287_v17  ;;  %v4722_v17 = vld [vmem:[#allocation57_spill] sm:$0xff]  ;;  %vm1109_vm5 = vcmp.lt.s32.totalorder %v3045_v23, 2  ;;  %vm1144_vm6 = vcmp.lt.s32.totalorder %v3045_v23, 1  ;;  %vm1236_vm8 = vcmp.lt.s32.totalorder %v3045_v23, 126 }
 0x318   :  { %4696 = vst [vmem:[#allocation145_spill] sm:$0xff] %v3289_v14  ;;  %v4709_v14 = vld [vmem:[#allocation81_spill] sm:$0xff]  ;;  %v3385_v40 = vadd.f32 %v885_v38, %v749_v27  ;;  %v3389_v7 = vadd.f32 %v883_v52, %v747_v60  ;;  %v4725_v60 = vld [vmem:[#allocation66_spill] sm:$0xff]  ;;  %v4733_v52 = vld [vmem:[#allocation87_spill] sm:$0xff]  ;;  %1407 = vrot.lane.b32.xlu0 %v2696_v24, %s2403_s20 }
 0x319   :  { %1524 = vst [vmem:[#allocation1] ss:$4 sm:$0xff] %v3255_v33  ;;  %v516_v45 = vsel %vm514_vm7, %v4709_v14, %v4708_v57  ;;  %v518_v43 = vsel %vm514_vm7, %v4708_v57, %v4709_v14  ;;  %v4712_v14 = vld [vmem:[#allocation105_spill] sm:$0xff]  ;;  %v866_v57 = vsel %vm864_vm11, %v859_v8, %v863_v47  ;;  %v4720_v47 = vld [vmem:[#allocation14_spill] sm:$0xff]  ;;  %1405 = vrot.lane.b32.xlu1 %v2711_v37, %s2403_s20  ;;  %vm1201_vm7 = vcmp.lt.s32.totalorder %v3045_v23, 127 }
 0x31a   :  { %v620_v53 = vsel %vm619_vm9, %v4713_v32, %v4712_v14  ;;  %v622_v42 = vsel %vm619_vm9, %v4712_v14, %v4713_v32  ;;  %v886_v39 = vmul.f32 %v4717_v61, %v866_v57  ;;  %v4719_v14 = vld [vmem:[#allocation72_spill] sm:$0xff]  ;;  %v535_v8 = vmul.f32 %v4720_v47, %v518_v43  ;;  %v4730_v16 = vld [vmem:[#allocation73_spill] sm:$0xff]  ;;  %v4731_v38 = vld [vmem:[#allocation74_spill] sm:$0xff]  ;;  %1370 = vrot.lane.b32.xlu2 %v2711_v37, %s2402_s19 }
 0x31b   :  { %v884_v32 = vmul.f32 %v4719_v14, %v865_v62  ;;  %v638_v4 = vmul.f32 %v4722_v17, %v622_v42  ;;  %v639_v33 = vmul.f32 %v4723_v55, %v620_v53  ;;  %v502_v57 = vadd.f32 %v3248_v19, %v3150_v13  ;;  %v4724_v53 = vld [vmem:[#allocation65_spill] sm:$0xff]  ;;  %v4734_v14 = vld [vmem:[#allocation94_spill] sm:$0xff]  ;;  %v4735_v47 = vld [vmem:[#allocation19_spill] sm:$0xff] }
 0x31c   :  { %v3387_v34 = vadd.f32 %v886_v39, %v750_v30  ;;  %v503_v43 = vadd.f32 %v3258_v35, %v3153_v25  ;;  %v505_v17 = vadd.f32 %v501_v51, %v3140_v1  ;;  %v3400_v55 = vadd.f32 %v533_v36, %v3156_v26  ;;  %v4727_v25 = vld [vmem:[#allocation92_spill] sm:$0xff]  ;;  %v4729_v51 = vld [vmem:[#allocation99_spill] sm:$0xff]  ;;  %v894_v36 = vpop.permute.xlu0 %893 }
 0x31d   :  { %v3391_v56 = vadd.f32 %v884_v32, %v748_v31  ;;  %v778_v42 = vmul.f32 %v4724_v53, %v3090_v63  ;;  %v779_v31 = vmul.f32 %v4725_v60, %v3088_v48  ;;  %v3414_v1 = vadd.f32 %v534_v10, %v3162_v50  ;;  %v4726_v48 = vld [vmem:[#allocation93_spill] sm:$0xff]  ;;  %v4732_v39 = vld [vmem:[#allocation16_spill] sm:$0xff] }
 0x31e   :  { %v3417_v13 = vadd.f32 %v535_v8, %v3165_v0  ;;  %v553_v26 = vsel %vm549_vm10, %v4727_v25, %v4726_v48  ;;  %v642_v19 = vadd.f32 %v638_v4, %v502_v57  ;;  %v643_v35 = vadd.f32 %v639_v33, %v503_v43  ;;  %v4737_v43 = vld [vmem:[#allocation17_spill] sm:$0xff] }
 0x31f   :  { %v551_v4 = vsel %vm549_vm10, %v4726_v48, %v4727_v25  ;;  %v570_v46 = vmul.f32 %v4732_v39, %v553_v26  ;;  %v552_v32 = vsel %vm549_vm10, %v4734_v14, %v4733_v52  ;;  %v4738_v48 = vld [vmem:[#allocation109_spill] sm:$0xff]  ;;  %v4739_v25 = vld [vmem:[#allocation111_spill] sm:$0xff]  ;;  %vm1341_vm11 = vcmp.lt.s32.totalorder %v3045_v23, 114 }
 0x320   :  { %v3362_v18 = vld.sshfl [vmem:[#allocation1] sm:$0xff pattern:$0x73625140]  ;;  %v3364_v3 = vld.sshfl [vmem:[#allocation1 + $0x8] sm:$0xff pattern:$0x73625140]  ;;  %v783_v62 = vadd.f32 %v779_v31, %v643_v35  ;;  %v571_v53 = vmul.f32 %v4737_v43, %v551_v4  ;;  %v656_v26 = vsel %vm654_vm13, %v4739_v25, %v4738_v48  ;;  %1440 = vrot.lane.b32.xlu0 %v2711_v37, %s2404_s21 }
 0x321   :  { %4714 = vst [vmem:[#allocation18_spill] sm:$0xff] %v3362_v18  ;;  %v4740_v35 = vld [vmem:[#allocation112_spill] sm:$0xff]  ;;  %v4743_v4 = vld [vmem:[#allocation134_spill] sm:$0xff]  ;;  %1438 = vrot.lane.b32.xlu1 %v2701_v59, %s2404_s21 }
 0x322   :  { %4715 = vst [vmem:[#allocation12_spill] sm:$0xff] %v3364_v3  ;;  %v4721_v3 = vld [vmem:[#allocation15_spill] sm:$0xff]  ;;  %1403 = vrot.lane.b32.xlu2 %v2701_v59, %s2403_s20 }
 0x323   :  { %1559 = vst [vmem:[#allocation1] ss:$4 sm:$0xff] %v3348_v6  ;;  %v536_v18 = vmul.f32 %v4721_v3, %v516_v45  ;;  %v504_v45 = vadd.f32 %v500_v20, %v3137_v54  ;;  %v3411_v54 = vld [vmem:[#allocation6 + $0x90] sm:$0xf]  ;;  %v4728_v20 = vld [vmem:[#allocation106_spill] sm:$0xff]  ;;  %v782_v3 = vadd.f32 %v778_v42, %v642_v19  ;;  %v550_v42 = vsel %vm549_vm10, %v4733_v52, %v4734_v14 }
 0x324   :  { %v621_v50 = vsel %vm619_vm9, %v4729_v51, %v4728_v20  ;;  %v623_v0 = vsel %vm619_vm9, %v4728_v20, %v4729_v51  ;;  %v658_v19 = vsel %vm654_vm13, %v4738_v48, %v4739_v25  ;;  %v4741_v20 = vld [vmem:[#allocation103_spill] sm:$0xff]  ;;  %vm1271_vm9 = vcmp.lt.s32.totalorder %v3045_v23, 125 }
 0x325   :  { %v3420_v63 = vadd.f32 %v536_v18, %v3168_v5  ;;  %v892_v5 = vpop.permute.xlu1 %891  ;;  %v3449_v18 = vpop.permute.xlu2 %928  ;;  %v640_v8 = vmul.f32 %v4735_v47, %v623_v0  ;;  %v655_v51 = vsel %vm654_vm13, %v4741_v20, %v4740_v35  ;;  %v4742_v0 = vld [vmem:[#allocation55_spill] sm:$0xff]  ;;  %vm1306_vm10 = vcmp.lt.s32.totalorder %v3045_v23, 115 }
 0x326   :  { %v900_v33 = vsel %vm899_vm12, %v892_v5, %v896_v41  ;;  %v902_v30 = vsel %vm899_vm12, %v896_v41, %v892_v5  ;;  %v4736_v41 = vld [vmem:[#allocation20_spill] sm:$0xff]  ;;  %v568_v5 = vmul.f32 %v4742_v0, %v552_v32  ;;  %v4748_v32 = vld [vmem:[#allocation21_spill] sm:$0xff]  ;;  %v4750_v48 = vld [vmem:[#allocation59_spill] sm:$0xff] }
 0x327   :  { %v918_v28 = vmul.f32 %v4730_v16, %v902_v30  ;;  %v919_v61 = vmul.f32 %v4731_v38, %v900_v33  ;;  %v641_v57 = vmul.f32 %v4736_v41, %v621_v50  ;;  %v657_v50 = vsel %vm654_vm13, %v4740_v35, %v4741_v20  ;;  %v4744_v33 = vld [vmem:[#allocation27_spill] sm:$0xff]  ;;  %v4749_v41 = vld [vmem:[#allocation22_spill] sm:$0xff]  ;;  %v4751_v35 = vld [vmem:[#allocation60_spill] sm:$0xff] }
 0x328   :  { %v780_v30 = vmul.f32 %v4744_v33, %v4743_v4  ;;  %v3499_v38 = vadd.f32 %v570_v46, %v3230_v15  ;;  %v644_v52 = vadd.f32 %v640_v8, %v504_v45  ;;  %v675_v47 = vmul.f32 %v4748_v32, %v658_v19  ;;  %v927_v4 = vpop.permute.xlu0 %926  ;;  %v4753_v46 = vld [vmem:[#allocation115_spill] sm:$0xff]  ;;  %v4754_v45 = vld [vmem:[#allocation117_spill] sm:$0xff]  ;;  %v4757_v32 = vld [vmem:[#allocation122_spill] sm:$0xff]  ;;  %1473 = vrot.lane.b32.xlu0 %v2701_v59, %s2405_s22 }
 0x329   :  { %v3466_v60 = vadd.f32 %v918_v28, %v782_v3  ;;  %v3468_v31 = vadd.f32 %v919_v61, %v783_v62  ;;  %v4745_v3 = vld [vmem:[#allocation133_spill] sm:$0xff]  ;;  %v4746_v62 = vld [vmem:[#allocation28_spill] sm:$0xff]  ;;  %v645_v14 = vadd.f32 %v641_v57, %v505_v17  ;;  %v676_v43 = vmul.f32 %v4749_v41, %v656_v26  ;;  %v4758_v41 = vld [vmem:[#allocation118_spill] sm:$0xff]  ;;  %1444 = vrot.lane.b32.xlu1 %v2723_v21, %s2404_s21 }
 0x32a   :  { %v3436_v10 = vld.sshfl [vmem:[#allocation1] sm:$0xff pattern:$0x73625140]  ;;  %v3438_v27 = vld.sshfl [vmem:[#allocation1 + $0x8] sm:$0xff pattern:$0x73625140]  ;;  %v781_v16 = vmul.f32 %v4746_v62, %v4745_v3  ;;  %v673_v25 = vmul.f32 %v4750_v48, %v657_v50  ;;  %v674_v20 = vmul.f32 %v4751_v35, %v655_v51  ;;  %v690_v17 = vsel %vm689_vm14, %v4754_v45, %v4753_v46  ;;  %1409 = vrot.lane.b32.xlu2 %v2723_v21, %s2403_s20 }
 0x32b   :  { %1594 = vst [vmem:[#allocation1] ss:$4 sm:$0xff] %v3411_v54  ;;  %v3496_v28 = vld [vmem:[#allocation6 + $0x94] sm:$0xf]  ;;  %v692_v8 = vsel %vm689_vm14, %v4753_v46, %v4754_v45  ;;  %v784_v19 = vadd.f32 %v780_v30, %v644_v52  ;;  %v4755_v50 = vld [vmem:[#allocation35_spill] sm:$0xff]  ;;  %v691_v48 = vsel %vm689_vm14, %v4758_v41, %v4757_v32  ;;  %v4761_v45 = vld [vmem:[#allocation138_spill] sm:$0xff] }
 0x32c   :  { %v4747_v61 = vld [vmem:[#allocation56_spill] sm:$0xff]  ;;  %v785_v51 = vadd.f32 %v781_v16, %v645_v14  ;;  %v4759_v35 = vld [vmem:[#allocation139_spill] sm:$0xff]  ;;  %v4763_v52 = vld [vmem:[#allocation29_spill] sm:$0xff]  ;;  %vm1411_vm13 = vcmp.lt.s32.totalorder %v3045_v23, 112 }
 0x32d   :  { %v569_v39 = vmul.f32 %v4747_v61, %v550_v42  ;;  %v898_v0 = vpop.permute.xlu1 %897  ;;  %v3524_v26 = vpop.permute.xlu2 %961  ;;  %v4756_v62 = vld [vmem:[#allocation36_spill] sm:$0xff]  ;;  %v815_v14 = vmul.f32 %v4763_v52, %v3192_v9  ;;  %v678_v9 = vadd.f32 %v674_v20, %v3414_v1  ;;  %v4771_v52 = vld [vmem:[#allocation37_spill] sm:$0xff] }
 0x32e   :  { %v901_v57 = vsel %vm899_vm12, %v894_v36, %v898_v0  ;;  %v903_v42 = vsel %vm899_vm12, %v898_v0, %v894_v36  ;;  %v693_v36 = vsel %vm689_vm14, %v4757_v32, %v4758_v41  ;;  %v4760_v0 = vld [vmem:[#allocation67_spill] sm:$0xff]  ;;  %v4762_v30 = vld [vmem:[#allocation68_spill] sm:$0xff]  ;;  %v572_v32 = vadd.f32 %v568_v5, %v3224_v58  ;;  %v4765_v58 = vld [vmem:[#allocation61_spill] sm:$0xff] }
 0x32f   :  { %v920_v3 = vmul.f32 %v4755_v50, %v903_v42  ;;  %v921_v61 = vmul.f32 %v4756_v62, %v901_v57  ;;  %v813_v46 = vmul.f32 %v4760_v0, %v4759_v35  ;;  %v814_v16 = vmul.f32 %v4762_v30, %v4761_v45  ;;  %v4764_v57 = vld [vmem:[#allocation30_spill] sm:$0xff]  ;;  %v4770_v30 = vld [vmem:[#allocation76_spill] sm:$0xff] }
 0x330   :  { %v816_v42 = vmul.f32 %v4764_v57, %v3188_v49  ;;  %v573_v41 = vadd.f32 %v569_v39, %v3227_v11  ;;  %v679_v35 = vadd.f32 %v675_v47, %v3417_v13  ;;  %v680_v0 = vadd.f32 %v676_v43, %v3420_v63  ;;  %v3561_v49 = vld [vmem:[#allocation6 + $0x98] sm:$0xf]  ;;  %v4767_v63 = vld [vmem:[#allocation23_spill] sm:$0xff]  ;;  %v933_v20 = vpop.permute.xlu0 %932  ;;  %v4772_v57 = vld [vmem:[#allocation38_spill] sm:$0xff]  ;;  %1479 = vrot.lane.b32.xlu0 %v2723_v21, %s2405_s22 }
 0x331   :  { %v3545_v50 = vadd.f32 %v920_v3, %v784_v19  ;;  %v3547_v62 = vadd.f32 %v921_v61, %v785_v51  ;;  %v677_v45 = vadd.f32 %v673_v25, %v3400_v55  ;;  %v708_v11 = vmul.f32 %v4765_v58, %v692_v8  ;;  %v4768_v55 = vld [vmem:[#allocation24_spill] sm:$0xff]  ;;  %1477 = vrot.lane.b32.xlu1 %v2696_v24, %s2405_s22 }
 0x332   :  { %v3508_v33 = vld.sshfl [vmem:[#allocation1] sm:$0xff pattern:$0x73625140]  ;;  %v3510_v15 = vld.sshfl [vmem:[#allocation1 + $0x8] sm:$0xff pattern:$0x73625140]  ;;  %v711_v5 = vmul.f32 %v4768_v55, %v691_v48  ;;  %v818_v39 = vadd.f32 %v814_v16, %v678_v9  ;;  %v819_v47 = vadd.f32 %v815_v14, %v679_v35  ;;  %v820_v43 = vadd.f32 %v816_v42, %v680_v0  ;;  %1442 = vrot.lane.b32.xlu2 %v2696_v24, %s2404_s21 }
 0x333   :  { %4752 = vst [vmem:[#allocation89_spill] sm:$0xff] %v3510_v15  ;;  %v575_v15 = vadd.f32 %v571_v53, %v3237_v12  ;;  %v4766_v12 = vld [vmem:[#allocation62_spill] sm:$0xff]  ;;  %v710_v53 = vmul.f32 %v4767_v63, %v693_v36  ;;  %v817_v1 = vadd.f32 %v813_v46, %v677_v45  ;;  %v936_v61 = vsel %vm934_vm15, %v3449_v18, %v933_v20  ;;  %v4769_v36 = vld [vmem:[#allocation75_spill] sm:$0xff] }
 0x334   :  { %1629 = vst [vmem:[#allocation1] ss:$4 sm:$0xff] %v3496_v28  ;;  %v709_v13 = vmul.f32 %v4766_v12, %v690_v17  ;;  %v938_v48 = vsel %vm934_vm15, %v933_v20, %v3449_v18  ;;  %v956_v42 = vmul.f32 %v4772_v57, %v936_v61  ;;  %v4774_v0 = vld [vmem:[#allocation70_spill] sm:$0xff]  ;;  %v4775_v9 = vld [vmem:[#allocation31_spill] sm:$0xff]  ;;  %v4776_v18 = vld [vmem:[#allocation32_spill] sm:$0xff]  ;;  %vm1376_vm12 = vcmp.lt.s32.totalorder %v3045_v23, 113 }
 0x335   :  { %v931_v25 = vpop.permute.xlu1 %930  ;;  %v968_v3 = vpop.permute.xlu2 %967  ;;  %v955_v14 = vmul.f32 %v4771_v52, %v938_v48  ;;  %v849_v45 = vmul.f32 %v4774_v0, %v3293_v44  ;;  %v850_v58 = vmul.f32 %v4775_v9, %v3307_v22  ;;  %v851_v12 = vmul.f32 %v4776_v18, %v3302_v29  ;;  %v3610_v44 = vld [vmem:[#allocation6 + $0x9c] sm:$0xf]  ;;  %v4780_v52 = vld [vmem:[#allocation78_spill] sm:$0xff] }
 0x336   :  { %v935_v17 = vsel %vm934_vm15, %v927_v4, %v931_v25  ;;  %v937_v8 = vsel %vm934_vm15, %v931_v25, %v927_v4  ;;  %v4773_v4 = vld [vmem:[#allocation69_spill] sm:$0xff]  ;;  %v3602_v20 = vadd.f32 %v956_v42, %v820_v43  ;;  %v715_v61 = vadd.f32 %v711_v5, %v575_v15  ;;  %v4777_v43 = vld [vmem:[#allocation39_spill] sm:$0xff] }
 0x337   :  { %v953_v46 = vmul.f32 %v4769_v36, %v937_v8  ;;  %v954_v16 = vmul.f32 %v4770_v30, %v935_v17  ;;  %v848_v35 = vmul.f32 %v4773_v4, %v3297_v2  ;;  %v3600_v25 = vadd.f32 %v955_v14, %v819_v47  ;;  %v4778_v36 = vld [vmem:[#allocation40_spill] sm:$0xff]  ;;  %v4779_v30 = vld [vmem:[#allocation77_spill] sm:$0xff] }
 0x338   :  { %v712_v17 = vadd.f32 %v708_v11, %v572_v32  ;;  %v713_v8 = vadd.f32 %v709_v13, %v573_v41  ;;  %v714_v2 = vadd.f32 %v710_v53, %v3499_v38  ;;  %v855_v41 = vadd.f32 %v851_v12, %v715_v61  ;;  %v966_v15 = vpop.permute.xlu0 %965  ;;  %1512 = vrot.lane.b32.xlu0 %v2696_v24, %s2406_s23 }
 0x339   :  { %v3596_v63 = vadd.f32 %v953_v46, %v817_v1  ;;  %v3598_v55 = vadd.f32 %v954_v16, %v818_v39  ;;  %v970_v39 = vsel %vm969_vm1, %v3524_v26, %v966_v15  ;;  %v972_v47 = vsel %vm969_vm1, %v966_v15, %v3524_v26  ;;  %v3638_v26 = vld [vmem:[#allocation6 + $0xa0] sm:$0xf]  ;;  %1510 = vrot.lane.b32.xlu1 %v2711_v37, %s2406_s23 }
 0x33a   :  { %v852_v29 = vadd.f32 %v848_v35, %v712_v17  ;;  %v853_v22 = vadd.f32 %v849_v45, %v713_v8  ;;  %v854_v32 = vadd.f32 %v850_v58, %v714_v2  ;;  %v988_v16 = vmul.f32 %v4779_v30, %v972_v47  ;;  %v4783_v17 = vld [vmem:[#allocation79_spill] sm:$0xff]  ;;  %v4784_v2 = vld [vmem:[#allocation80_spill] sm:$0xff]  ;;  %v4788_v47 = vld [vmem:[#allocation42_spill] sm:$0xff]  ;;  %1475 = vrot.lane.b32.xlu2 %v2711_v37, %s2405_s22 }
 0x33b   :  { %v3569_v19 = vld.sshfl [vmem:[#allocation1] sm:$0xff pattern:$0x73625140]  ;;  %v3571_v51 = vld.sshfl [vmem:[#allocation1 + $0x8] sm:$0xff pattern:$0x73625140]  ;;  %v989_v14 = vmul.f32 %v4780_v52, %v970_v39 }
 0x33c   :  { %1664 = vst [vmem:[#allocation1] ss:$4 sm:$0xff] %v3561_v49  ;;  %vm1446_vm14 = vcmp.lt.s32.totalorder %v3045_v23, 111  ;;  %vm1481_vm15 = vcmp.lt.s32.totalorder %v3045_v23, 110 }
 0x33d   :  { %v964_v38 = vpop.permute.xlu1 %963  ;;  %v1001_v1 = vpop.permute.xlu2 %1000  ;;  %v3631_v4 = vadd.f32 %v989_v14, %v853_v22 }
 0x33e   :  { %v971_v53 = vsel %vm969_vm1, %v964_v38, %v968_v3  ;;  %v973_v5 = vsel %vm969_vm1, %v968_v3, %v964_v38  ;;  %v3629_v3 = vadd.f32 %v988_v16, %v852_v29  ;;  %vm1516_vm1 = vcmp.lt.s32.totalorder %v3045_v23, 109 }
 0x33f   :  { %v990_v48 = vmul.f32 %v4777_v43, %v973_v5  ;;  %v991_v46 = vmul.f32 %v4778_v36, %v971_v53 }
 0x340   :  { %v999_v0 = vpop.permute.xlu0 %998  ;;  %1545 = vrot.lane.b32.xlu0 %v2711_v37, %s2407_s24 }
 0x341   :  { %v3625_v57 = vadd.f32 %v990_v48, %v854_v32  ;;  %v3627_v42 = vadd.f32 %v991_v46, %v855_v41  ;;  %v3663_v32 = vld [vmem:[#allocation6 + $0xa4] sm:$0xf]  ;;  %v3689_v46 = vld [vmem:[#allocation6 + $0xa8] sm:$0xf]  ;;  %1543 = vrot.lane.b32.xlu1 %v2701_v59, %s2407_s24 }
 0x342   :  { %1508 = vrot.lane.b32.xlu2 %v2701_v59, %s2406_s23 }
 0x343   :  { %v3614_v11 = vld.sshfl [vmem:[#allocation1] sm:$0xff pattern:$0x73625140]  ;;  %v3616_v13 = vld.sshfl [vmem:[#allocation1 + $0x8] sm:$0xff pattern:$0x73625140] }
 0x344   :  { %1699 = vst [vmem:[#allocation1] ss:$4 sm:$0xff] %v3610_v44 }
 0x345   :  { %v997_v35 = vpop.permute.xlu1 %996  ;;  %v1034_v12 = vpop.permute.xlu2 %1033 }
 0x346   :  { %v1005_v58 = vsel %vm1004_vm2, %v997_v35, %v1001_v1  ;;  %v1007_v18 = vsel %vm1004_vm2, %v1001_v1, %v997_v35  ;;  %v4787_v1 = vld [vmem:[#allocation41_spill] sm:$0xff] }
 0x347   :  { %v1023_v8 = vmul.f32 %v4783_v17, %v1007_v18  ;;  %v1024_v61 = vmul.f32 %v4784_v2, %v1005_v58  ;;  %v4791_v18 = vld [vmem:[#allocation84_spill] sm:$0xff] }
 0x348   :  { %v1032_v38 = vpop.permute.xlu0 %1031  ;;  %1578 = vrot.lane.b32.xlu0 %v2701_v59, %s2408_s25 }
 0x349   :  { %v3654_v29 = vadd.f32 %v1023_v8, %v3389_v7  ;;  %v3657_v22 = vadd.f32 %v1024_v61, %v3391_v56  ;;  %v4792_v8 = vld [vmem:[#allocation85_spill] sm:$0xff]  ;;  %v4793_v61 = vld [vmem:[#allocation43_spill] sm:$0xff]  ;;  %1549 = vrot.lane.b32.xlu1 %v2723_v21, %s2407_s24 }
 0x34a   :  { %1514 = vrot.lane.b32.xlu2 %v2723_v21, %s2406_s23 }
 0x34b   :  { %v3642_v45 = vld.sshfl [vmem:[#allocation1] sm:$0xff pattern:$0x73625140]  ;;  %v3644_v9 = vld.sshfl [vmem:[#allocation1 + $0x8] sm:$0xff pattern:$0x73625140] }
 0x34c   :  { %4781 = vst [vmem:[#allocation86_spill] sm:$0xff] %v3642_v45  ;;  %v4842_v45 = vld [vmem:[#allocation124_spill] sm:$0xff] }
 0x34d   :  { %4782 = vst [vmem:[#allocation63_spill] sm:$0xff] %v3644_v9  ;;  %v1003_v41 = vpop.permute.xlu1 %1002  ;;  %v1067_v5 = vpop.permute.xlu2 %1066 }
 0x34e   :  { %1734 = vst [vmem:[#allocation1] ss:$4 sm:$0xff] %v3638_v26  ;;  %v1006_v56 = vsel %vm1004_vm2, %v999_v0, %v1003_v41  ;;  %v1008_v53 = vsel %vm1004_vm2, %v1003_v41, %v999_v0  ;;  %vm1551_vm2 = vcmp.lt.s32.totalorder %v3045_v23, 99 }
 0x34f   :  { %v1025_v39 = vmul.f32 %v4787_v1, %v1008_v53  ;;  %v1026_v43 = vmul.f32 %v4788_v47, %v1006_v56  ;;  %v4794_v56 = vld [vmem:[#allocation44_spill] sm:$0xff] }
 0x350   :  { %1584 = vrot.lane.b32.xlu0 %v2723_v21, %s2408_s25 }
 0x351   :  { %v3679_v48 = vadd.f32 %v1025_v39, %v3385_v40  ;;  %v3682_v36 = vadd.f32 %v1026_v43, %v3387_v34  ;;  %v1038_v40 = vpop.permute.xlu0 %1037  ;;  %1582 = vrot.lane.b32.xlu1 %v2696_v24, %s2408_s25 }
 0x352   :  { %v1041_v0 = vsel %vm1039_vm3, %v1034_v12, %v1038_v40  ;;  %v1043_v58 = vsel %vm1039_vm3, %v1038_v40, %v1034_v12  ;;  %1547 = vrot.lane.b32.xlu2 %v2696_v24, %s2407_s24 }
 0x353   :  { %v1060_v41 = vmul.f32 %v4793_v61, %v1043_v58  ;;  %v1061_v53 = vmul.f32 %v4794_v56, %v1041_v0  ;;  %v4797_v58 = vld [vmem:[#allocation104_spill] sm:$0xff] }
 0x355   :  { %v3667_v15 = vld.sshfl [vmem:[#allocation1] sm:$0xff pattern:$0x73625140]  ;;  %v3669_v7 = vld.sshfl [vmem:[#allocation1 + $0x8] sm:$0xff pattern:$0x73625140]  ;;  %v1036_v30 = vpop.permute.xlu1 %1035  ;;  %v1073_v35 = vpop.permute.xlu2 %1072  ;;  %v3712_v12 = vadd.f32 %v1061_v53, %v3547_v62 }
 0x356   :  { %4785 = vst [vmem:[#allocation64_spill] sm:$0xff] %v3667_v15  ;;  %v1040_v52 = vsel %vm1039_vm3, %v1032_v38, %v1036_v30  ;;  %v1042_v14 = vsel %vm1039_vm3, %v1036_v30, %v1032_v38  ;;  %v3709_v38 = vadd.f32 %v1060_v41, %v3545_v50  ;;  %v3725_v62 = vld.sshfl [vmem:[#allocation1 + $0x28] sm:$0xff pattern:$0x73625140]  ;;  %vm1586_vm3 = vcmp.lt.s32.totalorder %v3045_v23, 98 }
 0x357   :  { %4786 = vst [vmem:[#allocation129_spill] sm:$0xff] %v3669_v7  ;;  %v1058_v17 = vmul.f32 %v4791_v18, %v1042_v14  ;;  %v1059_v2 = vmul.f32 %v4792_v8, %v1040_v52  ;;  %v4801_v41 = vld [vmem:[#allocation88_spill] sm:$0xff]  ;;  %v4802_v53 = vld [vmem:[#allocation91_spill] sm:$0xff] }
 0x358   :  { %1769 = vst [vmem:[#allocation1] ss:$4 sm:$0xff] %v3663_v32  ;;  %v4820_v7 = vld [vmem:[#allocation51_spill] sm:$0xff]  ;;  %1617 = vrot.lane.b32.xlu0 %v2696_v24, %s2409_s26 }
 0x359   :  { %v3703_v1 = vadd.f32 %v1058_v17, %v3466_v60  ;;  %v3706_v39 = vadd.f32 %v1059_v2, %v3468_v31  ;;  %v3721_v60 = vld.sshfl [vmem:[#allocation1 + $0x20] sm:$0xff pattern:$0x73625140]  ;;  %v1071_v47 = vpop.permute.xlu0 %1070  ;;  %v4799_v17 = vld [vmem:[#allocation45_spill] sm:$0xff]  ;;  %1615 = vrot.lane.b32.xlu1 %v2711_v37, %s2409_s26 }
 0x35a   :  { %v3723_v31 = vld [vmem:[#allocation6 + $0xac] sm:$0xf]  ;;  %v1075_v14 = vsel %vm1074_vm4, %v1067_v5, %v1071_v47  ;;  %v1077_v0 = vsel %vm1074_vm4, %v1071_v47, %v1067_v5  ;;  %1248 = vst [vmem:[#allocation1 + $0x20] ss:$4 sm:$0xff] %v4797_v58  ;;  %v4800_v2 = vld [vmem:[#allocation46_spill] sm:$0xff]  ;;  %v4807_v58 = vld [vmem:[#allocation96_spill] sm:$0xff]  ;;  %1580 = vrot.lane.b32.xlu2 %v2711_v37, %s2408_s25 }
 0x35b   :  { %4795 = vst [vmem:[#allocation26_spill] sm:$0xff] %v3723_v31  ;;  %v1093_v56 = vmul.f32 %v4801_v41, %v1077_v0 }
 0x35d   :  { %v1069_v50 = vpop.permute.xlu1 %1068  ;;  %v1106_v52 = vpop.permute.xlu2 %1105  ;;  %v3744_v5 = vadd.f32 %v1093_v56, %v3596_v63 }
 0x35e   :  { %v1076_v30 = vsel %vm1074_vm4, %v1069_v50, %v1073_v35  ;;  %v1078_v40 = vsel %vm1074_vm4, %v1073_v35, %v1069_v50  ;;  %vm1621_vm4 = vcmp.lt.s32.totalorder %v3045_v23, 97 }
 0x35f   :  { %v3693_v16 = vld.sshfl [vmem:[#allocation1] sm:$0xff pattern:$0x73625140]  ;;  %v3695_v34 = vld.sshfl [vmem:[#allocation1 + $0x8] sm:$0xff pattern:$0x73625140]  ;;  %v1095_v8 = vmul.f32 %v4799_v17, %v1078_v40  ;;  %v1096_v61 = vmul.f32 %v4800_v2, %v1076_v30 }
 0x360   :  { %4789 = vst [vmem:[#allocation25_spill] sm:$0xff] %v3693_v16  ;;  %v4819_v16 = vld [vmem:[#allocation50_spill] sm:$0xff]  ;;  %1650 = vrot.lane.b32.xlu0 %v2711_v37, %s2410_s27 }
 0x361   :  { %4790 = vst [vmem:[#allocation128_spill] sm:$0xff] %v3695_v34  ;;  %v1094_v34 = vmul.f32 %v4802_v53, %v1075_v14  ;;  %v3741_v35 = vadd.f32 %v1096_v61, %v3602_v20  ;;  %v1104_v47 = vpop.permute.xlu0 %1103  ;;  %v4806_v14 = vld [vmem:[#allocation95_spill] sm:$0xff]  ;;  %1648 = vrot.lane.b32.xlu1 %v2701_v59, %s2410_s27 }
 0x362   :  { %1804 = vst [vmem:[#allocation1] ss:$4 sm:$0xff] %v3689_v46  ;;  %v3783_v61 = vld.sshfl [vmem:[#allocation1 + $0x20] sm:$0xff pattern:$0x73625140]  ;;  %1613 = vrot.lane.b32.xlu2 %v2701_v59, %s2409_s26 }
 0x363   :  { %v3747_v50 = vadd.f32 %v1094_v34, %v3598_v55  ;;  %v3785_v41 = vld.sshfl [vmem:[#allocation1 + $0x28] sm:$0xff pattern:$0x73625140] }
 0x365   :  { %v1102_v20 = vpop.permute.xlu1 %1101  ;;  %v1139_v34 = vpop.permute.xlu2 %1138 }
 0x366   :  { %v1110_v63 = vsel %vm1109_vm5, %v1102_v20, %v1106_v52  ;;  %v1112_v55 = vsel %vm1109_vm5, %v1106_v52, %v1102_v20  ;;  %v3779_v52 = vld [vmem:[#allocation6 + $0xb4] sm:$0xf] }
 0x367   :  { %v1128_v0 = vmul.f32 %v4806_v14, %v1112_v55  ;;  %v1129_v17 = vmul.f32 %v4807_v58, %v1110_v63  ;;  %4808 = vst [vmem:[#allocation105_spill] sm:$0xff] %v3779_v52 }
 0x368   :  { %1683 = vrot.lane.b32.xlu0 %v2701_v59, %s2411_s28 }
 0x369   :  { %v3727_v43 = vld.sshfl [vmem:[#allocation1] sm:$0xff pattern:$0x73625140]  ;;  %v3730_v18 = vld.sshfl [vmem:[#allocation1 + $0x8] sm:$0xff pattern:$0x73625140]  ;;  %v3773_v2 = vadd.f32 %v1129_v17, %v3631_v4  ;;  %v1137_v56 = vpop.permute.xlu0 %1136  ;;  %1654 = vrot.lane.b32.xlu1 %v2723_v21, %s2410_s27 }
 0x36a   :  { %4796 = vst [vmem:[#allocation13_spill] sm:$0xff] %v3727_v43  ;;  %v3738_v43 = vadd.f32 %v1095_v8, %v3600_v25  ;;  %v3756_v25 = vld [vmem:[#allocation6 + $0xb0] sm:$0xf]  ;;  %v3770_v8 = vadd.f32 %v1128_v0, %v3629_v3  ;;  %v4809_v4 = vld [vmem:[#allocation110_spill] sm:$0xff]  ;;  %v4813_v17 = vld [vmem:[#allocation48_spill] sm:$0xff]  ;;  %1619 = vrot.lane.b32.xlu2 %v2723_v21, %s2409_s26 }
 0x36b   :  { %4798 = vst [vmem:[#allocation90_spill] sm:$0xff] %v3730_v18  ;;  %v4812_v0 = vld [vmem:[#allocation47_spill] sm:$0xff]  ;;  %v4818_v18 = vld [vmem:[#allocation98_spill] sm:$0xff] }
 0x36c   :  { %1839 = vst [vmem:[#allocation1] ss:$4 sm:$0xff] %v3723_v31 }
 0x36d   :  { %4803 = vst [vmem:[#allocation81_spill] sm:$0xff] %v3756_v25  ;;  %v1108_v3 = vpop.permute.xlu1 %1107  ;;  %v1194_v63 = vpop.permute.xlu2 %1193 }
 0x36e   :  { %1283 = vst [vmem:[#allocation1 + $0x20] ss:$4 sm:$0xff] %v4809_v4  ;;  %v1111_v53 = vsel %vm1109_vm5, %v1104_v47, %v1108_v3  ;;  %v1113_v20 = vsel %vm1109_vm5, %v1108_v3, %v1104_v47  ;;  %vm1656_vm5 = vcmp.lt.s32.totalorder %v3045_v23, 96 }
 0x36f   :  { %v1130_v58 = vmul.f32 %v4812_v0, %v1113_v20 }
 0x370   :  { %1689 = vrot.lane.b32.xlu0 %v2723_v21, %s2411_s28 }
 0x371   :  { %v1143_v3 = vpop.permute.xlu0 %1142  ;;  %1687 = vrot.lane.b32.xlu1 %v2696_v24, %s2411_s28 }
 0x372   :  { %v1148_v0 = vsel %vm1144_vm6, %v1143_v3, %v1139_v34  ;;  %1652 = vrot.lane.b32.xlu2 %v2696_v24, %s2410_s27 }
 0x373   :  { %v3762_v30 = vld.sshfl [vmem:[#allocation1] sm:$0xff pattern:$0x73625140]  ;;  %v3764_v40 = vld.sshfl [vmem:[#allocation1 + $0x8] sm:$0xff pattern:$0x73625140] }
 0x374   :  { %4804 = vst [vmem:[#allocation53_spill] sm:$0xff] %v3762_v30  ;;  %v3800_v30 = vadd.f32 %v1130_v58, %v3625_v57 }
 0x375   :  { %4805 = vst [vmem:[#allocation54_spill] sm:$0xff] %v3764_v40  ;;  %v1131_v40 = vmul.f32 %v4813_v17, %v1111_v53  ;;  %v1141_v47 = vpop.permute.xlu1 %1140  ;;  %v3812_v53 = vld [vmem:[#allocation6 + $0xb8] sm:$0xf]  ;;  %v3822_v31 = vld.sshfl [vmem:[#allocation1 + $0x20] sm:$0xff pattern:$0x73625140] }
 0x376   :  { %1874 = vst [vmem:[#allocation1] ss:$4 sm:$0xff] %v3756_v25  ;;  %v1145_v57 = vsel %vm1144_vm6, %v1137_v56, %v1141_v47  ;;  %v1147_v20 = vsel %vm1144_vm6, %v1141_v47, %v1137_v56  ;;  %v1165_v25 = vmul.f32 %v4819_v16, %v1148_v0  ;;  %v3824_v9 = vld.sshfl [vmem:[#allocation1 + $0x28] sm:$0xff pattern:$0x73625140] }
 0x377   :  { %v3803_v4 = vadd.f32 %v1131_v40, %v3627_v42  ;;  %4814 = vst [vmem:[#allocation34_spill] sm:$0xff] %v3812_v53  ;;  %v1200_v42 = vpop.permute.xlu2 %1199  ;;  %v1146_v40 = vsel %vm1144_vm6, %v1139_v34, %v1143_v3  ;;  %v4821_v56 = vld [vmem:[#allocation116_spill] sm:$0xff]  ;;  %v4823_v3 = vld [vmem:[#allocation107_spill] sm:$0xff]  ;;  %vm1691_vm6 = vcmp.lt.s32.totalorder %v3045_v23, 95 }
 0x378   :  { %v1166_v15 = vmul.f32 %v4820_v7, %v1146_v40  ;;  %1318 = vst [vmem:[#allocation1 + $0x20] ss:$4 sm:$0xff] %v4821_v56  ;;  %1722 = vrot.lane.b32.xlu0 %v2696_v24, %s2412_s29 }
 0x379   :  { %1720 = vrot.lane.b32.xlu1 %v2711_v37, %s2412_s29 }
 0x37a   :  { %1685 = vrot.lane.b32.xlu2 %v2711_v37, %s2411_s28 }
 0x37d   :  { %v3792_v55 = vld.sshfl [vmem:[#allocation1] sm:$0xff pattern:$0x73625140]  ;;  %v3794_v14 = vld.sshfl [vmem:[#allocation1 + $0x8] sm:$0xff pattern:$0x73625140] }
 0x37e   :  { %4810 = vst [vmem:[#allocation100_spill] sm:$0xff] %v3792_v55 }
 0x37f   :  { %4811 = vst [vmem:[#allocation33_spill] sm:$0xff] %v3794_v14  ;;  %v4817_v14 = vld [vmem:[#allocation97_spill] sm:$0xff]  ;;  %v3853_v0 = vld.sshfl [vmem:[#allocation1 + $0x20] sm:$0xff pattern:$0x73625140] }
 0x380   :  { %1909 = vst [vmem:[#allocation1] ss:$4 sm:$0xff] %v3779_v52  ;;  %v1163_v55 = vmul.f32 %v4817_v14, %v1147_v20  ;;  %v1164_v52 = vmul.f32 %v4818_v18, %v1145_v57  ;;  %v3834_v14 = vadd.f32 %v1165_v25, %v3679_v48  ;;  %v3837_v18 = vadd.f32 %v1166_v15, %v3682_v36  ;;  %v1233_v15 = vpop.permute.xlu2 %1232  ;;  %v3847_v25 = vld [vmem:[#allocation6 + $0xbc] sm:$0xf]  ;;  %v4824_v20 = vld [vmem:[#allocation108_spill] sm:$0xff] }
 0x381   :  { %4822 = vst [vmem:[#allocation14_spill] sm:$0xff] %v3847_v25  ;;  %v3855_v56 = vld.sshfl [vmem:[#allocation1 + $0x28] sm:$0xff pattern:$0x73625140]  ;;  %1753 = vrot.lane.b32.xlu1 %v2701_v59, %s2413_s30  ;;  %1755 = vrot.lane.b32.xlu0 %v2711_v37, %s2413_s30 }
 0x382   :  { %v3828_v34 = vadd.f32 %v1163_v55, %v3654_v29  ;;  %v3831_v47 = vadd.f32 %v1164_v52, %v3657_v22  ;;  %v1196_v29 = vpop.permute.xlu1 %1195  ;;  %v1198_v22 = vpop.permute.xlu0 %1197  ;;  %1718 = vrot.lane.b32.xlu2 %v2701_v59, %s2412_s29 }
 0x383   :  { %v1203_v7 = vsel %vm1201_vm7, %v1196_v29, %v1200_v42  ;;  %v1205_v48 = vsel %vm1201_vm7, %v1200_v42, %v1196_v29  ;;  %v1202_v36 = vsel %vm1201_vm7, %v1194_v63, %v1198_v22  ;;  %v1204_v16 = vsel %vm1201_vm7, %v1198_v22, %v1194_v63 }
 0x384   :  { %v1222_v52 = vmul.f32 %v3721_v60, %v1203_v7  ;;  %v1223_v55 = vmul.f32 %v3725_v62, %v1205_v48  ;;  %v1220_v57 = vmul.f32 %v4823_v3, %v1202_v36  ;;  %v1221_v40 = vmul.f32 %v4824_v20, %v1204_v16  ;;  %v4828_v7 = vld [vmem:[#allocation113_spill] sm:$0xff]  ;;  %v4829_v36 = vld [vmem:[#allocation114_spill] sm:$0xff] }
 0x385   :  { %vm1726_vm7 = vcmp.lt.s32.totalorder %v3045_v23, 94 }
 0x386   :  { %v3861_v63 = vadd.f32 %v1222_v52, %v3738_v43  ;;  %v3864_v29 = vadd.f32 %v1223_v55, %v3741_v35  ;;  %v3867_v60 = vadd.f32 %v1220_v57, %v3744_v5  ;;  %v3870_v62 = vadd.f32 %v1221_v40, %v3747_v50  ;;  %v3888_v52 = vld [vmem:[#allocation6 + $0xc0] sm:$0xf] }
 0x387   :  { %v3814_v58 = vld.sshfl [vmem:[#allocation1] sm:$0xff pattern:$0x73625140]  ;;  %v3816_v17 = vld.sshfl [vmem:[#allocation1 + $0x8] sm:$0xff pattern:$0x73625140] }
 0x388   :  { %4815 = vst [vmem:[#allocation71_spill] sm:$0xff] %v3814_v58 }
 0x389   :  { %4816 = vst [vmem:[#allocation72_spill] sm:$0xff] %v3816_v17  ;;  %v4825_v17 = vld [vmem:[#allocation121_spill] sm:$0xff]  ;;  %1759 = vrot.lane.b32.xlu1 %v2723_v21, %s2413_s30  ;;  %1788 = vrot.lane.b32.xlu0 %v2701_v59, %s2414_s8 }
 0x38a   :  { %1944 = vst [vmem:[#allocation1] ss:$4 sm:$0xff] %v3812_v53  ;;  %v1229_v43 = vpop.permute.xlu1 %1228  ;;  %v1231_v35 = vpop.permute.xlu0 %1230  ;;  %1724 = vrot.lane.b32.xlu2 %v2723_v21, %s2412_s29 }
 0x38b   :  { %1353 = vst [vmem:[#allocation1 + $0x20] ss:$4 sm:$0xff] %v4825_v17  ;;  %v1237_v5 = vsel %vm1236_vm8, %v1229_v43, %v1233_v15  ;;  %v1239_v50 = vsel %vm1236_vm8, %v1233_v15, %v1229_v43  ;;  %v1266_v17 = vpop.permute.xlu2 %1265  ;;  %v4833_v43 = vld [vmem:[#allocation125_spill] sm:$0xff] }
 0x38c   :  { %v1255_v48 = vmul.f32 %v4828_v7, %v1237_v5  ;;  %v1256_v16 = vmul.f32 %v4829_v36, %v1239_v50  ;;  %4830 = vst [vmem:[#allocation58_spill] sm:$0xff] %v3888_v52 }
 0x38e   :  { %v3891_v55 = vadd.f32 %v1255_v48, %v3770_v8  ;;  %v3894_v3 = vadd.f32 %v1256_v16, %v3773_v2 }
 0x391   :  { %v3858_v42 = vld.sshfl [vmem:[#allocation1] sm:$0xff pattern:$0x73625140]  ;;  %v3872_v22 = vld.sshfl [vmem:[#allocation1 + $0x8] sm:$0xff pattern:$0x73625140]  ;;  %1792 = vrot.lane.b32.xlu1 %v2696_v24, %s2414_s8  ;;  %1794 = vrot.lane.b32.xlu0 %v2723_v21, %s2414_s8 }
 0x392   :  { %4826 = vst [vmem:[#allocation15_spill] sm:$0xff] %v3858_v42  ;;  %v3907_v8 = vld.sshfl [vmem:[#allocation1 + $0x20] sm:$0xff pattern:$0x73625140]  ;;  %v1235_v15 = vpop.permute.xlu1 %1234  ;;  %v1264_v40 = vpop.permute.xlu0 %1263  ;;  %1757 = vrot.lane.b32.xlu2 %v2696_v24, %s2413_s30 }
 0x393   :  { %4827 = vst [vmem:[#allocation57_spill] sm:$0xff] %v3872_v22  ;;  %v3909_v2 = vld.sshfl [vmem:[#allocation1 + $0x28] sm:$0xff pattern:$0x73625140]  ;;  %v1238_v5 = vsel %vm1236_vm8, %v1231_v35, %v1235_v15  ;;  %v1240_v50 = vsel %vm1236_vm8, %v1235_v15, %v1231_v35  ;;  %v1299_v7 = vpop.permute.xlu2 %1298  ;;  %vm1761_vm8 = vcmp.lt.s32.totalorder %v3045_v23, 93 }
 0x394   :  { %1979 = vst [vmem:[#allocation1] ss:$4 sm:$0xff] %v3847_v25  ;;  %v1257_v48 = vmul.f32 %v3783_v61, %v1238_v5  ;;  %v1258_v36 = vmul.f32 %v3785_v41, %v1240_v50  ;;  %v4834_v5 = vld [vmem:[#allocation119_spill] sm:$0xff] }
 0x395   :  { %1388 = vst [vmem:[#allocation1 + $0x20] ss:$4 sm:$0xff] %v4833_v43 }
 0x396   :  { %v3919_v16 = vadd.f32 %v1257_v48, %v3800_v30  ;;  %v3922_v58 = vadd.f32 %v1258_v36, %v3803_v4  ;;  %v4835_v48 = vld [vmem:[#allocation120_spill] sm:$0xff] }
 0x399   :  { %1825 = vrot.lane.b32.xlu1 %v2711_v37, %s2415_s11  ;;  %1827 = vrot.lane.b32.xlu0 %v2696_v24, %s2415_s11 }
 0x39a   :  { %v1268_v61 = vpop.permute.xlu1 %1267  ;;  %v1270_v41 = vpop.permute.xlu0 %1269  ;;  %1790 = vrot.lane.b32.xlu2 %v2711_v37, %s2414_s8 }
 0x39b   :  { %v3896_v57 = vld.sshfl [vmem:[#allocation1] sm:$0xff pattern:$0x73625140]  ;;  %v3898_v20 = vld.sshfl [vmem:[#allocation1 + $0x8] sm:$0xff pattern:$0x73625140]  ;;  %v1272_v35 = vsel %vm1271_vm9, %v1264_v40, %v1268_v61  ;;  %v1274_v30 = vsel %vm1271_vm9, %v1268_v61, %v1264_v40  ;;  %v1305_v15 = vpop.permute.xlu2 %1304  ;;  %v1273_v43 = vsel %vm1271_vm9, %v1266_v17, %v1270_v41  ;;  %v1275_v4 = vsel %vm1271_vm9, %v1270_v41, %v1266_v17 }
 0x39c   :  { %4831 = vst [vmem:[#allocation65_spill] sm:$0xff] %v3896_v57  ;;  %v1290_v50 = vmul.f32 %v4834_v5, %v1272_v35  ;;  %v1291_v36 = vmul.f32 %v4835_v48, %v1274_v30  ;;  %v1293_v57 = vmul.f32 %v3824_v9, %v1275_v4  ;;  %v3935_v22 = vld.sshfl [vmem:[#allocation1 + $0x20] sm:$0xff pattern:$0x73625140]  ;;  %vm1796_vm9 = vcmp.lt.s32.totalorder %v3045_v23, 83 }
 0x39d   :  { %4832 = vst [vmem:[#allocation66_spill] sm:$0xff] %v3898_v20  ;;  %v1292_v20 = vmul.f32 %v3822_v31, %v1273_v43  ;;  %v3937_v42 = vld.sshfl [vmem:[#allocation1 + $0x28] sm:$0xff pattern:$0x73625140]  ;;  %v4837_v9 = vld [vmem:[#allocation82_spill] sm:$0xff] }
 0x39e   :  { %2014 = vst [vmem:[#allocation1] ss:$4 sm:$0xff] %v3888_v52  ;;  %v4836_v52 = vld [vmem:[#allocation130_spill] sm:$0xff]  ;;  %v3941_v25 = vadd.f32 %v1290_v50, %v3828_v34  ;;  %v3944_v40 = vadd.f32 %v1291_v36, %v3831_v47  ;;  %v3950_v61 = vadd.f32 %v1293_v57, %v3837_v18  ;;  %v1187_v31 = vmul.f32 %v4837_v9, %v2711_v37  ;;  %v4838_v34 = vld [vmem:[#allocation83_spill] sm:$0xff] }
 0x39f   :  { %1423 = vst [vmem:[#allocation1 + $0x20] ss:$4 sm:$0xff] %v4836_v52  ;;  %v3947_v17 = vadd.f32 %v1292_v20, %v3834_v14  ;;  %v1188_v47 = vmul.f32 %v4838_v34, %v2723_v21  ;;  %v4839_v14 = vld [vmem:[#allocation101_spill] sm:$0xff]  ;;  %v4840_v18 = vld [vmem:[#allocation102_spill] sm:$0xff] }
 0x3a0   :  { %v1185_v52 = vmul.f32 %v4839_v14, %v2701_v59  ;;  %v1186_v57 = vmul.f32 %v4840_v18, %v2696_v24  ;;  %v1191_v41 = vadd.f32 %v1187_v31, %v3709_v38  ;;  %v4841_v18 = vld [vmem:[#allocation123_spill] sm:$0xff] }
 0x3a1   :  { %v1192_v35 = vadd.f32 %v1188_v47, %v3712_v12  ;;  %1858 = vrot.lane.b32.xlu1 %v2701_v59, %s2416_s12  ;;  %1860 = vrot.lane.b32.xlu0 %v2711_v37, %s2416_s12 }
 0x3a2   :  { %v1301_v20 = vpop.permute.xlu1 %1300  ;;  %v1189_v30 = vadd.f32 %v1185_v52, %v3703_v1  ;;  %v1190_v43 = vadd.f32 %v1186_v57, %v3706_v39  ;;  %v1303_v4 = vpop.permute.xlu0 %1302  ;;  %v4843_v1 = vld [vmem:[#allocation135_spill] sm:$0xff]  ;;  %v4844_v57 = vld [vmem:[#allocation126_spill] sm:$0xff]  ;;  %1823 = vrot.lane.b32.xlu2 %v2701_v59, %s2415_s11 }
 0x3a3   :  { %v1308_v5 = vsel %vm1306_vm10, %v1301_v20, %v1305_v15  ;;  %v1310_v50 = vsel %vm1306_vm10, %v1305_v15, %v1301_v20  ;;  %v1338_v48 = vpop.permute.xlu2 %1337  ;;  %v1307_v36 = vsel %vm1306_vm10, %v1299_v7, %v1303_v4  ;;  %v1309_v9 = vsel %vm1306_vm10, %v1303_v4, %v1299_v7 }
 0x3a4   :  { %v1327_v34 = vmul.f32 %v3853_v0, %v1308_v5  ;;  %v1328_v14 = vmul.f32 %v3855_v56, %v1310_v50  ;;  %v1325_v53 = vmul.f32 %v4841_v18, %v1307_v36  ;;  %v1326_v38 = vmul.f32 %v4842_v45, %v1309_v9 }
 0x3a5   :  { %vm1831_vm10 = vcmp.lt.s32.totalorder %v3045_v23, 82 }
 0x3a6   :  { %v3975_v31 = vld.sshfl [vmem:[#allocation1 + $0x20] sm:$0xff pattern:$0x73625140]  ;;  %v3977_v12 = vld.sshfl [vmem:[#allocation1 + $0x28] sm:$0xff pattern:$0x73625140]  ;;  %v3980_v39 = vadd.f32 %v1327_v34, %v1191_v41  ;;  %v3982_v15 = vadd.f32 %v1328_v14, %v1192_v35  ;;  %v3984_v47 = vadd.f32 %v1325_v53, %v1189_v30  ;;  %v3986_v7 = vadd.f32 %v1326_v38, %v1190_v43 }
 0x3a7   :  { %1458 = vst [vmem:[#allocation1 + $0x20] ss:$4 sm:$0xff] %v4843_v1  ;;  %v4845_v41 = vld [vmem:[#allocation127_spill] sm:$0xff] }
 0x3a9   :  { %1864 = vrot.lane.b32.xlu1 %v2723_v21, %s2416_s12  ;;  %1893 = vrot.lane.b32.xlu0 %v2701_v59, %s2417_s13 }
 0x3aa   :  { %v1334_v45 = vpop.permute.xlu1 %1333  ;;  %v1336_v0 = vpop.permute.xlu0 %1335  ;;  %1829 = vrot.lane.b32.xlu2 %v2723_v21, %s2415_s11 }
 0x3ab   :  { %v1342_v56 = vsel %vm1341_vm11, %v1334_v45, %v1338_v48  ;;  %v1344_v53 = vsel %vm1341_vm11, %v1338_v48, %v1334_v45  ;;  %v1371_v52 = vpop.permute.xlu2 %1370  ;;  %v4846_v48 = vld [vmem:[#allocation140_spill] sm:$0xff] }
 0x3ac   :  { %v1360_v20 = vmul.f32 %v4844_v57, %v1342_v56  ;;  %v1361_v35 = vmul.f32 %v4845_v41, %v1344_v53  ;;  %v4847_v56 = vld [vmem:[#allocation131_spill] sm:$0xff]  ;;  %v4848_v57 = vld [vmem:[#allocation132_spill] sm:$0xff] }
 0x3ae   :  { %v4002_v30 = vadd.f32 %v1360_v20, %v3867_v60  ;;  %v4005_v43 = vadd.f32 %v1361_v35, %v3870_v62  ;;  %v4013_v4 = vld.sshfl [vmem:[#allocation1 + $0x20] sm:$0xff pattern:$0x73625140]  ;;  %v4015_v5 = vld.sshfl [vmem:[#allocation1 + $0x28] sm:$0xff pattern:$0x73625140] }
 0x3af   :  { %1493 = vst [vmem:[#allocation1 + $0x20] ss:$4 sm:$0xff] %v4846_v48 }
 0x3b1   :  { %1897 = vrot.lane.b32.xlu1 %v2696_v24, %s2417_s13  ;;  %1899 = vrot.lane.b32.xlu0 %v2723_v21, %s2417_s13 }
 0x3b2   :  { %v1340_v50 = vpop.permute.xlu1 %1339  ;;  %v1369_v60 = vpop.permute.xlu0 %1368  ;;  %1862 = vrot.lane.b32.xlu2 %v2696_v24, %s2416_s12 }
 0x3b3   :  { %v1343_v62 = vsel %vm1341_vm11, %v1336_v0, %v1340_v50  ;;  %v1345_v36 = vsel %vm1341_vm11, %v1340_v50, %v1336_v0  ;;  %v1404_v9 = vpop.permute.xlu2 %1403  ;;  %vm1866_vm11 = vcmp.lt.s32.totalorder %v3045_v23, 81 }
 0x3b4   :  { %v1362_v34 = vmul.f32 %v3907_v8, %v1343_v62  ;;  %v1363_v14 = vmul.f32 %v3909_v2, %v1345_v36  ;;  %v4849_v62 = vld [vmem:[#allocation143_spill] sm:$0xff] }
 0x3b6   :  { %v4025_v18 = vadd.f32 %v1362_v34, %v3861_v63  ;;  %v4028_v38 = vadd.f32 %v1363_v14, %v3864_v29  ;;  %v4041_v50 = vld.sshfl [vmem:[#allocation1 + $0x20] sm:$0xff pattern:$0x73625140]  ;;  %v4043_v48 = vld.sshfl [vmem:[#allocation1 + $0x28] sm:$0xff pattern:$0x73625140] }
 0x3b7   :  { %1528 = vst [vmem:[#allocation1 + $0x20] ss:$4 sm:$0xff] %v4849_v62 }
 0x3b9   :  { %1930 = vrot.lane.b32.xlu1 %v2711_v37, %s2418_s0  ;;  %1932 = vrot.lane.b32.xlu0 %v2696_v24, %s2418_s0 }
 0x3ba   :  { %v1373_v8 = vpop.permute.xlu1 %1372  ;;  %v1375_v2 = vpop.permute.xlu0 %1374  ;;  %1895 = vrot.lane.b32.xlu2 %v2711_v37, %s2417_s13 }
 0x3bb   :  { %v1377_v1 = vsel %vm1376_vm12, %v1369_v60, %v1373_v8  ;;  %v1379_v63 = vsel %vm1376_vm12, %v1373_v8, %v1369_v60  ;;  %v1410_v45 = vpop.permute.xlu2 %1409  ;;  %v1378_v0 = vsel %vm1376_vm12, %v1371_v52, %v1375_v2  ;;  %v1380_v29 = vsel %vm1376_vm12, %v1375_v2, %v1371_v52 }
 0x3bc   :  { %v1395_v53 = vmul.f32 %v4847_v56, %v1377_v1  ;;  %v1396_v20 = vmul.f32 %v4848_v57, %v1379_v63  ;;  %v1397_v41 = vmul.f32 %v3935_v22, %v1378_v0  ;;  %v1398_v35 = vmul.f32 %v3937_v42, %v1380_v29  ;;  %v4850_v1 = vld [vmem:[#allocation136_spill] sm:$0xff]  ;;  %v4851_v0 = vld [vmem:[#allocation137_spill] sm:$0xff] }
 0x3bd   :  { %vm1901_vm12 = vcmp.lt.s32.totalorder %v3045_v23, 80 }
 0x3be   :  { %v4047_v36 = vadd.f32 %v1395_v53, %v3891_v55  ;;  %v4050_v60 = vadd.f32 %v1396_v20, %v3894_v3  ;;  %v4053_v52 = vadd.f32 %v1397_v41, %v3919_v16  ;;  %v4056_v34 = vadd.f32 %v1398_v35, %v3922_v58  ;;  %v4069_v56 = vld.sshfl [vmem:[#allocation1 + $0x20] sm:$0xff pattern:$0x73625140]  ;;  %v4071_v53 = vld.sshfl [vmem:[#allocation1 + $0x28] sm:$0xff pattern:$0x73625140] }
 0x3bf   :  { %1563 = vst [vmem:[#allocation1 + $0x20] ss:$4 sm:$0xff] %v3348_v6  ;;  %v4853_v41 = vld [vmem:[#allocation142_spill] sm:$0xff] }
 0x3c1   :  { %1963 = vrot.lane.b32.xlu1 %v2701_v59, %s2419_s5  ;;  %1965 = vrot.lane.b32.xlu0 %v2711_v37, %s2419_s5 }
 0x3c2   :  { %v1406_v42 = vpop.permute.xlu1 %1405  ;;  %v1408_v22 = vpop.permute.xlu0 %1407  ;;  %1928 = vrot.lane.b32.xlu2 %v2701_v59, %s2418_s0 }
 0x3c3   :  { %v1413_v55 = vsel %vm1411_vm13, %v1406_v42, %v1410_v45  ;;  %v1415_v3 = vsel %vm1411_vm13, %v1410_v45, %v1406_v42  ;;  %v1443_v16 = vpop.permute.xlu2 %1442  ;;  %v1412_v14 = vsel %vm1411_vm13, %v1404_v9, %v1408_v22  ;;  %v1414_v58 = vsel %vm1411_vm13, %v1408_v22, %v1404_v9  ;;  %v4852_v9 = vld [vmem:[#allocation141_spill] sm:$0xff] }
 0x3c4   :  { %v1432_v8 = vmul.f32 %v3975_v31, %v1413_v55  ;;  %v1433_v2 = vmul.f32 %v3977_v12, %v1415_v3  ;;  %v1430_v63 = vmul.f32 %v4850_v1, %v1412_v14  ;;  %v1431_v29 = vmul.f32 %v4851_v0, %v1414_v58 }
 0x3c5   :  { %vm1936_vm13 = vcmp.lt.s32.totalorder %v3045_v23, 79 }
 0x3c6   :  { %v4075_v57 = vadd.f32 %v1432_v8, %v3947_v17  ;;  %v4078_v45 = vadd.f32 %v1433_v2, %v3950_v61  ;;  %v4081_v31 = vadd.f32 %v1430_v63, %v3941_v25  ;;  %v4084_v12 = vadd.f32 %v1431_v29, %v3944_v40  ;;  %v4111_v22 = vld.sshfl [vmem:[#allocation1 + $0x20] sm:$0xff pattern:$0x73625140]  ;;  %v4113_v55 = vld.sshfl [vmem:[#allocation1 + $0x28] sm:$0xff pattern:$0x73625140] }
 0x3c7   :  { %1598 = vst [vmem:[#allocation1 + $0x20] ss:$4 sm:$0xff] %v3411_v54  ;;  %v4854_v29 = vld [vmem:[#allocation144_spill] sm:$0xff] }
 0x3c9   :  { %1969 = vrot.lane.b32.xlu1 %v2723_v21, %s2419_s5  ;;  %1998 = vrot.lane.b32.xlu0 %v2701_v59, %s2420_s14 }
 0x3ca   :  { %v1439_v6 = vpop.permute.xlu1 %1438  ;;  %v1441_v17 = vpop.permute.xlu0 %1440  ;;  %1934 = vrot.lane.b32.xlu2 %v2723_v21, %s2418_s0 }
 0x3cb   :  { %v1447_v25 = vsel %vm1446_vm14, %v1439_v6, %v1443_v16  ;;  %v1449_v40 = vsel %vm1446_vm14, %v1443_v16, %v1439_v6  ;;  %v1476_v61 = vpop.permute.xlu2 %1475 }
 0x3cc   :  { %v1465_v20 = vmul.f32 %v4852_v9, %v1447_v25  ;;  %v1466_v35 = vmul.f32 %v4853_v41, %v1449_v40 }
 0x3ce   :  { %v4100_v62 = vadd.f32 %v1465_v20, %v3984_v47  ;;  %v4103_v42 = vadd.f32 %v1466_v35, %v3986_v7  ;;  %v4139_v20 = vld.sshfl [vmem:[#allocation1 + $0x20] sm:$0xff pattern:$0x73625140]  ;;  %v4141_v41 = vld.sshfl [vmem:[#allocation1 + $0x28] sm:$0xff pattern:$0x73625140] }
 0x3cf   :  { %1633 = vst [vmem:[#allocation1 + $0x20] ss:$4 sm:$0xff] %v3496_v28 }
 0x3d1   :  { %2002 = vrot.lane.b32.xlu1 %v2696_v24, %s2420_s14  ;;  %2004 = vrot.lane.b32.xlu0 %v2723_v21, %s2420_s14 }
 0x3d2   :  { %v1445_v3 = vpop.permute.xlu1 %1444  ;;  %v1474_v47 = vpop.permute.xlu0 %1473  ;;  %1967 = vrot.lane.b32.xlu2 %v2696_v24, %s2419_s5 }
 0x3d3   :  { %v1448_v7 = vsel %vm1446_vm14, %v1441_v17, %v1445_v3  ;;  %v1450_v16 = vsel %vm1446_vm14, %v1445_v3, %v1441_v17  ;;  %v1509_v14 = vpop.permute.xlu2 %1508  ;;  %v4855_v17 = vld [vmem:[#allocation145_spill] sm:$0xff]  ;;  %vm1971_vm14 = vcmp.lt.s32.totalorder %v3045_v23, 78 }
 0x3d4   :  { %v1467_v58 = vmul.f32 %v4013_v4, %v1448_v7  ;;  %v1468_v8 = vmul.f32 %v4015_v5, %v1450_v16 }
 0x3d6   :  { %v4123_v2 = vadd.f32 %v1467_v58, %v3980_v39  ;;  %v4126_v1 = vadd.f32 %v1468_v8, %v3982_v15  ;;  %v4856_v58 = vld [vmem:[#allocation18_spill] sm:$0xff] }
 0x3da   :  { %v1478_v54 = vpop.permute.xlu1 %1477  ;;  %v1480_v4 = vpop.permute.xlu0 %1479  ;;  %2000 = vrot.lane.b32.xlu2 %v2711_v37, %s2420_s14 }
 0x3db   :  { %v1482_v5 = vsel %vm1481_vm15, %v1474_v47, %v1478_v54  ;;  %v1484_v39 = vsel %vm1481_vm15, %v1478_v54, %v1474_v47  ;;  %v1515_v63 = vpop.permute.xlu2 %1514  ;;  %v1483_v0 = vsel %vm1481_vm15, %v1476_v61, %v1480_v4  ;;  %v1485_v15 = vsel %vm1481_vm15, %v1480_v4, %v1476_v61  ;;  %v4857_v54 = vld [vmem:[#allocation12_spill] sm:$0xff] }
 0x3dc   :  { %v1500_v6 = vmul.f32 %v4854_v29, %v1482_v5  ;;  %v1501_v25 = vmul.f32 %v4855_v17, %v1484_v39  ;;  %v1502_v40 = vmul.f32 %v4041_v50, %v1483_v0  ;;  %v1503_v9 = vmul.f32 %v4043_v48, %v1485_v15  ;;  %v4167_v5 = vld.sshfl [vmem:[#allocation1 + $0x20] sm:$0xff pattern:$0x73625140]  ;;  %v4169_v39 = vld.sshfl [vmem:[#allocation1 + $0x28] sm:$0xff pattern:$0x73625140] }
 0x3dd   :  { %1668 = vst [vmem:[#allocation1 + $0x20] ss:$4 sm:$0xff] %v3561_v49  ;;  %vm2006_vm15 = vcmp.lt.s32.totalorder %v3045_v23, 77 }
 0x3de   :  { %v4145_v35 = vadd.f32 %v1500_v6, %v4002_v30  ;;  %v4148_v3 = vadd.f32 %v1501_v25, %v4005_v43  ;;  %v4151_v61 = vadd.f32 %v1502_v40, %v4025_v18  ;;  %v4154_v47 = vadd.f32 %v1503_v9, %v4028_v38 }
 0x3e2   :  { %v1511_v28 = vpop.permute.xlu1 %1510  ;;  %v1513_v30 = vpop.permute.xlu0 %1512 }
 0x3e3   :  { %v1518_v43 = vsel %vm1516_vm1, %v1511_v28, %v1515_v63  ;;  %v1520_v18 = vsel %vm1516_vm1, %v1515_v63, %v1511_v28  ;;  %v1548_v50 = vpop.permute.xlu2 %1547  ;;  %v1517_v48 = vsel %vm1516_vm1, %v1509_v14, %v1513_v30  ;;  %v1519_v38 = vsel %vm1516_vm1, %v1513_v30, %v1509_v14 }
 0x3e4   :  { %v1537_v7 = vmul.f32 %v4069_v56, %v1518_v43  ;;  %v1538_v16 = vmul.f32 %v4071_v53, %v1520_v18  ;;  %v1535_v8 = vmul.f32 %v4856_v58, %v1517_v48  ;;  %v1536_v4 = vmul.f32 %v4857_v54, %v1519_v38  ;;  %v4209_v17 = vld.sshfl [vmem:[#allocation1 + $0x20] sm:$0xff pattern:$0x73625140]  ;;  %v4858_v38 = vld [vmem:[#allocation89_spill] sm:$0xff] }
 0x3e5   :  { %vm2045_vm1 = vcmask 1041408  }
 0x3e6   :  { %v4173_v0 = vadd.f32 %v1537_v7, %v4053_v52  ;;  %v4176_v63 = vadd.f32 %v1538_v16, %v4056_v34  ;;  %v4179_v56 = vadd.f32 %v1535_v8, %v4047_v36  ;;  %v4182_v53 = vadd.f32 %v1536_v4, %v4050_v60 }
 0x3ea   :  { %v1544_v49 = vpop.permute.xlu1 %1543  ;;  %v1546_v52 = vpop.permute.xlu0 %1545 }
 0x3eb   :  { %v1552_v36 = vsel %vm1551_vm2, %v1544_v49, %v1548_v50  ;;  %v1554_v60 = vsel %vm1551_vm2, %v1548_v50, %v1544_v49  ;;  %v1581_v34 = vpop.permute.xlu2 %1580 }
 0x3ec   :  { %v1570_v14 = vmul.f32 %v3436_v10, %v1552_v36  ;;  %v1571_v15 = vmul.f32 %v3438_v27, %v1554_v60  ;;  %v4211_v10 = vld.sshfl [vmem:[#allocation1 + $0x28] sm:$0xff pattern:$0x73625140] }
 0x3ed   :  { %1703 = vst [vmem:[#allocation1 + $0x20] ss:$4 sm:$0xff] %v3610_v44 }
 0x3ee   :  { %v4198_v29 = vadd.f32 %v1570_v14, %v4081_v31  ;;  %v4201_v6 = vadd.f32 %v1571_v15, %v4084_v12 }
 0x3f2   :  { %v1550_v27 = vpop.permute.xlu1 %1549  ;;  %v1579_v31 = vpop.permute.xlu0 %1578 }
 0x3f3   :  { %v1553_v12 = vsel %vm1551_vm2, %v1546_v52, %v1550_v27  ;;  %v1555_v25 = vsel %vm1551_vm2, %v1550_v27, %v1546_v52  ;;  %v1614_v40 = vpop.permute.xlu2 %1613 }
 0x3f4   :  { %v1572_v9 = vmul.f32 %v4111_v22, %v1553_v12  ;;  %v1573_v28 = vmul.f32 %v4113_v55, %v1555_v25  ;;  %v4237_v8 = vld.sshfl [vmem:[#allocation1 + $0x20] sm:$0xff pattern:$0x73625140]  ;;  %v4239_v54 = vld.sshfl [vmem:[#allocation1 + $0x28] sm:$0xff pattern:$0x73625140] }
 0x3f5   :  { %1738 = vst [vmem:[#allocation1 + $0x20] ss:$4 sm:$0xff] %v3638_v26 }
 0x3f6   :  { %v4221_v30 = vadd.f32 %v1572_v9, %v4075_v57  ;;  %v4224_v43 = vadd.f32 %v1573_v28, %v4078_v45 }
 0x3fa   :  { %v1583_v44 = vpop.permute.xlu1 %1582  ;;  %v1585_v22 = vpop.permute.xlu0 %1584 }
 0x3fb   :  { %v1587_v55 = vsel %vm1586_vm3, %v1579_v31, %v1583_v44  ;;  %v1589_v57 = vsel %vm1586_vm3, %v1583_v44, %v1579_v31  ;;  %v1620_v18 = vpop.permute.xlu2 %1619  ;;  %v1588_v50 = vsel %vm1586_vm3, %v1581_v34, %v1585_v22  ;;  %v1590_v45 = vsel %vm1586_vm3, %v1585_v22, %v1581_v34 }
 0x3fc   :  { %v1605_v48 = vmul.f32 %v3508_v33, %v1587_v55  ;;  %v1606_v7 = vmul.f32 %v4858_v38, %v1589_v57  ;;  %v1607_v16 = vmul.f32 %v4139_v20, %v1588_v50  ;;  %v1608_v58 = vmul.f32 %v4141_v41, %v1590_v45  ;;  %v1739_v14 = vld.sshfl [vmem:[#allocation1 + $0x20] sm:$0xff pattern:$0x73625140]  ;;  %v1740_v15 = vld.sshfl [vmem:[#allocation1 + $0x28] sm:$0xff pattern:$0x73625140] }
 0x3fd   :  { %1773 = vst [vmem:[#allocation1 + $0x20] ss:$4 sm:$0xff] %v3663_v32 }
 0x3fe   :  { %v4243_v4 = vadd.f32 %v1605_v48, %v4100_v62  ;;  %v4246_v49 = vadd.f32 %v1606_v7, %v4103_v42  ;;  %v4249_v33 = vadd.f32 %v1607_v16, %v4123_v2  ;;  %v4252_v52 = vadd.f32 %v1608_v58, %v4126_v1  ;;  %v4859_v48 = vld [vmem:[#allocation86_spill] sm:$0xff] }
 0x402   :  { %v1616_v26 = vpop.permute.xlu1 %1615  ;;  %v1618_v62 = vpop.permute.xlu0 %1617 }
 0x403   :  { %v1623_v42 = vsel %vm1621_vm4, %v1616_v26, %v1620_v18  ;;  %v1625_v2 = vsel %vm1621_vm4, %v1620_v18, %v1616_v26  ;;  %v1653_v20 = vpop.permute.xlu2 %1652  ;;  %v1622_v41 = vsel %vm1621_vm4, %v1614_v40, %v1618_v62  ;;  %v1624_v1 = vsel %vm1621_vm4, %v1618_v62, %v1614_v40 }
 0x404   :  { %v1642_v36 = vmul.f32 %v4167_v5, %v1623_v42  ;;  %v1643_v60 = vmul.f32 %v4169_v39, %v1625_v2  ;;  %v1640_v34 = vmul.f32 %v3569_v19, %v1622_v41  ;;  %v1641_v59 = vmul.f32 %v3571_v51, %v1624_v1  ;;  %v4297_v24 = vld.sshfl [vmem:[#allocation1 + $0x20] sm:$0xff pattern:$0x73625140]  ;;  %v4299_v25 = vld.sshfl [vmem:[#allocation1 + $0x28] sm:$0xff pattern:$0x73625140] }
 0x405   :  { %1808 = vst [vmem:[#allocation1 + $0x20] ss:$4 sm:$0xff] %v3689_v46  ;;  %v4861_v2 = vld [vmem:[#allocation26_spill] sm:$0xff] }
 0x406   :  { %v4267_v27 = vadd.f32 %v1642_v36, %v4151_v61  ;;  %v4270_v31 = vadd.f32 %v1643_v60, %v4154_v47  ;;  %v4273_v12 = vadd.f32 %v1640_v34, %v4145_v35  ;;  %v4276_v5 = vadd.f32 %v1641_v59, %v4148_v3  ;;  %v4862_v34 = vld [vmem:[#allocation64_spill] sm:$0xff] }
 0x40a   :  { %v1649_v19 = vpop.permute.xlu1 %1648  ;;  %v1651_v51 = vpop.permute.xlu0 %1650 }
 0x40b   :  { %v1657_v32 = vsel %vm1656_vm5, %v1649_v19, %v1653_v20  ;;  %v1659_v35 = vsel %vm1656_vm5, %v1653_v20, %v1649_v19  ;;  %v1686_v3 = vpop.permute.xlu2 %1685 }
 0x40c   :  { %v1675_v61 = vmul.f32 %v3614_v11, %v1657_v32  ;;  %v1676_v47 = vmul.f32 %v3616_v13, %v1659_v35  ;;  %v1809_v16 = vld.sshfl [vmem:[#allocation1 + $0x20] sm:$0xff pattern:$0x73625140] }
 0x40e   :  { %v4292_v21 = vadd.f32 %v1675_v61, %v4179_v56  ;;  %v4295_v39 = vadd.f32 %v1676_v47, %v4182_v53 }
 0x412   :  { %v1655_v40 = vpop.permute.xlu1 %1654  ;;  %v1684_v9 = vpop.permute.xlu0 %1683 }
 0x413   :  { %v1658_v11 = vsel %vm1656_vm5, %v1651_v51, %v1655_v40  ;;  %v1660_v13 = vsel %vm1656_vm5, %v1655_v40, %v1651_v51  ;;  %v1719_v56 = vpop.permute.xlu2 %1718 }
 0x414   :  { %v1677_v53 = vmul.f32 %v4209_v17, %v1658_v11  ;;  %v1678_v28 = vmul.f32 %v4211_v10, %v1660_v13  ;;  %v4860_v17 = vld [vmem:[#allocation63_spill] sm:$0xff] }
 0x416   :  { %v4311_v44 = vadd.f32 %v1677_v53, %v4173_v0  ;;  %v4314_v46 = vadd.f32 %v1678_v28, %v4176_v63  ;;  %v1810_v63 = vld.sshfl [vmem:[#allocation1 + $0x28] sm:$0xff pattern:$0x73625140] }
 0x417   :  { %1843 = vst [vmem:[#allocation1 + $0x20] ss:$4 sm:$0xff] %v4861_v2 }
 0x41a   :  { %v1688_v37 = vpop.permute.xlu1 %1687  ;;  %v1690_v22 = vpop.permute.xlu0 %1689 }
 0x41b   :  { %v1692_v55 = vsel %vm1691_vm6, %v1684_v9, %v1688_v37  ;;  %v1694_v57 = vsel %vm1691_vm6, %v1688_v37, %v1684_v9  ;;  %v1725_v18 = vpop.permute.xlu2 %1724  ;;  %v1693_v50 = vsel %vm1691_vm6, %v1686_v3, %v1690_v22  ;;  %v1695_v45 = vsel %vm1691_vm6, %v1690_v22, %v1686_v3  ;;  %v4865_v9 = vld [vmem:[#allocation25_spill] sm:$0xff] }
 0x41c   :  { %v1710_v38 = vmul.f32 %v4859_v48, %v1692_v55  ;;  %v1711_v7 = vmul.f32 %v4860_v17, %v1694_v57  ;;  %v1712_v10 = vmul.f32 %v4237_v8, %v1693_v50  ;;  %v1713_v0 = vmul.f32 %v4239_v54, %v1695_v45  ;;  %v4867_v37 = vld [vmem:[#allocation105_spill] sm:$0xff] }
 0x41e   :  { %v4322_v58 = vadd.f32 %v1710_v38, %v4198_v29  ;;  %v4325_v26 = vadd.f32 %v1711_v7, %v4201_v6  ;;  %v4328_v62 = vadd.f32 %v1712_v10, %v4221_v30  ;;  %v4331_v42 = vadd.f32 %v1713_v0, %v4224_v43  ;;  %v4863_v30 = vld [vmem:[#allocation129_spill] sm:$0xff]  ;;  %v1844_v51 = vld.sshfl [vmem:[#allocation1 + $0x20] sm:$0xff pattern:$0x73625140] }
 0x41f   :  { %v1845_v43 = vld.sshfl [vmem:[#allocation1 + $0x28] sm:$0xff pattern:$0x73625140] }
 0x422   :  { %v1721_v8 = vpop.permute.xlu1 %1720  ;;  %v1723_v54 = vpop.permute.xlu0 %1722 }
 0x423   :  { %v1728_v20 = vsel %vm1726_vm7, %v1721_v8, %v1725_v18  ;;  %v1730_v41 = vsel %vm1726_vm7, %v1725_v18, %v1721_v8  ;;  %v1758_v1 = vpop.permute.xlu2 %1757  ;;  %v1727_v29 = vsel %vm1726_vm7, %v1719_v56, %v1723_v54  ;;  %v1729_v36 = vsel %vm1726_vm7, %v1723_v54, %v1719_v56  ;;  %v4868_v54 = vld [vmem:[#allocation13_spill] sm:$0xff] }
 0x424   :  { %v1747_v60 = vmul.f32 %v1739_v14, %v1728_v20  ;;  %v1748_v6 = vmul.f32 %v1740_v15, %v1730_v41  ;;  %v1745_v59 = vmul.f32 %v4862_v34, %v1727_v29  ;;  %v1746_v19 = vmul.f32 %v4863_v30, %v1729_v36  ;;  %v4864_v14 = vld [vmem:[#allocation81_spill] sm:$0xff]  ;;  %v4869_v41 = vld [vmem:[#allocation90_spill] sm:$0xff] }
 0x425   :  { %1878 = vst [vmem:[#allocation1 + $0x20] ss:$4 sm:$0xff] %v4864_v14  ;;  %v4870_v34 = vld [vmem:[#allocation34_spill] sm:$0xff] }
 0x426   :  { %v4338_v32 = vadd.f32 %v1747_v60, %v4249_v33  ;;  %v4341_v35 = vadd.f32 %v1748_v6, %v4252_v52  ;;  %v4344_v3 = vadd.f32 %v1745_v59, %v4243_v4  ;;  %v4347_v61 = vadd.f32 %v1746_v19, %v4246_v49  ;;  %v4866_v4 = vld [vmem:[#allocation128_spill] sm:$0xff] }
 0x42a   :  { %v1754_v15 = vpop.permute.xlu1 %1753  ;;  %v1756_v47 = vpop.permute.xlu0 %1755 }
 0x42b   :  { %v1762_v40 = vsel %vm1761_vm8, %v1754_v15, %v1758_v1  ;;  %v1764_v33 = vsel %vm1761_vm8, %v1758_v1, %v1754_v15  ;;  %v1791_v52 = vpop.permute.xlu2 %1790 }
 0x42c   :  { %v1780_v11 = vmul.f32 %v4865_v9, %v1762_v40  ;;  %v1781_v13 = vmul.f32 %v4866_v4, %v1764_v33  ;;  %v1879_v53 = vld.sshfl [vmem:[#allocation1 + $0x20] sm:$0xff pattern:$0x73625140]  ;;  %v1880_v28 = vld.sshfl [vmem:[#allocation1 + $0x28] sm:$0xff pattern:$0x73625140] }
 0x42d   :  { %1913 = vst [vmem:[#allocation1 + $0x20] ss:$4 sm:$0xff] %v4867_v37  ;;  %v4872_v4 = vld [vmem:[#allocation58_spill] sm:$0xff] }
 0x42e   :  { %v4358_v49 = vadd.f32 %v1780_v11, %v4273_v12  ;;  %v4361_v56 = vadd.f32 %v1781_v13, %v4276_v5 }
 0x432   :  { %v1760_v22 = vpop.permute.xlu1 %1759  ;;  %v1789_v55 = vpop.permute.xlu0 %1788 }
 0x433   :  { %v1763_v57 = vsel %vm1761_vm8, %v1756_v47, %v1760_v22  ;;  %v1765_v18 = vsel %vm1761_vm8, %v1760_v22, %v1756_v47  ;;  %v4368_v50 = vpop.permute.xlu2 %1823  ;;  %v4871_v47 = vld [vmem:[#allocation14_spill] sm:$0xff] }
 0x434   :  { %v1782_v12 = vmul.f32 %v4297_v24, %v1763_v57  ;;  %v1783_v45 = vmul.f32 %v4299_v25, %v1765_v18  ;;  %v1914_v25 = vld.sshfl [vmem:[#allocation1 + $0x20] sm:$0xff pattern:$0x73625140]  ;;  %v1915_v36 = vld.sshfl [vmem:[#allocation1 + $0x28] sm:$0xff pattern:$0x73625140] }
 0x435   :  { %1948 = vst [vmem:[#allocation1 + $0x20] ss:$4 sm:$0xff] %v4870_v34 }
 0x436   :  { %v1786_v5 = vadd.f32 %v1782_v12, %v4267_v27  ;;  %v1787_v48 = vadd.f32 %v1783_v45, %v4270_v31 }
 0x43a   :  { %v1793_v38 = vpop.permute.xlu1 %1792  ;;  %v1795_v17 = vpop.permute.xlu0 %1794 }
 0x43b   :  { %v1797_v7 = vsel %vm1796_vm9, %v1789_v55, %v1793_v38  ;;  %v1799_v10 = vsel %vm1796_vm9, %v1793_v38, %v1789_v55  ;;  %v1830_v0 = vpop.permute.xlu2 %1829  ;;  %v1798_v2 = vsel %vm1796_vm9, %v1791_v52, %v1795_v17  ;;  %v1800_v8 = vsel %vm1796_vm9, %v1795_v17, %v1791_v52 }
 0x43c   :  { %v1815_v20 = vmul.f32 %v4868_v54, %v1797_v7  ;;  %v1816_v1 = vmul.f32 %v4869_v41, %v1799_v10  ;;  %v1817_v24 = vmul.f32 %v1809_v16, %v1798_v2  ;;  %v1818_v29 = vmul.f32 %v1810_v63, %v1800_v8  ;;  %v4397_v19 = vld.sshfl [vmem:[#allocation1 + $0x20] sm:$0xff pattern:$0x73625140] }
 0x43e   :  { %v4378_v27 = vadd.f32 %v1815_v20, %v4292_v21  ;;  %v4381_v31 = vadd.f32 %v1816_v1, %v4295_v39  ;;  %v4384_v60 = vadd.f32 %v1817_v24, %v4311_v44  ;;  %v4387_v6 = vadd.f32 %v1818_v29, %v4314_v46  ;;  %v1950_v46 = vld.sshfl [vmem:[#allocation1 + $0x28] sm:$0xff pattern:$0x73625140]  ;;  %v4874_v20 = vld [vmem:[#allocation54_spill] sm:$0xff] }
 0x43f   :  { %1983 = vst [vmem:[#allocation1 + $0x20] ss:$4 sm:$0xff] %v4871_v47  ;;  %v4875_v24 = vld [vmem:[#allocation15_spill] sm:$0xff]  ;;  %v4878_v47 = vld [vmem:[#allocation66_spill] sm:$0xff] }
 0x442   :  { %v1826_v16 = vpop.permute.xlu1 %1825  ;;  %v1828_v63 = vpop.permute.xlu0 %1827 }
 0x443   :  { %v1833_v59 = vsel %vm1831_vm10, %v1826_v16, %v1830_v0  ;;  %v1835_v21 = vsel %vm1831_vm10, %v1830_v0, %v1826_v16  ;;  %v4395_v39 = vpop.permute.xlu2 %1862  ;;  %v1832_v0 = vsel %vm1831_vm10, %v4368_v50, %v1828_v63  ;;  %v1834_v2 = vsel %vm1831_vm10, %v1828_v63, %v4368_v50 }
 0x444   :  { %v1852_v30 = vmul.f32 %v1844_v51, %v1833_v59  ;;  %v1853_v44 = vmul.f32 %v1845_v43, %v1835_v21  ;;  %v1851_v41 = vmul.f32 %v4874_v20, %v1834_v2  ;;  %v4882_v20 = vld [vmem:[#allocation72_spill] sm:$0xff] }
 0x446   :  { %v4400_v14 = vadd.f32 %v1852_v30, %v4328_v62  ;;  %v4403_v15 = vadd.f32 %v1853_v44, %v4331_v42  ;;  %v1984_v9 = vld.sshfl [vmem:[#allocation1 + $0x20] sm:$0xff pattern:$0x73625140]  ;;  %v1985_v11 = vld.sshfl [vmem:[#allocation1 + $0x28] sm:$0xff pattern:$0x73625140]  ;;  %v1855_v21 = vadd.f32 %v1851_v41, %v4325_v26 }
 0x447   :  { %2018 = vst [vmem:[#allocation1 + $0x20] ss:$4 sm:$0xff] %v4872_v4  ;;  %v4877_v30 = vld [vmem:[#allocation65_spill] sm:$0xff] }
 0x44a   :  { %v1859_v40 = vpop.permute.xlu1 %1858  ;;  %v1861_v33 = vpop.permute.xlu0 %1860 }
 0x44b   :  { %v1896_v52 = vpop.permute.xlu2 %1895  ;;  %v1867_v26 = vsel %vm1866_vm11, %v1859_v40, %v4395_v39 }
 0x452   :  { %v1865_v51 = vpop.permute.xlu1 %1864  ;;  %v1894_v43 = vpop.permute.xlu0 %1893 }
 0x453   :  { %v1868_v62 = vsel %vm1866_vm11, %v1861_v33, %v1865_v51  ;;  %v1870_v42 = vsel %vm1866_vm11, %v1865_v51, %v1861_v33  ;;  %v1929_v22 = vpop.permute.xlu2 %1928 }
 0x454   :  { %v1887_v13 = vmul.f32 %v1879_v53, %v1868_v62  ;;  %v1888_v37 = vmul.f32 %v1880_v28, %v1870_v42 }
 0x456   :  { %v4413_v55 = vadd.f32 %v1887_v13, %v4338_v32  ;;  %v4416_v57 = vadd.f32 %v1888_v37, %v4341_v35 }
 0x45a   :  { %v1898_v18 = vpop.permute.xlu1 %1897  ;;  %v1900_v12 = vpop.permute.xlu0 %1899 }
 0x45b   :  { %v1903_v45 = vsel %vm1901_vm12, %v1896_v52, %v1900_v12  ;;  %v1905_v38 = vsel %vm1901_vm12, %v1900_v12, %v1896_v52  ;;  %v1935_v32 = vpop.permute.xlu2 %1934 }
 0x45c   :  { %v1922_v17 = vmul.f32 %v1914_v25, %v1903_v45  ;;  %v1923_v53 = vmul.f32 %v1915_v36, %v1905_v38  ;;  %v4876_v25 = vld [vmem:[#allocation57_spill] sm:$0xff] }
 0x45e   :  { %v4423_v28 = vadd.f32 %v1922_v17, %v1786_v5  ;;  %v4425_v7 = vadd.f32 %v1923_v53, %v1787_v48  ;;  %v4873_v48 = vld [vmem:[#allocation53_spill] sm:$0xff] }
 0x45f   :  { %v1850_v54 = vmul.f32 %v4873_v48, %v1832_v0  ;;  %v4880_v0 = vld [vmem:[#allocation33_spill] sm:$0xff]  ;;  %v4881_v48 = vld [vmem:[#allocation71_spill] sm:$0xff] }
 0x461   :  { %v1854_v59 = vadd.f32 %v1850_v54, %v4322_v58 }
 0x462   :  { %v1931_v10 = vpop.permute.xlu1 %1930  ;;  %v1933_v35 = vpop.permute.xlu0 %1932 }
 0x463   :  { %v1937_v8 = vsel %vm1936_vm13, %v1929_v22, %v1933_v35  ;;  %v1939_v5 = vsel %vm1936_vm13, %v1933_v35, %v1929_v22  ;;  %v1968_v1 = vpop.permute.xlu2 %1967  ;;  %v1938_v42 = vsel %vm1936_vm13, %v1931_v10, %v1935_v32  ;;  %v1940_v13 = vsel %vm1936_vm13, %v1935_v32, %v1931_v10  ;;  %v4879_v10 = vld [vmem:[#allocation100_spill] sm:$0xff] }
 0x464   :  { %v1955_v29 = vmul.f32 %v4875_v24, %v1937_v8  ;;  %v1956_v36 = vmul.f32 %v4876_v25, %v1939_v5  ;;  %v1958_v22 = vmul.f32 %v1950_v46, %v1940_v13  ;;  %v1885_v35 = vmul.f32 %v4879_v10, %v1867_v26  ;;  %v2019_v24 = vld.sshfl [vmem:[#allocation1 + $0x20] sm:$0xff pattern:$0x73625140]  ;;  %v2016_v25 = vld.sshfl [vmem:[#allocation1 + $0x8] sm:$0xff pattern:$0x73625140] }
 0x466   :  { %v1959_v52 = vadd.f32 %v1955_v29, %v4378_v27  ;;  %v1960_v4 = vadd.f32 %v1956_v36, %v4381_v31  ;;  %v1869_v27 = vsel %vm1866_vm11, %v4395_v39, %v1859_v40  ;;  %v1957_v31 = vmul.f32 %v4397_v19, %v1938_v42  ;;  %v2020_v29 = vld.sshfl [vmem:[#allocation1 + $0x28] sm:$0xff pattern:$0x73625140] }
 0x467   :  { %v1886_v2 = vmul.f32 %v4880_v0, %v1869_v27  ;;  %v1902_v39 = vsel %vm1901_vm12, %v1894_v43, %v1898_v18  ;;  %v1904_v19 = vsel %vm1901_vm12, %v1898_v18, %v1894_v43  ;;  %v1962_v40 = vadd.f32 %v1958_v22, %v4387_v6 }
 0x468   :  { %v1961_v46 = vadd.f32 %v1957_v31, %v4384_v60  ;;  %v1920_v54 = vmul.f32 %v4881_v48, %v1902_v39  ;;  %v1921_v41 = vmul.f32 %v4882_v20, %v1904_v19  ;;  %v1889_v43 = vadd.f32 %v1885_v35, %v4344_v3 }
 0x469   :  { %v1890_v60 = vadd.f32 %v1886_v2, %v4347_v61 }
 0x46a   :  { %v1964_v34 = vpop.permute.xlu1 %1963  ;;  %v1966_v16 = vpop.permute.xlu0 %1965 }
 0x46b   :  { %v1972_v50 = vsel %vm1971_vm14, %v1964_v34, %v1968_v1  ;;  %v1974_v63 = vsel %vm1971_vm14, %v1968_v1, %v1964_v34  ;;  %v2001_v1 = vpop.permute.xlu2 %2000 }
 0x46c   :  { %v1990_v44 = vmul.f32 %v4877_v30, %v1972_v50  ;;  %v1991_v33 = vmul.f32 %v4878_v47, %v1974_v63  ;;  %v1925_v30 = vadd.f32 %v1921_v41, %v4361_v56 }
 0x46e   :  { %v1994_v51 = vadd.f32 %v1990_v44, %v1854_v59  ;;  %v1995_v62 = vadd.f32 %v1991_v33, %v1855_v21  ;;  %v1924_v21 = vadd.f32 %v1920_v54, %v4358_v49 }
 0x470   :  { %v2037_v37 = vadd.f32 %v1994_v51, %v1959_v52  ;;  %v2038_v58 = vadd.f32 %v1995_v62, %v1960_v4 }
 0x472   :  { %v1970_v12 = vpop.permute.xlu1 %1969  ;;  %v1999_v45 = vpop.permute.xlu0 %1998 }
 0x473   :  { %v1973_v38 = vsel %vm1971_vm14, %v1966_v16, %v1970_v12  ;;  %v1975_v17 = vsel %vm1971_vm14, %v1970_v12, %v1966_v16 }
 0x474   :  { %v1992_v53 = vmul.f32 %v1984_v9, %v1973_v38  ;;  %v1993_v32 = vmul.f32 %v1985_v11, %v1975_v17 }
 0x476   :  { %v1996_v8 = vadd.f32 %v1992_v53, %v4400_v14  ;;  %v1997_v5 = vadd.f32 %v1993_v32, %v4403_v15  ;;  %v2015_v14 = vld.sshfl [vmem:[#allocation1] sm:$0xff pattern:$0x73625140] }
 0x478   :  { %v2039_v9 = vadd.f32 %v1996_v8, %v1961_v46  ;;  %v2040_v11 = vadd.f32 %v1997_v5, %v1962_v40  ;;  %v2075_v40 = vstv %s4524_s6  ;;  %s2421_s6 = smov [#allocation8]  }
 0x479   :  { %s2174_s16 = sshll.u32 %s2421_s6, 4  ;;  %s2175_s16 = int_to_ptr.vmem [resolvable:$true] %s2174_s16 }
 0x47a   :  { %v2003_v6 = vpop.permute.xlu1 %2002  ;;  %v2005_v18 = vpop.permute.xlu0 %2004 }
 0x47b   :  { %v2007_v15 = vsel %vm2006_vm15, %v1999_v45, %v2003_v6  ;;  %v2009_v36 = vsel %vm2006_vm15, %v2003_v6, %v1999_v45  ;;  %v2008_v34 = vsel %vm2006_vm15, %v2001_v1, %v2005_v18  ;;  %v2010_v16 = vsel %vm2006_vm15, %v2005_v18, %v2001_v1 }
 0x47c   :  { %v2025_v23 = vmul.f32 %v2015_v14, %v2007_v15  ;;  %v2026_v50 = vmul.f32 %v2016_v25, %v2009_v36  ;;  %v2027_v63 = vmul.f32 %v2019_v24, %v2008_v34  ;;  %v2028_v59 = vmul.f32 %v2020_v29, %v2010_v16 }
 0x47e   :  { %v2029_v44 = vadd.f32 %v2025_v23, %v1889_v43  ;;  %v2030_v3 = vadd.f32 %v2026_v50, %v1890_v60  ;;  %v2031_v61 = vadd.f32 %v2027_v63, %v4413_v55  ;;  %v2032_v47 = vadd.f32 %v2028_v59, %v4416_v57 }
 0x480   :  { %v2033_v33 = vadd.f32 %v2029_v44, %v1924_v21  ;;  %v2034_v52 = vadd.f32 %v2030_v3, %v1925_v30  ;;  %v2035_v4 = vadd.f32 %v2031_v61, %v4423_v28  ;;  %v2036_v51 = vadd.f32 %v2032_v47, %v4425_v7 }
 0x482   :  { %v2041_v62 = vadd.f32 %v2037_v37, %v2033_v33  ;;  %v2042_v42 = vadd.f32 %v2038_v58, %v2034_v52  ;;  %v2043_v13 = vadd.f32 %v2039_v9, %v2035_v4  ;;  %v2044_v26 = vadd.f32 %v2040_v11, %v2036_v51 }
 0x484   :  { %v2046_v49 = vsel %vm2045_vm1, %v2041_v62, 0.0  ;;  %v2053_v27 = vsel %vm2045_vm1, %v2042_v42, 0.0  ;;  %v2060_v56 = vsel %vm2045_vm1, %v2043_v13, 0.0  ;;  %v2067_v31 = vsel %vm2045_vm1, %v2044_v26, 0.0 }
 0x485   :  { %v2047_v22 = vrot.slane %v2046_v49, 4  ;;  %v2054_v12 = vrot.slane %v2053_v27, 4  ;;  %v2061_v55 = vrot.slane %v2060_v56, 4  ;;  %v2068_v45 = vrot.slane %v2067_v31, 4 }
 0x487   :  { %v2048_v57 = vadd.f32 %v2047_v22, %v2046_v49  ;;  %v2055_v38 = vadd.f32 %v2054_v12, %v2053_v27  ;;  %v2062_v17 = vadd.f32 %v2061_v55, %v2060_v56  ;;  %v2069_v53 = vadd.f32 %v2068_v45, %v2067_v31 }
 0x489   :  { %v2049_v28 = vrot.slane %v2048_v57, 2  ;;  %v2056_v32 = vrot.slane %v2055_v38, 2  ;;  %v2063_v7 = vrot.slane %v2062_v17, 2  ;;  %v2070_v10 = vrot.slane %v2069_v53, 2 }
 0x48b   :  { %v2050_v37 = vadd.f32 %v2049_v28, %v2048_v57  ;;  %v2057_v58 = vadd.f32 %v2056_v32, %v2055_v38  ;;  %v2064_v35 = vadd.f32 %v2063_v7, %v2062_v17  ;;  %v2071_v0 = vadd.f32 %v2070_v10, %v2069_v53 }
 0x48d   :  { %v2051_v2 = vrot.slane %v2050_v37, 1  ;;  %v2058_v39 = vrot.slane %v2057_v58, 1  ;;  %v2065_v19 = vrot.slane %v2064_v35, 1  ;;  %v2072_v46 = vrot.slane %v2071_v0, 1 }
 0x48f   :  { %v2052_v8 = vadd.f32 %v2051_v2, %v2050_v37  ;;  %v2059_v5 = vadd.f32 %v2058_v39, %v2057_v58  ;;  %v2066_v9 = vadd.f32 %v2065_v19, %v2064_v35  ;;  %v2073_v11 = vadd.f32 %v2072_v46, %v2071_v0 }
 0x491   :  { %v2076_v48 = vadd.f32 %v2075_v40, %v2052_v8  ;;  %v2077_v54 = vadd.f32 %v2075_v40, %v2059_v5  ;;  %v2078_v20 = vadd.f32 %v2075_v40, %v2066_v9  ;;  %v2079_v41 = vadd.f32 %v2075_v40, %v2073_v11  ;;  %v4887_v5 = vld [vmem:[#allocation49_spill] sm:$0xff] }
 0x493   :  { %v2192_v1 = vmul.f32 -1.442695, %v2076_v48  ;;  %v2193_v24 = vmul.f32 -1.442695, %v2077_v54  ;;  %v2194_v29 = vmul.f32 -1.442695, %v2078_v20 }
 0x494   :  { %v2195_v43 = vmul.f32 -1.442695, %v2079_v41  ;;  %v4888_v48 = vld [vmem:[#allocation52_spill] sm:$0xff] }
 0x495   :  { %2269 = vpow2.f32 %v2192_v1 }
 0x496   :  { %2271 = vpow2.f32 %v2193_v24 }
 0x497   :  { %2273 = vpow2.f32 %v2194_v29 }
 0x498   :  { %2275 = vpow2.f32 %v2195_v43 }
 0x49b   :  { %v2270_v60 = vpop.eup %2269 }
 0x49c   :  { %v2272_v6 = vpop.eup %2271  ;;  %v2092_v18 = vadd.f32 1.0, %v2270_v60 }
 0x49d   :  { %v2274_v14 = vpop.eup %2273  ;;  %v2093_v25 = vadd.f32 1.0, %v2272_v6 }
 0x49e   :  { %v2276_v15 = vpop.eup %2275  ;;  %2277 = vrcp.f32 %v2092_v18  ;;  %v2094_v36 = vadd.f32 1.0, %v2274_v14  ;;  %vm2101_vm2 = vweird.f32 %v2092_v18  ;;  %v2105_v59 = vand.u32 2147483647, %v2092_v18 }
 0x49f   :  { %2279 = vrcp.f32 %v2093_v25  ;;  %v2095_v34 = vadd.f32 1.0, %v2276_v15  ;;  %v2107_v3 = vand.u32 2147483648, %v2092_v18  ;;  %vm2116_vm3 = vweird.f32 %v2093_v25 }
 0x4a0   :  { %2281 = vrcp.f32 %v2094_v36  ;;  %v2120_v33 = vand.u32 2147483647, %v2093_v25  ;;  %v2122_v52 = vand.u32 2147483648, %v2093_v25  ;;  %vm2131_vm5 = vweird.f32 %v2094_v36 }
 0x4a1   :  { %2283 = vrcp.f32 %v2095_v34  ;;  %v2135_v13 = vand.u32 2147483647, %v2094_v36  ;;  %v2152_v56 = vand.u32 2147483648, %v2095_v34  ;;  %v2150_v55 = vand.u32 2147483647, %v2095_v34 }
 0x4a2   :  { %vm2121_vm11 = vcmp.eq.f32.partialorder %v2120_v33, 8.507059e+37  ;;  %v2123_v45 = vor.u32 1.1754944e-38, %v2122_v52  ;;  %v2137_v38 = vand.u32 2147483648, %v2094_v36  ;;  %vm2146_vm13 = vweird.f32 %v2095_v34 }
 0x4a3   :  { %vm2106_vm14 = vcmp.eq.f32.partialorder %v2105_v59, 8.507059e+37  ;;  %v2108_v7 = vor.u32 1.1754944e-38, %v2107_v3  ;;  %v2153_v37 = vor.u32 1.1754944e-38, %v2152_v56  ;;  %vm2151_vm1 = vcmp.eq.f32.partialorder %v2150_v55, 8.507059e+37 }
 0x4a4   :  { %v2278_v16 = vpop.eup %2277  ;;  %v2138_v39 = vor.u32 1.1754944e-38, %v2137_v38 }
 0x4a5   :  { %v2280_v23 = vpop.eup %2279  ;;  %v2097_v50 = vmul.f32 %v2278_v16, %v2092_v18  ;;  %vm2102_vm4 = vweird.f32 %v2278_v16 }
 0x4a6   :  { %v2282_v63 = vpop.eup %2281  ;;  %v2112_v21 = vmul.f32 %v2280_v23, %v2093_v25  ;;  %vm2117_vm6 = vweird.f32 %v2280_v23  ;;  %vm4493_vm8 = vmor %vm2101_vm2, %vm2102_vm4  ;;  %vm2136_vm2 = vcmp.eq.f32.partialorder %v2135_v13, 8.507059e+37 }
 0x4a7   :  { %v2284_v30 = vpop.eup %2283  ;;  %v2098_v44 = vsub.f32 1.0, %v2097_v50  ;;  %v2127_v61 = vmul.f32 %v2282_v63, %v2094_v36  ;;  %vm2132_vm7 = vweird.f32 %v2282_v63  ;;  %vm2118_vm10 = vmor %vm2116_vm3, %vm2117_vm6 }
 0x4a8   :  { %v2113_v47 = vsub.f32 1.0, %v2112_v21  ;;  %v2142_v4 = vmul.f32 %v2284_v30, %v2095_v34  ;;  %vm2147_vm9 = vweird.f32 %v2284_v30  ;;  %vm4501_vm12 = vmor %vm2131_vm5, %vm2132_vm7 }
 0x4a9   :  { %v2099_v51 = vmul.f32 %v2278_v16, %v2098_v44  ;;  %v2128_v62 = vsub.f32 1.0, %v2127_v61  ;;  %vm2148_vm15 = vmor %vm2146_vm13, %vm2147_vm9 }
 0x4aa   :  { %v2114_v42 = vmul.f32 %v2280_v23, %v2113_v47  ;;  %v2143_v26 = vsub.f32 1.0, %v2142_v4 }
 0x4ab   :  { %v2100_v49 = vadd.f32 %v2278_v16, %v2099_v51  ;;  %v2129_v27 = vmul.f32 %v2282_v63, %v2128_v62 }
 0x4ac   :  { %v2115_v22 = vadd.f32 %v2280_v23, %v2114_v42  ;;  %v2144_v12 = vmul.f32 %v2284_v30, %v2143_v26 }
 0x4ad   :  { %v2130_v57 = vadd.f32 %v2282_v63, %v2129_v27  ;;  %v2104_v17 = vsel %vm4493_vm8, %v2278_v16, %v2100_v49 }
 0x4ae   :  { %v2119_v53 = vsel %vm2118_vm10, %v2280_v23, %v2115_v22  ;;  %v2145_v32 = vadd.f32 %v2284_v30, %v2144_v12  ;;  %v2109_v2 = vsel %vm2106_vm14, %v2108_v7, %v2104_v17 }
 0x4af   :  { %v2124_v10 = vsel %vm2121_vm11, %v2123_v45, %v2119_v53  ;;  %v2134_v58 = vsel %vm4501_vm12, %v2282_v63, %v2130_v57 }
 0x4b0   :  { %v2149_v35 = vsel %vm2148_vm15, %v2284_v30, %v2145_v32  ;;  %v2160_v0 = vrot.slane %v2124_v10, 4  ;;  %v2139_v8 = vsel %vm2136_vm2, %v2138_v39, %v2134_v58 }
 0x4b1   :  { %v2154_v19 = vsel %vm2151_vm1, %v2153_v37, %v2149_v35 }
 0x4b2   :  { %v2161_v46 = vrot.slane %v2154_v19, 4  ;;  %v2162_v40 = vsel %vm75_vm0, %v2109_v2, %v2160_v0 }
 0x4b3   :  { %v2166_v9 = vmul.f32 %v2162_v40, %v4887_v5 }
 0x4b4   :  { %v2163_v11 = vsel %vm75_vm0, %v2139_v8, %v2161_v46 }
 0x4b5   :  { %v2167_v54 = vmul.f32 %v2163_v11, %v4888_v48  ;;  %2168 = vst [vmem:[#allocation8] sm:$0xff] %v2166_v9 }
 0x4b7   :  { %2169 = vst [vmem:[#allocation8 + $0x8] sm:$0xff] %v2167_v54 }
 0x4b8   :  { %2182 = dma.vmem_to_hbm [thread:$0]  %s2175_s16, 256, %s2177_s3, [#allocation5], %s2364_s9, %s2364_s9, %s2365_s10  }
 0x4b9   :  { %2361 = dma.done.wait [#allocation5], 256  }
 0x4ba   :  { %2362 = vsyncadd [#allocation5], 4294967040 }
 0x4bb   :  { %2187 = vsyncpa [#allocation4], 1 }
 0x4bc   :  { %2188 = vsyncpa [#allocation7], 1 }
 0x4bd   :  { %2189 = vsyncpa [#allocation5], 1 }

</bundles_post_ra>
